<compile_context>
chip_gen: v6e
topology: v6e:2x2x1
jax: 0.10.0
libtpu: 0.0.40
codegen_flags: <defaults>
</compile_context>

<pallas_src>
import functools
import math

import jax
import jax.numpy as jnp
from jax.experimental import pallas as pl
from jax.experimental.pallas import tpu as pltpu


# --------------------------- in-kernel helpers -------------------------------
def _zero_halo(ref, h, w):
    """Zero only the 1-wide halo rows/cols of a (h+2, w+2, C) padded scratch."""
    c = ref.shape[-1]
    zr = jnp.zeros((1, w + 2, c), ref.dtype)
    zc = jnp.zeros((h + 2, 1, c), ref.dtype)
    ref[0:1, :, :] = zr
    ref[h + 1:h + 2, :, :] = zr
    ref[:, 0:1, :] = zc
    ref[:, w + 1:w + 2, :] = zc


def _cols_every_s(ref, start, n, s):
    """ref[:, start::s, :] (n columns) -> strided sublane read when s > 1."""
    if s == 1:
        return ref[:, start:start + n, :]
    return ref[:, pl.ds(start, n, s), :]


def _rows_every_s(a, start, s, n):
    """a[start : start + s*n : s] along axis 0, using only a leading-dim
    reshape + unit-stride slicing (no strided vector ops)."""
    a = a[start:start + s * n]
    if s == 1:
        return a
    return a.reshape(n, s, *a.shape[1:])[:, 0]


# ------------------------------- kernel --------------------------------------
def _bottleneck_ir_kernel(*refs, H, W, Cin, D, S, conv_shortcut):
    if conv_shortcut:
        (x_ref, bn1s_ref, bn1b_ref, w1_ref, alpha_ref, w2_ref, bn2b_ref,
         wsc_ref, bnscb_ref, o_ref, *scratch) = refs
    else:
        (x_ref, bn1s_ref, bn1b_ref, w1_ref, alpha_ref, w2_ref, bn2b_ref,
         o_ref, *scratch) = refs
        wsc_ref = bnscb_ref = None
    if S > 1:
        pad1, pad2, xstage = scratch
    else:
        pad1, pad2 = scratch
        xstage = None

    Ho, Wo = H // S, W // S
    x = x_ref[0]                                       # (H, W, Cin), caller dtype

    # ---- shortcut branch -----------------------------------------------------
    if S > 1:
        # Row subsample on the value (leading-dim reshape trick), then stage
        # only (Ho, W, Cin) -- S x smaller than a full-image copy -- so the
        # stride-S column pick is a plain strided sublane read on an unpacked
        # 32-bit ref.
        xr = _rows_every_s(x, 0, S, Ho)                # (Ho, W, Cin)
        xstage[...] = xr.astype(jnp.float32)
        xs = _cols_every_s(xstage, 0, Wo, S)           # (Ho, Wo, Cin)
    else:
        xs = x.astype(jnp.float32)                     # (H, W, Cin)
    xs = xs.reshape(Ho * Wo, Cin)
    if conv_shortcut:
        # Conv1x1 stride S; BNsc scale pre-folded into wsc, only bias here.
        sc = jnp.dot(xs.astype(jnp.bfloat16), wsc_ref[...],
                     preferred_element_type=jnp.float32) + bnscb_ref[...]
    else:
        sc = xs                                        # MaxPool2d(1, S) == subsample (exact f32)

    # ---- residual branch -----------------------------------------------------
    # BN1 (eval mode, folded running stats), f32 math.
    y = x.astype(jnp.float32) * bn1s_ref[...] + bn1b_ref[...]

    # conv1 padded input (bf16 scratch = MXU operand dtype).  Halo re-zeroed
    # every step: gating on program_id==0 is unsafe when the batch axis is
    # megacore-partitioned (each core has its own scratch and only one core
    # ever sees step 0).
    _zero_halo(pad1, H, W)
    pad1[1:H + 1, 1:W + 1, :] = y.astype(pad1.dtype)

    # conv1: 3x3, stride 1.  Per kh, the three kw-shifted slices are fused
    # into one (H*W, 3*Cin) patch -> K = 3*Cin matmul (partial im2col):
    # 3x fewer MXU passes and 3x fewer accumulator read-modify-writes.
    p1 = pad1[...]
    acc1 = jnp.zeros((H * W, D), jnp.float32)
    for kh in range(3):
        slab = p1[kh:kh + H]                            # (H, W+2, Cin) bf16
        patch = jnp.concatenate([slab[:, kw:kw + W, :] for kw in range(3)],
                                axis=-1)                # (H, W, 3*Cin)
        acc1 = acc1 + jnp.dot(patch.reshape(H * W, 3 * Cin), w1_ref[kh],
                              preferred_element_type=jnp.float32)

    # PReLU with per-channel alpha (f32).
    a1 = acc1.reshape(H, W, D)
    a1 = jnp.where(a1 >= 0, a1, a1 * alpha_ref[...])

    # conv2 padded input (f32 scratch so the stride-S column reads stay on the
    # well-supported unpacked 32-bit path).
    _zero_halo(pad2, H, W)
    pad2[1:H + 1, 1:W + 1, :] = a1

    # conv2: 3x3, stride S folded into the patch extraction.  Stride-S columns
    # are read once per kw (hoisted), rows use the leading-dim reshape trick,
    # and per kh the three kw taps are fused into one K = 3*D matmul.
    cols = [_cols_every_s(pad2, kw, Wo, S) for kw in range(3)]   # 3 x (H+2, Wo, D)
    acc2 = jnp.zeros((Ho * Wo, D), jnp.float32)
    for kh in range(3):
        patch = jnp.concatenate([_rows_every_s(cols[kw], kh, S, Ho)
                                 for kw in range(3)], axis=-1)   # (Ho, Wo, 3*D)
        patch = patch.reshape(Ho * Wo, 3 * D).astype(jnp.bfloat16)
        acc2 = acc2 + jnp.dot(patch, w2_ref[kh],
                              preferred_element_type=jnp.float32)
    res = acc2 + bn2b_ref[...]                          # BN2 scale pre-folded into w2

    # Store the flat (Ho*Wo, D) slab directly (no in-kernel output reshape);
    # the wrapper's NHWC reshape of contiguous memory is free.
    # TODO(synk): lane-dense (Ho, Wo*D) output slab when D < 128 at real sizes.
    o_ref[0] = (res + sc).astype(o_ref.dtype)


# ---------------------------- VMEM budgeting ----------------------------------
def _physical_vmem_bytes():
    try:
        return int(pltpu.get_tpu_info().vmem_capacity_bytes)
    except Exception:
        return 64 * 1024 * 1024          # assume the tightest budget (v7x per-core)


def _derive_vmem_limit(per_step_bytes, const_bytes, scratch_bytes, work_bytes):
    """Buffer-math-derived VMEM budget instead of a flat constant."""
    phys = _physical_vmem_bytes()
    cap = (phys * 3) // 4                # leave >= 25% for compiler scratch / spills
    want = (2 * per_step_bytes           # double-buffered per-step blocks (x, out)
            + 2 * const_bytes            # worst case: constants double-buffered too
            + scratch_bytes              # explicit VMEM scratches
            + work_bytes                 # in-kernel temporaries (patches, accs)
            + (4 << 20))                 # fixed headroom
    floor = min(32 << 20, cap)
    return int(max(min(want, cap), floor))


# ------------------------------- wrappers -------------------------------------
def bottleneck_ir_pallas_nhwc(x_nhwc, p, stride, out_dtype=None):
    """Native NHWC entry point: (N, H, W, Cin) -> (N, Ho, Wo, D)."""
    N, H, W, Cin = x_nhwc.shape
    D = p["w1"].shape[-1]
    conv_shortcut = "wsc" in p
    S = int(stride)
    assert H % S == 0 and W % S == 0, "stride must divide the spatial dims"
    Ho, Wo = H // S, W // S
    if out_dtype is None:
        out_dtype = x_nhwc.dtype         # pass bf16 downstream by setting out_dtype

    cdt = jnp.bfloat16                   # MXU operand dtype (f32 accumulation)

    # Host-side (weight-sized, one-time) prep:
    #  * BN2 / BNsc scales folded into the conv weights in f32, then cast.
    #  * 3x3 weights pre-reshaped to (3, 3*C, D) so each kh is one fused
    #    K = 3*C matmul in-kernel.
    #  * x is NOT cast here (DMA'd in caller dtype, cast at the MXU in-kernel).
    w1 = p["w1"].astype(cdt).reshape(3, 3 * Cin, D)
    w2 = (p["w2"] * p["bn2_scale"]).astype(cdt).reshape(3, 3 * D, D)

    inputs = [
        x_nhwc,
        p["bn1_scale"].reshape(1, Cin).astype(jnp.float32),
        p["bn1_bias"].reshape(1, Cin).astype(jnp.float32),
        w1,
        p["alpha"].reshape(1, D).astype(jnp.float32),
        w2,
        p["bn2_bias"].reshape(1, D).astype(jnp.float32),
    ]
    const_shapes = [(1, Cin), (1, Cin), (3, 3 * Cin, D), (1, D),
                    (3, 3 * D, D), (1, D)]
    if conv_shortcut:
        wsc = (p["wsc"] * p["bnsc_scale"]).astype(cdt)
        inputs += [wsc, p["bnsc_bias"].reshape(1, D).astype(jnp.float32)]
        const_shapes += [(Cin, D), (1, D)]

    scratch_shapes = [
        pltpu.VMEM((H + 2, W + 2, Cin), cdt),           # conv1 padded input (bf16)
        pltpu.VMEM((H + 2, W + 2, D), jnp.float32),     # conv2 padded input (f32)
    ]
    if S > 1:
        scratch_shapes.append(pltpu.VMEM((Ho, W, Cin), jnp.float32))  # shortcut staging

    kernel = functools.partial(_bottleneck_ir_kernel, H=H, W=W, Cin=Cin, D=D,
                               S=S, conv_shortcut=conv_shortcut)

    # ---- VMEM budget from actual buffer math ----
    per_step = (H * W * Cin * jnp.dtype(x_nhwc.dtype).itemsize
                + Ho * Wo * D * jnp.dtype(out_dtype).itemsize)
    const_b = sum(int(a.size) * a.dtype.itemsize for a in inputs[1:])
    scratch_b = ((H + 2) * (W + 2) * Cin * 2 + (H + 2) * (W + 2) * D * 4
                 + (Ho * W * Cin * 4 if S > 1 else 0))
    work_b = (H * W * (3 * Cin * 2 + D * 4)             # conv1 patch + f32 acc1
              + (H + 2) * Wo * D * 4 * 3                # hoisted strided column slabs
              + Ho * Wo * (3 * D * 6 + D * 4))          # conv2 patch (f32+bf16) + acc2
    vmem_limit = _derive_vmem_limit(per_step, const_b, scratch_b, work_b)

    def build(single_buffer_consts):
        extra = {}
        if single_buffer_consts:
            # Grid-invariant operands: single-buffer to save VMEM (esp. v7x).
            extra = dict(pipeline_mode=pl.Buffered(1))

        def const_spec(shape):
            nd = len(shape)
            return pl.BlockSpec(shape, lambda n, _nd=nd: (0,) * _nd, **extra)

        in_specs = [pl.BlockSpec((1, H, W, Cin), lambda n: (n, 0, 0, 0))]
        in_specs += [const_spec(s) for s in const_shapes]

        return pl.pallas_call(
            kernel,
            out_shape=jax.ShapeDtypeStruct((N, Ho * Wo, D), out_dtype),
            grid_spec=pltpu.PrefetchScalarGridSpec(
                num_scalar_prefetch=0,
                grid=(N,),
                in_specs=in_specs,
                out_specs=pl.BlockSpec((1, Ho * Wo, D), lambda n: (n, 0, 0)),
                scratch_shapes=scratch_shapes,
            ),
            compiler_params=pltpu.CompilerParams(
                dimension_semantics=("parallel",),
                vmem_limit_bytes=vmem_limit),
        )

    try:
        out2d = build(True)(*inputs)
    except Exception:
        # pl.Buffered(1) single-buffering unavailable on this jax build:
        # fall back to default double-buffered constants (same semantics).
        out2d = build(False)(*inputs)

    # (N, Ho*Wo, D) -> (N, Ho, Wo, D): free relabel of contiguous NHWC memory.
    return out2d.reshape(N, Ho, Wo, D)


def bottleneck_ir_pallas_nchw(x_nchw, p, stride):
    """Thin NCHW adapter for PyTorch-shaped tensors (transposes only here)."""
    x_nhwc = jnp.transpose(x_nchw, (0, 2, 3, 1))
    out = bottleneck_ir_pallas_nhwc(x_nhwc, p, stride)
    return jnp.transpose(out, (0, 3, 1, 2))


# ----------------------------- reference ------------------------------------
def bottleneck_ir_reference_nhwc(x_nhwc, p, stride, compute_dtype=jnp.bfloat16):
    """Pure-JAX reference mirroring the kernel's precision strategy:
    BN scales folded into conv weights before the compute_dtype cast,
    compute_dtype conv operands, float32 accumulation, f32 identity shortcut.
    With compute_dtype=float32 it is full-precision eval-mode semantics."""
    prec = jax.lax.Precision.HIGHEST
    f32 = jnp.float32
    x = x_nhwc.astype(f32)
    y = x * p["bn1_scale"] + p["bn1_bias"]
    c1 = jax.lax.conv_general_dilated(
        y.astype(compute_dtype), p["w1"].astype(compute_dtype),
        (1, 1), ((1, 1), (1, 1)),
        dimension_numbers=("NHWC", "HWIO", "NHWC"),
        preferred_element_type=f32, precision=prec)
    a = jnp.where(c1 >= 0, c1, c1 * p["alpha"])
    w2f = (p["w2"] * p["bn2_scale"]).astype(compute_dtype)
    c2 = jax.lax.conv_general_dilated(
        a.astype(compute_dtype), w2f, (stride, stride), ((1, 1), (1, 1)),
        dimension_numbers=("NHWC", "HWIO", "NHWC"),
        preferred_element_type=f32, precision=prec)
    res = c2 + p["bn2_bias"]
    xs = x[:, ::stride, ::stride, :]
    if "wsc" in p:
        wscf = (p["wsc"] * p["bnsc_scale"]).astype(compute_dtype)[None, None]
        sc = jax.lax.conv_general_dilated(
            xs.astype(compute_dtype), wscf, (1, 1), "VALID",
            dimension_numbers=("NHWC", "HWIO", "NHWC"),
            preferred_element_type=f32, precision=prec)
        sc = sc + p["bnsc_bias"]
    else:
        sc = xs
    return res + sc


# ----------------------------- param init -----------------------------------
def _fold_bn(gamma, beta, mean, var, eps=1e-5):
    scale = gamma / jnp.sqrt(var + eps)
    return scale, beta - mean * scale


def init_params(key, in_channel, depth):
    ks = jax.random.split(key, 12)
    p = {}
    g1 = 1.0 + 0.1 * jax.random.normal(ks[0], (in_channel,))
    b1 = 0.1 * jax.random.normal(ks[1], (in_channel,))
    m1 = 0.1 * jax.random.normal(ks[2], (in_channel,))
    v1 = 1.0 + 0.1 * jax.random.uniform(ks[3], (in_channel,))
    p["bn1_scale"], p["bn1_bias"] = _fold_bn(g1, b1, m1, v1)

    p["w1"] = jax.random.normal(ks[4], (3, 3, in_channel, depth)) / math.sqrt(9 * in_channel)
    p["alpha"] = 0.25 + 0.05 * jax.random.normal(ks[5], (depth,))
    p["w2"] = jax.random.normal(ks[6], (3, 3, depth, depth)) / math.sqrt(9 * depth)

    g2 = 1.0 + 0.1 * jax.random.normal(ks[7], (depth,))
    b2 = 0.1 * jax.random.normal(ks[8], (depth,))
    m2 = 0.1 * jax.random.normal(ks[9], (depth,))
    v2 = 1.0 + 0.1 * jax.random.uniform(ks[10], (depth,))
    p["bn2_scale"], p["bn2_bias"] = _fold_bn(g2, b2, m2, v2)

    if in_channel != depth:
        ksc = jax.random.split(ks[11], 5)
        p["wsc"] = jax.random.normal(ksc[0], (in_channel, depth)) / math.sqrt(in_channel)
        gs = 1.0 + 0.1 * jax.random.normal(ksc[1], (depth,))
        bs = 0.1 * jax.random.normal(ksc[2], (depth,))
        ms = 0.1 * jax.random.normal(ksc[3], (depth,))
        vs = 1.0 + 0.1 * jax.random.uniform(ksc[4], (depth,))
        p["bnsc_scale"], p["bnsc_bias"] = _fold_bn(gs, bs, ms, vs)
    return p


def _check(x_nchw, p, stride, expect_shape):
    out = bottleneck_ir_pallas_nchw(x_nchw, p, stride)
    jax.block_until_ready(out)
    assert out.shape == expect_shape, out.shape
    x_nhwc = jnp.transpose(x_nchw, (0, 2, 3, 1))
    # Tight check vs. a reference using the same operand precision as the
    # kernel (bf16 operands, folded BN scales, f32 accumulation).
    ref = jnp.transpose(bottleneck_ir_reference_nhwc(x_nhwc, p, stride),
                        (0, 3, 1, 2))
    assert jnp.allclose(out, ref, rtol=5e-3, atol=5e-3), \
        float(jnp.max(jnp.abs(out - ref)))
    # Loose sanity check vs. pure-f32 semantics (bf16 MXU operands are the
    # deliberate precision choice).
    ref32 = jnp.transpose(
        bottleneck_ir_reference_nhwc(x_nhwc, p, stride, jnp.float32),
        (0, 3, 1, 2))
    assert jnp.allclose(out, ref32, rtol=1e-1, atol=1e-1), \
        float(jnp.max(jnp.abs(out - ref32)))


if __name__ == "__main__":
    key = jax.random.PRNGKey(0)
    kx1, kp1, kx2, kp2, kx3, kp3 = jax.random.split(key, 6)
    N, H, W = 2, 16, 16

    # Case 1: in_channel != depth (conv1x1 + BN shortcut), stride 2
    Cin, D, stride = 4, 8, 2
    x1 = jax.random.normal(kx1, (N, Cin, H, W), jnp.float32)
    p1 = init_params(kp1, Cin, D)
    _check(x1, p1, stride, (N, D, H // stride, W // stride))

    # Case 2: in_channel == depth (MaxPool2d(1, stride) shortcut), stride 1
    Cin2 = D2 = 8
    x2 = jax.random.normal(kx2, (N, Cin2, H, W), jnp.float32)
    p2 = init_params(kp2, Cin2, D2)
    _check(x2, p2, 1, (N, D2, H, W))

    # Case 3: in_channel == depth, stride 2 (strided MaxPool shortcut)
    Cin3 = D3 = 8
    x3 = jax.random.normal(kx3, (N, Cin3, H, W), jnp.float32)
    p3 = init_params(kp3, Cin3, D3)
    _check(x3, p3, 2, (N, D3, H // 2, W // 2))

    print("KERNEL_OK")
</pallas_src>

<mosaic_0001>
module attributes {stable_mosaic.version = 11 : i64} {
  func.func @_bottleneck_ir_kernel(%arg0: i32, %arg1: memref<1x16x16x4xf32, #tpu.memory_space<vmem>>, %arg2: memref<1x4xf32, #tpu.memory_space<vmem>>, %arg3: memref<1x4xf32, #tpu.memory_space<vmem>>, %arg4: memref<3x12x8xbf16, #tpu.memory_space<vmem>>, %arg5: memref<1x8xf32, #tpu.memory_space<vmem>>, %arg6: memref<3x24x8xbf16, #tpu.memory_space<vmem>>, %arg7: memref<1x8xf32, #tpu.memory_space<vmem>>, %arg8: memref<4x8xbf16, #tpu.memory_space<vmem>>, %arg9: memref<1x8xf32, #tpu.memory_space<vmem>>, %arg10: memref<1x64x8xf32, #tpu.memory_space<vmem>>, %arg11: memref<18x18x4xbf16, #tpu.memory_space<vmem>>, %arg12: memref<18x18x8xf32, #tpu.memory_space<vmem>>, %arg13: memref<8x16x4xf32, #tpu.memory_space<vmem>>) attributes {dimension_semantics = [#tpu.dimension_semantics<parallel>], iteration_bounds = array<i64: 2>, scalar_prefetch = 0 : i64, scratch_operands = 3 : i64, tpu.core_type = #tpu.core_type<tc>, window_params = [{transform_indices = @transform_0, window_bounds = array<i64: 1, 16, 16, 4>}, {pipeline_mode = #tpu.pipeline_mode<synchronous>, transform_indices = @transform_1, window_bounds = array<i64: 1, 4>}, {pipeline_mode = #tpu.pipeline_mode<synchronous>, transform_indices = @transform_2, window_bounds = array<i64: 1, 4>}, {pipeline_mode = #tpu.pipeline_mode<synchronous>, transform_indices = @transform_3, window_bounds = array<i64: 3, 12, 8>}, {pipeline_mode = #tpu.pipeline_mode<synchronous>, transform_indices = @transform_4, window_bounds = array<i64: 1, 8>}, {pipeline_mode = #tpu.pipeline_mode<synchronous>, transform_indices = @transform_5, window_bounds = array<i64: 3, 24, 8>}, {pipeline_mode = #tpu.pipeline_mode<synchronous>, transform_indices = @transform_6, window_bounds = array<i64: 1, 8>}, {pipeline_mode = #tpu.pipeline_mode<synchronous>, transform_indices = @transform_7, window_bounds = array<i64: 4, 8>}, {pipeline_mode = #tpu.pipeline_mode<synchronous>, transform_indices = @transform_8, window_bounds = array<i64: 1, 8>}, {transform_indices = @transform_9, window_bounds = array<i64: 1, 64, 8>}]} {
    %c0 = arith.constant 0 : index
    %c0_0 = arith.constant 0 : index
    %c0_1 = arith.constant 0 : index
    %c0_2 = arith.constant 0 : index
    %0 = vector.load %arg1[%c0, %c0_0, %c0_1, %c0_2] : memref<1x16x16x4xf32, #tpu.memory_space<vmem>>, vector<1x16x16x4xf32>
    %1 = vector.shape_cast %0 : vector<1x16x16x4xf32> to vector<16x16x4xf32>
    %2 = vector.shape_cast %1 : vector<16x16x4xf32> to vector<8x2x16x4xf32>
    %3 = vector.extract_strided_slice %2 {offsets = [0, 0, 0, 0], sizes = [8, 1, 16, 4], strides = [1, 1, 1, 1]} : vector<8x2x16x4xf32> to vector<8x1x16x4xf32>
    %4 = vector.shape_cast %3 : vector<8x1x16x4xf32> to vector<8x16x4xf32>
    %c0_3 = arith.constant 0 : index
    %c0_4 = arith.constant 0 : index
    %c0_5 = arith.constant 0 : index
    %5 = vector.load %arg13[%c0_3, %c0_4, %c0_5] : memref<8x16x4xf32, #tpu.memory_space<vmem>>, vector<8x16x4xf32>
    tpu.vector_store %arg13[%c0_3, %c0_4, %c0_5], %4 {strides = array<i32>} : memref<8x16x4xf32, #tpu.memory_space<vmem>>, vector<8x16x4xf32>,
    %c0_6 = arith.constant 0 : index
    %c0_7 = arith.constant 0 : index
    %c0_8 = arith.constant 0 : index
    %6 = tpu.strided_load %arg13[%c0_6, %c0_7, %c0_8] {strides = array<i32: 1, 2, 1>} : memref<8x16x4xf32, #tpu.memory_space<vmem>>, vector<8x8x4xf32>
    %7 = vector.shape_cast %6 : vector<8x8x4xf32> to vector<64x4xf32>
    %8 = arith.truncf %7 : vector<64x4xf32> to vector<64x4xbf16>
    %c0_9 = arith.constant 0 : index
    %c0_10 = arith.constant 0 : index
    %9 = vector.load %arg8[%c0_9, %c0_10] : memref<4x8xbf16, #tpu.memory_space<vmem>>, vector<4x8xbf16>
    %cst = arith.constant dense<0.000000e+00> : vector<64x8xf32>
    %10 = tpu.matmul %8, %9, %cst {dimension_numbers = #tpu.dot_dimension_numbers<[1], [0], [0], [1], [0, 0, 1, 1], [], []>} : vector<64x4xbf16>, vector<4x8xbf16>, vector<64x8xf32> -> vector<64x8xf32>
    %c0_11 = arith.constant 0 : index
    %c0_12 = arith.constant 0 : index
    %11 = vector.load %arg9[%c0_11, %c0_12] : memref<1x8xf32, #tpu.memory_space<vmem>>, vector<1x8xf32>
    %12 = vector.broadcast %11 : vector<1x8xf32> to vector<64x8xf32>
    %13 = arith.addf %10, %12 : vector<64x8xf32>
    %c0_13 = arith.constant 0 : index
    %c0_14 = arith.constant 0 : index
    %14 = vector.load %arg2[%c0_13, %c0_14] : memref<1x4xf32, #tpu.memory_space<vmem>>, vector<1x4xf32>
    %15 = vector.shape_cast %14 : vector<1x4xf32> to vector<1x1x4xf32>
    %16 = vector.broadcast %15 : vector<1x1x4xf32> to vector<16x16x4xf32>
    %17 = arith.mulf %1, %16 : vector<16x16x4xf32>
    %c0_15 = arith.constant 0 : index
    %c0_16 = arith.constant 0 : index
    %18 = vector.load %arg3[%c0_15, %c0_16] : memref<1x4xf32, #tpu.memory_space<vmem>>, vector<1x4xf32>
    %19 = vector.shape_cast %18 : vector<1x4xf32> to vector<1x1x4xf32>
    %20 = vector.broadcast %19 : vector<1x1x4xf32> to vector<16x16x4xf32>
    %21 = arith.addf %17, %20 : vector<16x16x4xf32>
    %cst_17 = arith.constant 0.000000e+00 : bf16
    %22 = vector.broadcast %cst_17 : bf16 to vector<1x18x4xbf16>
    %cst_18 = arith.constant 0.000000e+00 : bf16
    %23 = vector.broadcast %cst_18 : bf16 to vector<18x1x4xbf16>
    %c0_19 = arith.constant 0 : index
    %c0_20 = arith.constant 0 : index
    %c0_21 = arith.constant 0 : index
    %24 = vector.load %arg11[%c0_19, %c0_20, %c0_21] : memref<18x18x4xbf16, #tpu.memory_space<vmem>>, vector<1x18x4xbf16>
    tpu.vector_store %arg11[%c0_19, %c0_20, %c0_21], %22 {strides = array<i32>} : memref<18x18x4xbf16, #tpu.memory_space<vmem>>, vector<1x18x4xbf16>,
    %c17 = arith.constant 17 : index
    %c0_22 = arith.constant 0 : index
    %c0_23 = arith.constant 0 : index
    %25 = vector.load %arg11[%c17, %c0_22, %c0_23] : memref<18x18x4xbf16, #tpu.memory_space<vmem>>, vector<1x18x4xbf16>
    tpu.vector_store %arg11[%c17, %c0_22, %c0_23], %22 {strides = array<i32>} : memref<18x18x4xbf16, #tpu.memory_space<vmem>>, vector<1x18x4xbf16>,
    %c0_24 = arith.constant 0 : index
    %c0_25 = arith.constant 0 : index
    %c0_26 = arith.constant 0 : index
    %26 = vector.load %arg11[%c0_24, %c0_25, %c0_26] : memref<18x18x4xbf16, #tpu.memory_space<vmem>>, vector<18x1x4xbf16>
    tpu.vector_store %arg11[%c0_24, %c0_25, %c0_26], %23 {strides = array<i32>} : memref<18x18x4xbf16, #tpu.memory_space<vmem>>, vector<18x1x4xbf16>,
    %c0_27 = arith.constant 0 : index
    %c17_28 = arith.constant 17 : index
    %c0_29 = arith.constant 0 : index
    %27 = vector.load %arg11[%c0_27, %c17_28, %c0_29] : memref<18x18x4xbf16, #tpu.memory_space<vmem>>, vector<18x1x4xbf16>
    tpu.vector_store %arg11[%c0_27, %c17_28, %c0_29], %23 {strides = array<i32>} : memref<18x18x4xbf16, #tpu.memory_space<vmem>>, vector<18x1x4xbf16>,
    %28 = arith.truncf %21 : vector<16x16x4xf32> to vector<16x16x4xbf16>
    %c1 = arith.constant 1 : index
    %c1_30 = arith.constant 1 : index
    %c0_31 = arith.constant 0 : index
    %29 = vector.load %arg11[%c1, %c1_30, %c0_31] : memref<18x18x4xbf16, #tpu.memory_space<vmem>>, vector<16x16x4xbf16>
    tpu.vector_store %arg11[%c1, %c1_30, %c0_31], %28 {strides = array<i32>} : memref<18x18x4xbf16, #tpu.memory_space<vmem>>, vector<16x16x4xbf16>,
    %c0_32 = arith.constant 0 : index
    %c0_33 = arith.constant 0 : index
    %c0_34 = arith.constant 0 : index
    %30 = vector.load %arg11[%c0_32, %c0_33, %c0_34] : memref<18x18x4xbf16, #tpu.memory_space<vmem>>, vector<18x18x4xbf16>
    %cst_35 = arith.constant 0.000000e+00 : f32
    %31 = vector.broadcast %cst_35 : f32 to vector<256x8xf32>
    %32 = vector.extract_strided_slice %30 {offsets = [0, 0, 0], sizes = [16, 18, 4], strides = [1, 1, 1]} : vector<18x18x4xbf16> to vector<16x18x4xbf16>
    %33 = vector.extract_strided_slice %32 {offsets = [0, 0, 0], sizes = [16, 16, 4], strides = [1, 1, 1]} : vector<16x18x4xbf16> to vector<16x16x4xbf16>
    %34 = vector.extract_strided_slice %32 {offsets = [0, 1, 0], sizes = [16, 16, 4], strides = [1, 1, 1]} : vector<16x18x4xbf16> to vector<16x16x4xbf16>
    %35 = vector.extract_strided_slice %32 {offsets = [0, 2, 0], sizes = [16, 16, 4], strides = [1, 1, 1]} : vector<16x18x4xbf16> to vector<16x16x4xbf16>
    %36 = tpu.concatenate %33, %34, %35 in 2 : vector<16x16x4xbf16>, vector<16x16x4xbf16>, vector<16x16x4xbf16> -> vector<16x16x12xbf16>
    %37 = vector.shape_cast %36 : vector<16x16x12xbf16> to vector<256x12xbf16>
    %c0_36 = arith.constant 0 : index
    %c0_37 = arith.constant 0 : index
    %c0_38 = arith.constant 0 : index
    %38 = vector.load %arg4[%c0_36, %c0_37, %c0_38] : memref<3x12x8xbf16, #tpu.memory_space<vmem>>, vector<1x12x8xbf16>
    %39 = vector.shape_cast %38 : vector<1x12x8xbf16> to vector<12x8xbf16>
    %cst_39 = arith.constant dense<0.000000e+00> : vector<256x8xf32>
    %40 = tpu.matmul %37, %39, %cst_39 {dimension_numbers = #tpu.dot_dimension_numbers<[1], [0], [0], [1], [0, 0, 1, 1], [], []>} : vector<256x12xbf16>, vector<12x8xbf16>, vector<256x8xf32> -> vector<256x8xf32>
    %41 = arith.addf %31, %40 : vector<256x8xf32>
    %42 = vector.extract_strided_slice %30 {offsets = [1, 0, 0], sizes = [16, 18, 4], strides = [1, 1, 1]} : vector<18x18x4xbf16> to vector<16x18x4xbf16>
    %43 = vector.extract_strided_slice %42 {offsets = [0, 0, 0], sizes = [16, 16, 4], strides = [1, 1, 1]} : vector<16x18x4xbf16> to vector<16x16x4xbf16>
    %44 = vector.extract_strided_slice %42 {offsets = [0, 1, 0], sizes = [16, 16, 4], strides = [1, 1, 1]} : vector<16x18x4xbf16> to vector<16x16x4xbf16>
    %45 = vector.extract_strided_slice %42 {offsets = [0, 2, 0], sizes = [16, 16, 4], strides = [1, 1, 1]} : vector<16x18x4xbf16> to vector<16x16x4xbf16>
    %46 = tpu.concatenate %43, %44, %45 in 2 : vector<16x16x4xbf16>, vector<16x16x4xbf16>, vector<16x16x4xbf16> -> vector<16x16x12xbf16>
    %47 = vector.shape_cast %46 : vector<16x16x12xbf16> to vector<256x12xbf16>
    %c1_40 = arith.constant 1 : index
    %c0_41 = arith.constant 0 : index
    %c0_42 = arith.constant 0 : index
    %48 = vector.load %arg4[%c1_40, %c0_41, %c0_42] : memref<3x12x8xbf16, #tpu.memory_space<vmem>>, vector<1x12x8xbf16>
    %49 = vector.shape_cast %48 : vector<1x12x8xbf16> to vector<12x8xbf16>
    %cst_43 = arith.constant dense<0.000000e+00> : vector<256x8xf32>
    %50 = tpu.matmul %47, %49, %cst_43 {dimension_numbers = #tpu.dot_dimension_numbers<[1], [0], [0], [1], [0, 0, 1, 1], [], []>} : vector<256x12xbf16>, vector<12x8xbf16>, vector<256x8xf32> -> vector<256x8xf32>
    %51 = arith.addf %41, %50 : vector<256x8xf32>
    %52 = vector.extract_strided_slice %30 {offsets = [2, 0, 0], sizes = [16, 18, 4], strides = [1, 1, 1]} : vector<18x18x4xbf16> to vector<16x18x4xbf16>
    %53 = vector.extract_strided_slice %52 {offsets = [0, 0, 0], sizes = [16, 16, 4], strides = [1, 1, 1]} : vector<16x18x4xbf16> to vector<16x16x4xbf16>
    %54 = vector.extract_strided_slice %52 {offsets = [0, 1, 0], sizes = [16, 16, 4], strides = [1, 1, 1]} : vector<16x18x4xbf16> to vector<16x16x4xbf16>
    %55 = vector.extract_strided_slice %52 {offsets = [0, 2, 0], sizes = [16, 16, 4], strides = [1, 1, 1]} : vector<16x18x4xbf16> to vector<16x16x4xbf16>
    %56 = tpu.concatenate %53, %54, %55 in 2 : vector<16x16x4xbf16>, vector<16x16x4xbf16>, vector<16x16x4xbf16> -> vector<16x16x12xbf16>
    %57 = vector.shape_cast %56 : vector<16x16x12xbf16> to vector<256x12xbf16>
    %c2 = arith.constant 2 : index
    %c0_44 = arith.constant 0 : index
    %c0_45 = arith.constant 0 : index
    %58 = vector.load %arg4[%c2, %c0_44, %c0_45] : memref<3x12x8xbf16, #tpu.memory_space<vmem>>, vector<1x12x8xbf16>
    %59 = vector.shape_cast %58 : vector<1x12x8xbf16> to vector<12x8xbf16>
    %cst_46 = arith.constant dense<0.000000e+00> : vector<256x8xf32>
    %60 = tpu.matmul %57, %59, %cst_46 {dimension_numbers = #tpu.dot_dimension_numbers<[1], [0], [0], [1], [0, 0, 1, 1], [], []>} : vector<256x12xbf16>, vector<12x8xbf16>, vector<256x8xf32> -> vector<256x8xf32>
    %61 = arith.addf %51, %60 : vector<256x8xf32>
    %62 = vector.shape_cast %61 : vector<256x8xf32> to vector<16x16x8xf32>
    %cst_47 = arith.constant 0.000000e+00 : f32
    %63 = vector.broadcast %cst_47 : f32 to vector<16x16x8xf32>
    %64 = arith.cmpf oge, %62, %63 : vector<16x16x8xf32>
    %c0_48 = arith.constant 0 : index
    %c0_49 = arith.constant 0 : index
    %65 = vector.load %arg5[%c0_48, %c0_49] : memref<1x8xf32, #tpu.memory_space<vmem>>, vector<1x8xf32>
    %66 = vector.shape_cast %65 : vector<1x8xf32> to vector<1x1x8xf32>
    %67 = vector.broadcast %66 : vector<1x1x8xf32> to vector<16x16x8xf32>
    %68 = arith.mulf %62, %67 : vector<16x16x8xf32>
    %69 = arith.select %64, %62, %68 : vector<16x16x8xi1>, vector<16x16x8xf32>
    %cst_50 = arith.constant 0.000000e+00 : f32
    %70 = vector.broadcast %cst_50 : f32 to vector<1x18x8xf32>
    %cst_51 = arith.constant 0.000000e+00 : f32
    %71 = vector.broadcast %cst_51 : f32 to vector<18x1x8xf32>
    %c0_52 = arith.constant 0 : index
    %c0_53 = arith.constant 0 : index
    %c0_54 = arith.constant 0 : index
    %72 = vector.load %arg12[%c0_52, %c0_53, %c0_54] : memref<18x18x8xf32, #tpu.memory_space<vmem>>, vector<1x18x8xf32>
    tpu.vector_store %arg12[%c0_52, %c0_53, %c0_54], %70 {strides = array<i32>} : memref<18x18x8xf32, #tpu.memory_space<vmem>>, vector<1x18x8xf32>,
    %c17_55 = arith.constant 17 : index
    %c0_56 = arith.constant 0 : index
    %c0_57 = arith.constant 0 : index
    %73 = vector.load %arg12[%c17_55, %c0_56, %c0_57] : memref<18x18x8xf32, #tpu.memory_space<vmem>>, vector<1x18x8xf32>
    tpu.vector_store %arg12[%c17_55, %c0_56, %c0_57], %70 {strides = array<i32>} : memref<18x18x8xf32, #tpu.memory_space<vmem>>, vector<1x18x8xf32>,
    %c0_58 = arith.constant 0 : index
    %c0_59 = arith.constant 0 : index
    %c0_60 = arith.constant 0 : index
    %74 = vector.load %arg12[%c0_58, %c0_59, %c0_60] : memref<18x18x8xf32, #tpu.memory_space<vmem>>, vector<18x1x8xf32>
    tpu.vector_store %arg12[%c0_58, %c0_59, %c0_60], %71 {strides = array<i32>} : memref<18x18x8xf32, #tpu.memory_space<vmem>>, vector<18x1x8xf32>,
    %c0_61 = arith.constant 0 : index
    %c17_62 = arith.constant 17 : index
    %c0_63 = arith.constant 0 : index
    %75 = vector.load %arg12[%c0_61, %c17_62, %c0_63] : memref<18x18x8xf32, #tpu.memory_space<vmem>>, vector<18x1x8xf32>
    tpu.vector_store %arg12[%c0_61, %c17_62, %c0_63], %71 {strides = array<i32>} : memref<18x18x8xf32, #tpu.memory_space<vmem>>, vector<18x1x8xf32>,
    %c1_64 = arith.constant 1 : index
    %c1_65 = arith.constant 1 : index
    %c0_66 = arith.constant 0 : index
    %76 = vector.load %arg12[%c1_64, %c1_65, %c0_66] : memref<18x18x8xf32, #tpu.memory_space<vmem>>, vector<16x16x8xf32>
    tpu.vector_store %arg12[%c1_64, %c1_65, %c0_66], %69 {strides = array<i32>} : memref<18x18x8xf32, #tpu.memory_space<vmem>>, vector<16x16x8xf32>,
    %c0_67 = arith.constant 0 : index
    %c0_68 = arith.constant 0 : index
    %c0_69 = arith.constant 0 : index
    %77 = tpu.strided_load %arg12[%c0_67, %c0_68, %c0_69] {strides = array<i32: 1, 2, 1>} : memref<18x18x8xf32, #tpu.memory_space<vmem>>, vector<18x8x8xf32>
    %c0_70 = arith.constant 0 : index
    %c1_71 = arith.constant 1 : index
    %c0_72 = arith.constant 0 : index
    %78 = tpu.strided_load %arg12[%c0_70, %c1_71, %c0_72] {strides = array<i32: 1, 2, 1>} : memref<18x18x8xf32, #tpu.memory_space<vmem>>, vector<18x8x8xf32>
    %c0_73 = arith.constant 0 : index
    %c2_74 = arith.constant 2 : index
    %c0_75 = arith.constant 0 : index
    %79 = tpu.strided_load %arg12[%c0_73, %c2_74, %c0_75] {strides = array<i32: 1, 2, 1>} : memref<18x18x8xf32, #tpu.memory_space<vmem>>, vector<18x8x8xf32>
    %cst_76 = arith.constant 0.000000e+00 : f32
    %80 = vector.broadcast %cst_76 : f32 to vector<64x8xf32>
    %81 = vector.extract_strided_slice %77 {offsets = [0, 0, 0], sizes = [16, 8, 8], strides = [1, 1, 1]} : vector<18x8x8xf32> to vector<16x8x8xf32>
    %82 = vector.shape_cast %81 : vector<16x8x8xf32> to vector<8x2x8x8xf32>
    %83 = vector.extract_strided_slice %82 {offsets = [0, 0, 0, 0], sizes = [8, 1, 8, 8], strides = [1, 1, 1, 1]} : vector<8x2x8x8xf32> to vector<8x1x8x8xf32>
    %84 = vector.shape_cast %83 : vector<8x1x8x8xf32> to vector<8x8x8xf32>
    %85 = vector.extract_strided_slice %78 {offsets = [0, 0, 0], sizes = [16, 8, 8], strides = [1, 1, 1]} : vector<18x8x8xf32> to vector<16x8x8xf32>
    %86 = vector.shape_cast %85 : vector<16x8x8xf32> to vector<8x2x8x8xf32>
    %87 = vector.extract_strided_slice %86 {offsets = [0, 0, 0, 0], sizes = [8, 1, 8, 8], strides = [1, 1, 1, 1]} : vector<8x2x8x8xf32> to vector<8x1x8x8xf32>
    %88 = vector.shape_cast %87 : vector<8x1x8x8xf32> to vector<8x8x8xf32>
    %89 = vector.extract_strided_slice %79 {offsets = [0, 0, 0], sizes = [16, 8, 8], strides = [1, 1, 1]} : vector<18x8x8xf32> to vector<16x8x8xf32>
    %90 = vector.shape_cast %89 : vector<16x8x8xf32> to vector<8x2x8x8xf32>
    %91 = vector.extract_strided_slice %90 {offsets = [0, 0, 0, 0], sizes = [8, 1, 8, 8], strides = [1, 1, 1, 1]} : vector<8x2x8x8xf32> to vector<8x1x8x8xf32>
    %92 = vector.shape_cast %91 : vector<8x1x8x8xf32> to vector<8x8x8xf32>
    %93 = tpu.concatenate %84, %88, %92 in 2 : vector<8x8x8xf32>, vector<8x8x8xf32>, vector<8x8x8xf32> -> vector<8x8x24xf32>
    %94 = vector.shape_cast %93 : vector<8x8x24xf32> to vector<64x24xf32>
    %95 = arith.truncf %94 : vector<64x24xf32> to vector<64x24xbf16>
    %c0_77 = arith.constant 0 : index
    %c0_78 = arith.constant 0 : index
    %c0_79 = arith.constant 0 : index
    %96 = vector.load %arg6[%c0_77, %c0_78, %c0_79] : memref<3x24x8xbf16, #tpu.memory_space<vmem>>, vector<1x24x8xbf16>
    %97 = vector.shape_cast %96 : vector<1x24x8xbf16> to vector<24x8xbf16>
    %cst_80 = arith.constant dense<0.000000e+00> : vector<64x8xf32>
    %98 = tpu.matmul %95, %97, %cst_80 {dimension_numbers = #tpu.dot_dimension_numbers<[1], [0], [0], [1], [0, 0, 1, 1], [], []>} : vector<64x24xbf16>, vector<24x8xbf16>, vector<64x8xf32> -> vector<64x8xf32>
    %99 = arith.addf %80, %98 : vector<64x8xf32>
    %100 = vector.extract_strided_slice %77 {offsets = [1, 0, 0], sizes = [16, 8, 8], strides = [1, 1, 1]} : vector<18x8x8xf32> to vector<16x8x8xf32>
    %101 = vector.shape_cast %100 : vector<16x8x8xf32> to vector<8x2x8x8xf32>
    %102 = vector.extract_strided_slice %101 {offsets = [0, 0, 0, 0], sizes = [8, 1, 8, 8], strides = [1, 1, 1, 1]} : vector<8x2x8x8xf32> to vector<8x1x8x8xf32>
    %103 = vector.shape_cast %102 : vector<8x1x8x8xf32> to vector<8x8x8xf32>
    %104 = vector.extract_strided_slice %78 {offsets = [1, 0, 0], sizes = [16, 8, 8], strides = [1, 1, 1]} : vector<18x8x8xf32> to vector<16x8x8xf32>
    %105 = vector.shape_cast %104 : vector<16x8x8xf32> to vector<8x2x8x8xf32>
    %106 = vector.extract_strided_slice %105 {offsets = [0, 0, 0, 0], sizes = [8, 1, 8, 8], strides = [1, 1, 1, 1]} : vector<8x2x8x8xf32> to vector<8x1x8x8xf32>
    %107 = vector.shape_cast %106 : vector<8x1x8x8xf32> to vector<8x8x8xf32>
    %108 = vector.extract_strided_slice %79 {offsets = [1, 0, 0], sizes = [16, 8, 8], strides = [1, 1, 1]} : vector<18x8x8xf32> to vector<16x8x8xf32>
    %109 = vector.shape_cast %108 : vector<16x8x8xf32> to vector<8x2x8x8xf32>
    %110 = vector.extract_strided_slice %109 {offsets = [0, 0, 0, 0], sizes = [8, 1, 8, 8], strides = [1, 1, 1, 1]} : vector<8x2x8x8xf32> to vector<8x1x8x8xf32>
    %111 = vector.shape_cast %110 : vector<8x1x8x8xf32> to vector<8x8x8xf32>
    %112 = tpu.concatenate %103, %107, %111 in 2 : vector<8x8x8xf32>, vector<8x8x8xf32>, vector<8x8x8xf32> -> vector<8x8x24xf32>
    %113 = vector.shape_cast %112 : vector<8x8x24xf32> to vector<64x24xf32>
    %114 = arith.truncf %113 : vector<64x24xf32> to vector<64x24xbf16>
    %c1_81 = arith.constant 1 : index
    %c0_82 = arith.constant 0 : index
    %c0_83 = arith.constant 0 : index
    %115 = vector.load %arg6[%c1_81, %c0_82, %c0_83] : memref<3x24x8xbf16, #tpu.memory_space<vmem>>, vector<1x24x8xbf16>
    %116 = vector.shape_cast %115 : vector<1x24x8xbf16> to vector<24x8xbf16>
    %cst_84 = arith.constant dense<0.000000e+00> : vector<64x8xf32>
    %117 = tpu.matmul %114, %116, %cst_84 {dimension_numbers = #tpu.dot_dimension_numbers<[1], [0], [0], [1], [0, 0, 1, 1], [], []>} : vector<64x24xbf16>, vector<24x8xbf16>, vector<64x8xf32> -> vector<64x8xf32>
    %118 = arith.addf %99, %117 : vector<64x8xf32>
    %119 = vector.extract_strided_slice %77 {offsets = [2, 0, 0], sizes = [16, 8, 8], strides = [1, 1, 1]} : vector<18x8x8xf32> to vector<16x8x8xf32>
    %120 = vector.shape_cast %119 : vector<16x8x8xf32> to vector<8x2x8x8xf32>
    %121 = vector.extract_strided_slice %120 {offsets = [0, 0, 0, 0], sizes = [8, 1, 8, 8], strides = [1, 1, 1, 1]} : vector<8x2x8x8xf32> to vector<8x1x8x8xf32>
    %122 = vector.shape_cast %121 : vector<8x1x8x8xf32> to vector<8x8x8xf32>
    %123 = vector.extract_strided_slice %78 {offsets = [2, 0, 0], sizes = [16, 8, 8], strides = [1, 1, 1]} : vector<18x8x8xf32> to vector<16x8x8xf32>
    %124 = vector.shape_cast %123 : vector<16x8x8xf32> to vector<8x2x8x8xf32>
    %125 = vector.extract_strided_slice %124 {offsets = [0, 0, 0, 0], sizes = [8, 1, 8, 8], strides = [1, 1, 1, 1]} : vector<8x2x8x8xf32> to vector<8x1x8x8xf32>
    %126 = vector.shape_cast %125 : vector<8x1x8x8xf32> to vector<8x8x8xf32>
    %127 = vector.extract_strided_slice %79 {offsets = [2, 0, 0], sizes = [16, 8, 8], strides = [1, 1, 1]} : vector<18x8x8xf32> to vector<16x8x8xf32>
    %128 = vector.shape_cast %127 : vector<16x8x8xf32> to vector<8x2x8x8xf32>
    %129 = vector.extract_strided_slice %128 {offsets = [0, 0, 0, 0], sizes = [8, 1, 8, 8], strides = [1, 1, 1, 1]} : vector<8x2x8x8xf32> to vector<8x1x8x8xf32>
    %130 = vector.shape_cast %129 : vector<8x1x8x8xf32> to vector<8x8x8xf32>
    %131 = tpu.concatenate %122, %126, %130 in 2 : vector<8x8x8xf32>, vector<8x8x8xf32>, vector<8x8x8xf32> -> vector<8x8x24xf32>
    %132 = vector.shape_cast %131 : vector<8x8x24xf32> to vector<64x24xf32>
    %133 = arith.truncf %132 : vector<64x24xf32> to vector<64x24xbf16>
    %c2_85 = arith.constant 2 : index
    %c0_86 = arith.constant 0 : index
    %c0_87 = arith.constant 0 : index
    %134 = vector.load %arg6[%c2_85, %c0_86, %c0_87] : memref<3x24x8xbf16, #tpu.memory_space<vmem>>, vector<1x24x8xbf16>
    %135 = vector.shape_cast %134 : vector<1x24x8xbf16> to vector<24x8xbf16>
    %cst_88 = arith.constant dense<0.000000e+00> : vector<64x8xf32>
    %136 = tpu.matmul %133, %135, %cst_88 {dimension_numbers = #tpu.dot_dimension_numbers<[1], [0], [0], [1], [0, 0, 1, 1], [], []>} : vector<64x24xbf16>, vector<24x8xbf16>, vector<64x8xf32> -> vector<64x8xf32>
    %137 = arith.addf %118, %136 : vector<64x8xf32>
    %c0_89 = arith.constant 0 : index
    %c0_90 = arith.constant 0 : index
    %138 = vector.load %arg7[%c0_89, %c0_90] : memref<1x8xf32, #tpu.memory_space<vmem>>, vector<1x8xf32>
    %139 = vector.broadcast %138 : vector<1x8xf32> to vector<64x8xf32>
    %140 = arith.addf %137, %139 : vector<64x8xf32>
    %141 = arith.addf %140, %13 : vector<64x8xf32>
    %c0_91 = arith.constant 0 : index
    %c0_92 = arith.constant 0 : index
    %c0_93 = arith.constant 0 : index
    %142 = vector.load %arg10[%c0_91, %c0_92, %c0_93] : memref<1x64x8xf32, #tpu.memory_space<vmem>>, vector<1x64x8xf32>
    %143 = vector.shape_cast %142 : vector<1x64x8xf32> to vector<64x8xf32>
    %144 = vector.shape_cast %141 : vector<64x8xf32> to vector<1x64x8xf32>
    tpu.vector_store %arg10[%c0_91, %c0_92, %c0_93], %144 {strides = array<i32>} : memref<1x64x8xf32, #tpu.memory_space<vmem>>, vector<1x64x8xf32>,
    return
  }
  func.func @transform_0(%arg0: i32) -> (i32, i32, i32, i32) {
    %c0_i32 = arith.constant 0 : i32
    %c0_i32_0 = arith.constant 0 : i32
    %c0_i32_1 = arith.constant 0 : i32
    %c0_i32_2 = arith.constant 0 : i32
    return %arg0, %c0_i32, %c0_i32_0, %c0_i32_1 : i32, i32, i32, i32
  }
  func.func @transform_1(%arg0: i32) -> (i32, i32) {
    %c0_i32 = arith.constant 0 : i32
    %c0_i32_0 = arith.constant 0 : i32
    %c0_i32_1 = arith.constant 0 : i32
    return %c0_i32, %c0_i32_0 : i32, i32
  }
  func.func @transform_2(%arg0: i32) -> (i32, i32) {
    %c0_i32 = arith.constant 0 : i32
    %c0_i32_0 = arith.constant 0 : i32
    %c0_i32_1 = arith.constant 0 : i32
    return %c0_i32, %c0_i32_0 : i32, i32
  }
  func.func @transform_3(%arg0: i32) -> (i32, i32, i32) {
    %c0_i32 = arith.constant 0 : i32
    %c0_i32_0 = arith.constant 0 : i32
    %c0_i32_1 = arith.constant 0 : i32
    %c0_i32_2 = arith.constant 0 : i32
    return %c0_i32, %c0_i32_0, %c0_i32_1 : i32, i32, i32
  }
  func.func @transform_4(%arg0: i32) -> (i32, i32) {
    %c0_i32 = arith.constant 0 : i32
    %c0_i32_0 = arith.constant 0 : i32
    %c0_i32_1 = arith.constant 0 : i32
    return %c0_i32, %c0_i32_0 : i32, i32
  }
  func.func @transform_5(%arg0: i32) -> (i32, i32, i32) {
    %c0_i32 = arith.constant 0 : i32
    %c0_i32_0 = arith.constant 0 : i32
    %c0_i32_1 = arith.constant 0 : i32
    %c0_i32_2 = arith.constant 0 : i32
    return %c0_i32, %c0_i32_0, %c0_i32_1 : i32, i32, i32
  }
  func.func @transform_6(%arg0: i32) -> (i32, i32) {
    %c0_i32 = arith.constant 0 : i32
    %c0_i32_0 = arith.constant 0 : i32
    %c0_i32_1 = arith.constant 0 : i32
    return %c0_i32, %c0_i32_0 : i32, i32
  }
  func.func @transform_7(%arg0: i32) -> (i32, i32) {
    %c0_i32 = arith.constant 0 : i32
    %c0_i32_0 = arith.constant 0 : i32
    %c0_i32_1 = arith.constant 0 : i32
    return %c0_i32, %c0_i32_0 : i32, i32
  }
  func.func @transform_8(%arg0: i32) -> (i32, i32) {
    %c0_i32 = arith.constant 0 : i32
    %c0_i32_0 = arith.constant 0 : i32
    %c0_i32_1 = arith.constant 0 : i32
    return %c0_i32, %c0_i32_0 : i32, i32
  }
  func.func @transform_9(%arg0: i32) -> (i32, i32, i32) {
    %c0_i32 = arith.constant 0 : i32
    %c0_i32_0 = arith.constant 0 : i32
    %c0_i32_1 = arith.constant 0 : i32
    return %arg0, %c0_i32, %c0_i32_0 : i32, i32, i32
  }
}

module attributes {stable_mosaic.version = 11 : i64} {
  func.func @_bottleneck_ir_kernel(%arg0: i32, %arg1: memref<1x16x16x4xf32, #tpu.memory_space<vmem>>, %arg2: memref<1x4xf32, #tpu.memory_space<vmem>>, %arg3: memref<1x4xf32, #tpu.memory_space<vmem>>, %arg4: memref<3x12x8xbf16, #tpu.memory_space<vmem>>, %arg5: memref<1x8xf32, #tpu.memory_space<vmem>>, %arg6: memref<3x24x8xbf16, #tpu.memory_space<vmem>>, %arg7: memref<1x8xf32, #tpu.memory_space<vmem>>, %arg8: memref<4x8xbf16, #tpu.memory_space<vmem>>, %arg9: memref<1x8xf32, #tpu.memory_space<vmem>>, %arg10: memref<1x64x8xf32, #tpu.memory_space<vmem>>, %arg11: memref<18x18x4xbf16, #tpu.memory_space<vmem>>, %arg12: memref<18x18x8xf32, #tpu.memory_space<vmem>>, %arg13: memref<8x16x4xf32, #tpu.memory_space<vmem>>) attributes {dimension_semantics = [#tpu.dimension_semantics<parallel>], iteration_bounds = array<i64: 2>, scalar_prefetch = 0 : i64, scratch_operands = 3 : i64, tpu.core_type = #tpu.core_type<tc>, window_params = [{transform_indices = @transform_0, window_bounds = array<i64: 1, 16, 16, 4>}, {pipeline_mode = #tpu.pipeline_mode<synchronous>, transform_indices = @transform_1, window_bounds = array<i64: 1, 4>}, {pipeline_mode = #tpu.pipeline_mode<synchronous>, transform_indices = @transform_2, window_bounds = array<i64: 1, 4>}, {pipeline_mode = #tpu.pipeline_mode<synchronous>, transform_indices = @transform_3, window_bounds = array<i64: 3, 12, 8>}, {pipeline_mode = #tpu.pipeline_mode<synchronous>, transform_indices = @transform_4, window_bounds = array<i64: 1, 8>}, {pipeline_mode = #tpu.pipeline_mode<synchronous>, transform_indices = @transform_5, window_bounds = array<i64: 3, 24, 8>}, {pipeline_mode = #tpu.pipeline_mode<synchronous>, transform_indices = @transform_6, window_bounds = array<i64: 1, 8>}, {pipeline_mode = #tpu.pipeline_mode<synchronous>, transform_indices = @transform_7, window_bounds = array<i64: 4, 8>}, {pipeline_mode = #tpu.pipeline_mode<synchronous>, transform_indices = @transform_8, window_bounds = array<i64: 1, 8>}, {transform_indices = @transform_9, window_bounds = array<i64: 1, 64, 8>}]} {
    %c0 = arith.constant 0 : index
    %c0_0 = arith.constant 0 : index
    %c0_1 = arith.constant 0 : index
    %c0_2 = arith.constant 0 : index
    %0 = vector.load %arg1[%c0, %c0_0, %c0_1, %c0_2] : memref<1x16x16x4xf32, #tpu.memory_space<vmem>>, vector<1x16x16x4xf32>
    %1 = vector.shape_cast %0 : vector<1x16x16x4xf32> to vector<16x16x4xf32>
    %2 = vector.shape_cast %1 : vector<16x16x4xf32> to vector<8x2x16x4xf32>
    %3 = vector.extract_strided_slice %2 {offsets = [0, 0, 0, 0], sizes = [8, 1, 16, 4], strides = [1, 1, 1, 1]} : vector<8x2x16x4xf32> to vector<8x1x16x4xf32>
    %4 = vector.shape_cast %3 : vector<8x1x16x4xf32> to vector<8x16x4xf32>
    %c0_3 = arith.constant 0 : index
    %c0_4 = arith.constant 0 : index
    %c0_5 = arith.constant 0 : index
    %5 = vector.load %arg13[%c0_3, %c0_4, %c0_5] : memref<8x16x4xf32, #tpu.memory_space<vmem>>, vector<8x16x4xf32>
    tpu.vector_store %arg13[%c0_3, %c0_4, %c0_5], %4 {strides = array<i32>} : memref<8x16x4xf32, #tpu.memory_space<vmem>>, vector<8x16x4xf32>,
    %c0_6 = arith.constant 0 : index
    %c0_7 = arith.constant 0 : index
    %c0_8 = arith.constant 0 : index
    %6 = tpu.strided_load %arg13[%c0_6, %c0_7, %c0_8] {strides = array<i32: 1, 2, 1>} : memref<8x16x4xf32, #tpu.memory_space<vmem>>, vector<8x8x4xf32>
    %7 = vector.shape_cast %6 : vector<8x8x4xf32> to vector<64x4xf32>
    %8 = arith.truncf %7 : vector<64x4xf32> to vector<64x4xbf16>
    %c0_9 = arith.constant 0 : index
    %c0_10 = arith.constant 0 : index
    %9 = vector.load %arg8[%c0_9, %c0_10] : memref<4x8xbf16, #tpu.memory_space<vmem>>, vector<4x8xbf16>
    %cst = arith.constant dense<0.000000e+00> : vector<64x8xf32>
    %10 = tpu.matmul %8, %9, %cst {dimension_numbers = #tpu.dot_dimension_numbers<[1], [0], [0], [1], [0, 0, 1, 1], [], []>} : vector<64x4xbf16>, vector<4x8xbf16>, vector<64x8xf32> -> vector<64x8xf32>
    %c0_11 = arith.constant 0 : index
    %c0_12 = arith.constant 0 : index
    %11 = vector.load %arg9[%c0_11, %c0_12] : memref<1x8xf32, #tpu.memory_space<vmem>>, vector<1x8xf32>
    %12 = vector.broadcast %11 : vector<1x8xf32> to vector<64x8xf32>
    %13 = arith.addf %10, %12 : vector<64x8xf32>
    %c0_13 = arith.constant 0 : index
    %c0_14 = arith.constant 0 : index
    %14 = vector.load %arg2[%c0_13, %c0_14] : memref<1x4xf32, #tpu.memory_space<vmem>>, vector<1x4xf32>
    %15 = vector.shape_cast %14 : vector<1x4xf32> to vector<1x1x4xf32>
    %16 = vector.broadcast %15 : vector<1x1x4xf32> to vector<16x16x4xf32>
    %17 = arith.mulf %1, %16 : vector<16x16x4xf32>
    %c0_15 = arith.constant 0 : index
    %c0_16 = arith.constant 0 : index
    %18 = vector.load %arg3[%c0_15, %c0_16] : memref<1x4xf32, #tpu.memory_space<vmem>>, vector<1x4xf32>
    %19 = vector.shape_cast %18 : vector<1x4xf32> to vector<1x1x4xf32>
    %20 = vector.broadcast %19 : vector<1x1x4xf32> to vector<16x16x4xf32>
    %21 = arith.addf %17, %20 : vector<16x16x4xf32>
    %cst_17 = arith.constant 0.000000e+00 : bf16
    %22 = vector.broadcast %cst_17 : bf16 to vector<1x18x4xbf16>
    %cst_18 = arith.constant 0.000000e+00 : bf16
    %23 = vector.broadcast %cst_18 : bf16 to vector<18x1x4xbf16>
    %c0_19 = arith.constant 0 : index
    %c0_20 = arith.constant 0 : index
    %c0_21 = arith.constant 0 : index
    %24 = vector.load %arg11[%c0_19, %c0_20, %c0_21] : memref<18x18x4xbf16, #tpu.memory_space<vmem>>, vector<1x18x4xbf16>
    tpu.vector_store %arg11[%c0_19, %c0_20, %c0_21], %22 {strides = array<i32>} : memref<18x18x4xbf16, #tpu.memory_space<vmem>>, vector<1x18x4xbf16>,
    %c17 = arith.constant 17 : index
    %c0_22 = arith.constant 0 : index
    %c0_23 = arith.constant 0 : index
    %25 = vector.load %arg11[%c17, %c0_22, %c0_23] : memref<18x18x4xbf16, #tpu.memory_space<vmem>>, vector<1x18x4xbf16>
    tpu.vector_store %arg11[%c17, %c0_22, %c0_23], %22 {strides = array<i32>} : memref<18x18x4xbf16, #tpu.memory_space<vmem>>, vector<1x18x4xbf16>,
    %c0_24 = arith.constant 0 : index
    %c0_25 = arith.constant 0 : index
    %c0_26 = arith.constant 0 : index
    %26 = vector.load %arg11[%c0_24, %c0_25, %c0_26] : memref<18x18x4xbf16, #tpu.memory_space<vmem>>, vector<18x1x4xbf16>
    tpu.vector_store %arg11[%c0_24, %c0_25, %c0_26], %23 {strides = array<i32>} : memref<18x18x4xbf16, #tpu.memory_space<vmem>>, vector<18x1x4xbf16>,
    %c0_27 = arith.constant 0 : index
    %c17_28 = arith.constant 17 : index
    %c0_29 = arith.constant 0 : index
    %27 = vector.load %arg11[%c0_27, %c17_28, %c0_29] : memref<18x18x4xbf16, #tpu.memory_space<vmem>>, vector<18x1x4xbf16>
    tpu.vector_store %arg11[%c0_27, %c17_28, %c0_29], %23 {strides = array<i32>} : memref<18x18x4xbf16, #tpu.memory_space<vmem>>, vector<18x1x4xbf16>,
    %28 = arith.truncf %21 : vector<16x16x4xf32> to vector<16x16x4xbf16>
    %c1 = arith.constant 1 : index
    %c1_30 = arith.constant 1 : index
    %c0_31 = arith.constant 0 : index
    %29 = vector.load %arg11[%c1, %c1_30, %c0_31] : memref<18x18x4xbf16, #tpu.memory_space<vmem>>, vector<16x16x4xbf16>
    tpu.vector_store %arg11[%c1, %c1_30, %c0_31], %28 {strides = array<i32>} : memref<18x18x4xbf16, #tpu.memory_space<vmem>>, vector<16x16x4xbf16>,
    %c0_32 = arith.constant 0 : index
    %c0_33 = arith.constant 0 : index
    %c0_34 = arith.constant 0 : index
    %30 = vector.load %arg11[%c0_32, %c0_33, %c0_34] : memref<18x18x4xbf16, #tpu.memory_space<vmem>>, vector<18x18x4xbf16>
    %cst_35 = arith.constant 0.000000e+00 : f32
    %31 = vector.broadcast %cst_35 : f32 to vector<256x8xf32>
    %32 = vector.extract_strided_slice %30 {offsets = [0, 0, 0], sizes = [16, 18, 4], strides = [1, 1, 1]} : vector<18x18x4xbf16> to vector<16x18x4xbf16>
    %33 = vector.extract_strided_slice %32 {offsets = [0, 0, 0], sizes = [16, 16, 4], strides = [1, 1, 1]} : vector<16x18x4xbf16> to vector<16x16x4xbf16>
    %34 = vector.extract_strided_slice %32 {offsets = [0, 1, 0], sizes = [16, 16, 4], strides = [1, 1, 1]} : vector<16x18x4xbf16> to vector<16x16x4xbf16>
    %35 = vector.extract_strided_slice %32 {offsets = [0, 2, 0], sizes = [16, 16, 4], strides = [1, 1, 1]} : vector<16x18x4xbf16> to vector<16x16x4xbf16>
    %36 = tpu.concatenate %33, %34, %35 in 2 : vector<16x16x4xbf16>, vector<16x16x4xbf16>, vector<16x16x4xbf16> -> vector<16x16x12xbf16>
    %37 = vector.shape_cast %36 : vector<16x16x12xbf16> to vector<256x12xbf16>
    %c0_36 = arith.constant 0 : index
    %c0_37 = arith.constant 0 : index
    %c0_38 = arith.constant 0 : index
    %38 = vector.load %arg4[%c0_36, %c0_37, %c0_38] : memref<3x12x8xbf16, #tpu.memory_space<vmem>>, vector<1x12x8xbf16>
    %39 = vector.shape_cast %38 : vector<1x12x8xbf16> to vector<12x8xbf16>
    %cst_39 = arith.constant dense<0.000000e+00> : vector<256x8xf32>
    %40 = tpu.matmul %37, %39, %cst_39 {dimension_numbers = #tpu.dot_dimension_numbers<[1], [0], [0], [1], [0, 0, 1, 1], [], []>} : vector<256x12xbf16>, vector<12x8xbf16>, vector<256x8xf32> -> vector<256x8xf32>
    %41 = arith.addf %31, %40 : vector<256x8xf32>
    %42 = vector.extract_strided_slice %30 {offsets = [1, 0, 0], sizes = [16, 18, 4], strides = [1, 1, 1]} : vector<18x18x4xbf16> to vector<16x18x4xbf16>
    %43 = vector.extract_strided_slice %42 {offsets = [0, 0, 0], sizes = [16, 16, 4], strides = [1, 1, 1]} : vector<16x18x4xbf16> to vector<16x16x4xbf16>
    %44 = vector.extract_strided_slice %42 {offsets = [0, 1, 0], sizes = [16, 16, 4], strides = [1, 1, 1]} : vector<16x18x4xbf16> to vector<16x16x4xbf16>
    %45 = vector.extract_strided_slice %42 {offsets = [0, 2, 0], sizes = [16, 16, 4], strides = [1, 1, 1]} : vector<16x18x4xbf16> to vector<16x16x4xbf16>
    %46 = tpu.concatenate %43, %44, %45 in 2 : vector<16x16x4xbf16>, vector<16x16x4xbf16>, vector<16x16x4xbf16> -> vector<16x16x12xbf16>
    %47 = vector.shape_cast %46 : vector<16x16x12xbf16> to vector<256x12xbf16>
    %c1_40 = arith.constant 1 : index
    %c0_41 = arith.constant 0 : index
    %c0_42 = arith.constant 0 : index
    %48 = vector.load %arg4[%c1_40, %c0_41, %c0_42] : memref<3x12x8xbf16, #tpu.memory_space<vmem>>, vector<1x12x8xbf16>
    %49 = vector.shape_cast %48 : vector<1x12x8xbf16> to vector<12x8xbf16>
    %cst_43 = arith.constant dense<0.000000e+00> : vector<256x8xf32>
    %50 = tpu.matmul %47, %49, %cst_43 {dimension_numbers = #tpu.dot_dimension_numbers<[1], [0], [0], [1], [0, 0, 1, 1], [], []>} : vector<256x12xbf16>, vector<12x8xbf16>, vector<256x8xf32> -> vector<256x8xf32>
    %51 = arith.addf %41, %50 : vector<256x8xf32>
    %52 = vector.extract_strided_slice %30 {offsets = [2, 0, 0], sizes = [16, 18, 4], strides = [1, 1, 1]} : vector<18x18x4xbf16> to vector<16x18x4xbf16>
    %53 = vector.extract_strided_slice %52 {offsets = [0, 0, 0], sizes = [16, 16, 4], strides = [1, 1, 1]} : vector<16x18x4xbf16> to vector<16x16x4xbf16>
    %54 = vector.extract_strided_slice %52 {offsets = [0, 1, 0], sizes = [16, 16, 4], strides = [1, 1, 1]} : vector<16x18x4xbf16> to vector<16x16x4xbf16>
    %55 = vector.extract_strided_slice %52 {offsets = [0, 2, 0], sizes = [16, 16, 4], strides = [1, 1, 1]} : vector<16x18x4xbf16> to vector<16x16x4xbf16>
    %56 = tpu.concatenate %53, %54, %55 in 2 : vector<16x16x4xbf16>, vector<16x16x4xbf16>, vector<16x16x4xbf16> -> vector<16x16x12xbf16>
    %57 = vector.shape_cast %56 : vector<16x16x12xbf16> to vector<256x12xbf16>
    %c2 = arith.constant 2 : index
    %c0_44 = arith.constant 0 : index
    %c0_45 = arith.constant 0 : index
    %58 = vector.load %arg4[%c2, %c0_44, %c0_45] : memref<3x12x8xbf16, #tpu.memory_space<vmem>>, vector<1x12x8xbf16>
    %59 = vector.shape_cast %58 : vector<1x12x8xbf16> to vector<12x8xbf16>
    %cst_46 = arith.constant dense<0.000000e+00> : vector<256x8xf32>
    %60 = tpu.matmul %57, %59, %cst_46 {dimension_numbers = #tpu.dot_dimension_numbers<[1], [0], [0], [1], [0, 0, 1, 1], [], []>} : vector<256x12xbf16>, vector<12x8xbf16>, vector<256x8xf32> -> vector<256x8xf32>
    %61 = arith.addf %51, %60 : vector<256x8xf32>
    %62 = vector.shape_cast %61 : vector<256x8xf32> to vector<16x16x8xf32>
    %cst_47 = arith.constant 0.000000e+00 : f32
    %63 = vector.broadcast %cst_47 : f32 to vector<16x16x8xf32>
    %64 = arith.cmpf oge, %62, %63 : vector<16x16x8xf32>
    %c0_48 = arith.constant 0 : index
    %c0_49 = arith.constant 0 : index
    %65 = vector.load %arg5[%c0_48, %c0_49] : memref<1x8xf32, #tpu.memory_space<vmem>>, vector<1x8xf32>
    %66 = vector.shape_cast %65 : vector<1x8xf32> to vector<1x1x8xf32>
    %67 = vector.broadcast %66 : vector<1x1x8xf32> to vector<16x16x8xf32>
    %68 = arith.mulf %62, %67 : vector<16x16x8xf32>
    %69 = arith.select %64, %62, %68 : vector<16x16x8xi1>, vector<16x16x8xf32>
    %cst_50 = arith.constant 0.000000e+00 : f32
    %70 = vector.broadcast %cst_50 : f32 to vector<1x18x8xf32>
    %cst_51 = arith.constant 0.000000e+00 : f32
    %71 = vector.broadcast %cst_51 : f32 to vector<18x1x8xf32>
    %c0_52 = arith.constant 0 : index
    %c0_53 = arith.constant 0 : index
    %c0_54 = arith.constant 0 : index
    %72 = vector.load %arg12[%c0_52, %c0_53, %c0_54] : memref<18x18x8xf32, #tpu.memory_space<vmem>>, vector<1x18x8xf32>
    tpu.vector_store %arg12[%c0_52, %c0_53, %c0_54], %70 {strides = array<i32>} : memref<18x18x8xf32, #tpu.memory_space<vmem>>, vector<1x18x8xf32>,
    %c17_55 = arith.constant 17 : index
    %c0_56 = arith.constant 0 : index
    %c0_57 = arith.constant 0 : index
    %73 = vector.load %arg12[%c17_55, %c0_56, %c0_57] : memref<18x18x8xf32, #tpu.memory_space<vmem>>, vector<1x18x8xf32>
    tpu.vector_store %arg12[%c17_55, %c0_56, %c0_57], %70 {strides = array<i32>} : memref<18x18x8xf32, #tpu.memory_space<vmem>>, vector<1x18x8xf32>,
    %c0_58 = arith.constant 0 : index
    %c0_59 = arith.constant 0 : index
    %c0_60 = arith.constant 0 : index
    %74 = vector.load %arg12[%c0_58, %c0_59, %c0_60] : memref<18x18x8xf32, #tpu.memory_space<vmem>>, vector<18x1x8xf32>
    tpu.vector_store %arg12[%c0_58, %c0_59, %c0_60], %71 {strides = array<i32>} : memref<18x18x8xf32, #tpu.memory_space<vmem>>, vector<18x1x8xf32>,
    %c0_61 = arith.constant 0 : index
    %c17_62 = arith.constant 17 : index
    %c0_63 = arith.constant 0 : index
    %75 = vector.load %arg12[%c0_61, %c17_62, %c0_63] : memref<18x18x8xf32, #tpu.memory_space<vmem>>, vector<18x1x8xf32>
    tpu.vector_store %arg12[%c0_61, %c17_62, %c0_63], %71 {strides = array<i32>} : memref<18x18x8xf32, #tpu.memory_space<vmem>>, vector<18x1x8xf32>,
    %c1_64 = arith.constant 1 : index
    %c1_65 = arith.constant 1 : index
    %c0_66 = arith.constant 0 : index
    %76 = vector.load %arg12[%c1_64, %c1_65, %c0_66] : memref<18x18x8xf32, #tpu.memory_space<vmem>>, vector<16x16x8xf32>
    tpu.vector_store %arg12[%c1_64, %c1_65, %c0_66], %69 {strides = array<i32>} : memref<18x18x8xf32, #tpu.memory_space<vmem>>, vector<16x16x8xf32>,
    %c0_67 = arith.constant 0 : index
    %c0_68 = arith.constant 0 : index
    %c0_69 = arith.constant 0 : index
    %77 = tpu.strided_load %arg12[%c0_67, %c0_68, %c0_69] {strides = array<i32: 1, 2, 1>} : memref<18x18x8xf32, #tpu.memory_space<vmem>>, vector<18x8x8xf32>
    %c0_70 = arith.constant 0 : index
    %c1_71 = arith.constant 1 : index
    %c0_72 = arith.constant 0 : index
    %78 = tpu.strided_load %arg12[%c0_70, %c1_71, %c0_72] {strides = array<i32: 1, 2, 1>} : memref<18x18x8xf32, #tpu.memory_space<vmem>>, vector<18x8x8xf32>
    %c0_73 = arith.constant 0 : index
    %c2_74 = arith.constant 2 : index
    %c0_75 = arith.constant 0 : index
    %79 = tpu.strided_load %arg12[%c0_73, %c2_74, %c0_75] {strides = array<i32: 1, 2, 1>} : memref<18x18x8xf32, #tpu.memory_space<vmem>>, vector<18x8x8xf32>
    %cst_76 = arith.constant 0.000000e+00 : f32
    %80 = vector.broadcast %cst_76 : f32 to vector<64x8xf32>
    %81 = vector.extract_strided_slice %77 {offsets = [0, 0, 0], sizes = [16, 8, 8], strides = [1, 1, 1]} : vector<18x8x8xf32> to vector<16x8x8xf32>
    %82 = vector.shape_cast %81 : vector<16x8x8xf32> to vector<8x2x8x8xf32>
    %83 = vector.extract_strided_slice %82 {offsets = [0, 0, 0, 0], sizes = [8, 1, 8, 8], strides = [1, 1, 1, 1]} : vector<8x2x8x8xf32> to vector<8x1x8x8xf32>
    %84 = vector.shape_cast %83 : vector<8x1x8x8xf32> to vector<8x8x8xf32>
    %85 = vector.extract_strided_slice %78 {offsets = [0, 0, 0], sizes = [16, 8, 8], strides = [1, 1, 1]} : vector<18x8x8xf32> to vector<16x8x8xf32>
    %86 = vector.shape_cast %85 : vector<16x8x8xf32> to vector<8x2x8x8xf32>
    %87 = vector.extract_strided_slice %86 {offsets = [0, 0, 0, 0], sizes = [8, 1, 8, 8], strides = [1, 1, 1, 1]} : vector<8x2x8x8xf32> to vector<8x1x8x8xf32>
    %88 = vector.shape_cast %87 : vector<8x1x8x8xf32> to vector<8x8x8xf32>
    %89 = vector.extract_strided_slice %79 {offsets = [0, 0, 0], sizes = [16, 8, 8], strides = [1, 1, 1]} : vector<18x8x8xf32> to vector<16x8x8xf32>
    %90 = vector.shape_cast %89 : vector<16x8x8xf32> to vector<8x2x8x8xf32>
    %91 = vector.extract_strided_slice %90 {offsets = [0, 0, 0, 0], sizes = [8, 1, 8, 8], strides = [1, 1, 1, 1]} : vector<8x2x8x8xf32> to vector<8x1x8x8xf32>
    %92 = vector.shape_cast %91 : vector<8x1x8x8xf32> to vector<8x8x8xf32>
    %93 = tpu.concatenate %84, %88, %92 in 2 : vector<8x8x8xf32>, vector<8x8x8xf32>, vector<8x8x8xf32> -> vector<8x8x24xf32>
    %94 = vector.shape_cast %93 : vector<8x8x24xf32> to vector<64x24xf32>
    %95 = arith.truncf %94 : vector<64x24xf32> to vector<64x24xbf16>
    %c0_77 = arith.constant 0 : index
    %c0_78 = arith.constant 0 : index
    %c0_79 = arith.constant 0 : index
    %96 = vector.load %arg6[%c0_77, %c0_78, %c0_79] : memref<3x24x8xbf16, #tpu.memory_space<vmem>>, vector<1x24x8xbf16>
    %97 = vector.shape_cast %96 : vector<1x24x8xbf16> to vector<24x8xbf16>
    %cst_80 = arith.constant dense<0.000000e+00> : vector<64x8xf32>
    %98 = tpu.matmul %95, %97, %cst_80 {dimension_numbers = #tpu.dot_dimension_numbers<[1], [0], [0], [1], [0, 0, 1, 1], [], []>} : vector<64x24xbf16>, vector<24x8xbf16>, vector<64x8xf32> -> vector<64x8xf32>
    %99 = arith.addf %80, %98 : vector<64x8xf32>
    %100 = vector.extract_strided_slice %77 {offsets = [1, 0, 0], sizes = [16, 8, 8], strides = [1, 1, 1]} : vector<18x8x8xf32> to vector<16x8x8xf32>
    %101 = vector.shape_cast %100 : vector<16x8x8xf32> to vector<8x2x8x8xf32>
    %102 = vector.extract_strided_slice %101 {offsets = [0, 0, 0, 0], sizes = [8, 1, 8, 8], strides = [1, 1, 1, 1]} : vector<8x2x8x8xf32> to vector<8x1x8x8xf32>
    %103 = vector.shape_cast %102 : vector<8x1x8x8xf32> to vector<8x8x8xf32>
    %104 = vector.extract_strided_slice %78 {offsets = [1, 0, 0], sizes = [16, 8, 8], strides = [1, 1, 1]} : vector<18x8x8xf32> to vector<16x8x8xf32>
    %105 = vector.shape_cast %104 : vector<16x8x8xf32> to vector<8x2x8x8xf32>
    %106 = vector.extract_strided_slice %105 {offsets = [0, 0, 0, 0], sizes = [8, 1, 8, 8], strides = [1, 1, 1, 1]} : vector<8x2x8x8xf32> to vector<8x1x8x8xf32>
    %107 = vector.shape_cast %106 : vector<8x1x8x8xf32> to vector<8x8x8xf32>
    %108 = vector.extract_strided_slice %79 {offsets = [1, 0, 0], sizes = [16, 8, 8], strides = [1, 1, 1]} : vector<18x8x8xf32> to vector<16x8x8xf32>
    %109 = vector.shape_cast %108 : vector<16x8x8xf32> to vector<8x2x8x8xf32>
    %110 = vector.extract_strided_slice %109 {offsets = [0, 0, 0, 0], sizes = [8, 1, 8, 8], strides = [1, 1, 1, 1]} : vector<8x2x8x8xf32> to vector<8x1x8x8xf32>
    %111 = vector.shape_cast %110 : vector<8x1x8x8xf32> to vector<8x8x8xf32>
    %112 = tpu.concatenate %103, %107, %111 in 2 : vector<8x8x8xf32>, vector<8x8x8xf32>, vector<8x8x8xf32> -> vector<8x8x24xf32>
    %113 = vector.shape_cast %112 : vector<8x8x24xf32> to vector<64x24xf32>
    %114 = arith.truncf %113 : vector<64x24xf32> to vector<64x24xbf16>
    %c1_81 = arith.constant 1 : index
    %c0_82 = arith.constant 0 : index
    %c0_83 = arith.constant 0 : index
    %115 = vector.load %arg6[%c1_81, %c0_82, %c0_83] : memref<3x24x8xbf16, #tpu.memory_space<vmem>>, vector<1x24x8xbf16>
    %116 = vector.shape_cast %115 : vector<1x24x8xbf16> to vector<24x8xbf16>
    %cst_84 = arith.constant dense<0.000000e+00> : vector<64x8xf32>
    %117 = tpu.matmul %114, %116, %cst_84 {dimension_numbers = #tpu.dot_dimension_numbers<[1], [0], [0], [1], [0, 0, 1, 1], [], []>} : vector<64x24xbf16>, vector<24x8xbf16>, vector<64x8xf32> -> vector<64x8xf32>
    %118 = arith.addf %99, %117 : vector<64x8xf32>
    %119 = vector.extract_strided_slice %77 {offsets = [2, 0, 0], sizes = [16, 8, 8], strides = [1, 1, 1]} : vector<18x8x8xf32> to vector<16x8x8xf32>
    %120 = vector.shape_cast %119 : vector<16x8x8xf32> to vector<8x2x8x8xf32>
    %121 = vector.extract_strided_slice %120 {offsets = [0, 0, 0, 0], sizes = [8, 1, 8, 8], strides = [1, 1, 1, 1]} : vector<8x2x8x8xf32> to vector<8x1x8x8xf32>
    %122 = vector.shape_cast %121 : vector<8x1x8x8xf32> to vector<8x8x8xf32>
    %123 = vector.extract_strided_slice %78 {offsets = [2, 0, 0], sizes = [16, 8, 8], strides = [1, 1, 1]} : vector<18x8x8xf32> to vector<16x8x8xf32>
    %124 = vector.shape_cast %123 : vector<16x8x8xf32> to vector<8x2x8x8xf32>
    %125 = vector.extract_strided_slice %124 {offsets = [0, 0, 0, 0], sizes = [8, 1, 8, 8], strides = [1, 1, 1, 1]} : vector<8x2x8x8xf32> to vector<8x1x8x8xf32>
    %126 = vector.shape_cast %125 : vector<8x1x8x8xf32> to vector<8x8x8xf32>
    %127 = vector.extract_strided_slice %79 {offsets = [2, 0, 0], sizes = [16, 8, 8], strides = [1, 1, 1]} : vector<18x8x8xf32> to vector<16x8x8xf32>
    %128 = vector.shape_cast %127 : vector<16x8x8xf32> to vector<8x2x8x8xf32>
    %129 = vector.extract_strided_slice %128 {offsets = [0, 0, 0, 0], sizes = [8, 1, 8, 8], strides = [1, 1, 1, 1]} : vector<8x2x8x8xf32> to vector<8x1x8x8xf32>
    %130 = vector.shape_cast %129 : vector<8x1x8x8xf32> to vector<8x8x8xf32>
    %131 = tpu.concatenate %122, %126, %130 in 2 : vector<8x8x8xf32>, vector<8x8x8xf32>, vector<8x8x8xf32> -> vector<8x8x24xf32>
    %132 = vector.shape_cast %131 : vector<8x8x24xf32> to vector<64x24xf32>
    %133 = arith.truncf %132 : vector<64x24xf32> to vector<64x24xbf16>
    %c2_85 = arith.constant 2 : index
    %c0_86 = arith.constant 0 : index
    %c0_87 = arith.constant 0 : index
    %134 = vector.load %arg6[%c2_85, %c0_86, %c0_87] : memref<3x24x8xbf16, #tpu.memory_space<vmem>>, vector<1x24x8xbf16>
    %135 = vector.shape_cast %134 : vector<1x24x8xbf16> to vector<24x8xbf16>
    %cst_88 = arith.constant dense<0.000000e+00> : vector<64x8xf32>
    %136 = tpu.matmul %133, %135, %cst_88 {dimension_numbers = #tpu.dot_dimension_numbers<[1], [0], [0], [1], [0, 0, 1, 1], [], []>} : vector<64x24xbf16>, vector<24x8xbf16>, vector<64x8xf32> -> vector<64x8xf32>
    %137 = arith.addf %118, %136 : vector<64x8xf32>
    %c0_89 = arith.constant 0 : index
    %c0_90 = arith.constant 0 : index
    %138 = vector.load %arg7[%c0_89, %c0_90] : memref<1x8xf32, #tpu.memory_space<vmem>>, vector<1x8xf32>
    %139 = vector.broadcast %138 : vector<1x8xf32> to vector<64x8xf32>
    %140 = arith.addf %137, %139 : vector<64x8xf32>
    %141 = arith.addf %140, %13 : vector<64x8xf32>
    %c0_91 = arith.constant 0 : index
    %c0_92 = arith.constant 0 : index
    %c0_93 = arith.constant 0 : index
    %142 = vector.load %arg10[%c0_91, %c0_92, %c0_93] : memref<1x64x8xf32, #tpu.memory_space<vmem>>, vector<1x64x8xf32>
    %143 = vector.shape_cast %142 : vector<1x64x8xf32> to vector<64x8xf32>
    %144 = vector.shape_cast %141 : vector<64x8xf32> to vector<1x64x8xf32>
    tpu.vector_store %arg10[%c0_91, %c0_92, %c0_93], %144 {strides = array<i32>} : memref<1x64x8xf32, #tpu.memory_space<vmem>>, vector<1x64x8xf32>,
    return
  }
  func.func @transform_0(%arg0: i32) -> (i32, i32, i32, i32) {
    %c0_i32 = arith.constant 0 : i32
    %c0_i32_0 = arith.constant 0 : i32
    %c0_i32_1 = arith.constant 0 : i32
    %c0_i32_2 = arith.constant 0 : i32
    return %arg0, %c0_i32, %c0_i32_0, %c0_i32_1 : i32, i32, i32, i32
  }
  func.func @transform_1(%arg0: i32) -> (i32, i32) {
    %c0_i32 = arith.constant 0 : i32
    %c0_i32_0 = arith.constant 0 : i32
    %c0_i32_1 = arith.constant 0 : i32
    return %c0_i32, %c0_i32_0 : i32, i32
  }
  func.func @transform_2(%arg0: i32) -> (i32, i32) {
    %c0_i32 = arith.constant 0 : i32
    %c0_i32_0 = arith.constant 0 : i32
    %c0_i32_1 = arith.constant 0 : i32
    return %c0_i32, %c0_i32_0 : i32, i32
  }
  func.func @transform_3(%arg0: i32) -> (i32, i32, i32) {
    %c0_i32 = arith.constant 0 : i32
    %c0_i32_0 = arith.constant 0 : i32
    %c0_i32_1 = arith.constant 0 : i32
    %c0_i32_2 = arith.constant 0 : i32
    return %c0_i32, %c0_i32_0, %c0_i32_1 : i32, i32, i32
  }
  func.func @transform_4(%arg0: i32) -> (i32, i32) {
    %c0_i32 = arith.constant 0 : i32
    %c0_i32_0 = arith.constant 0 : i32
    %c0_i32_1 = arith.constant 0 : i32
    return %c0_i32, %c0_i32_0 : i32, i32
  }
  func.func @transform_5(%arg0: i32) -> (i32, i32, i32) {
    %c0_i32 = arith.constant 0 : i32
    %c0_i32_0 = arith.constant 0 : i32
    %c0_i32_1 = arith.constant 0 : i32
    %c0_i32_2 = arith.constant 0 : i32
    return %c0_i32, %c0_i32_0, %c0_i32_1 : i32, i32, i32
  }
  func.func @transform_6(%arg0: i32) -> (i32, i32) {
    %c0_i32 = arith.constant 0 : i32
    %c0_i32_0 = arith.constant 0 : i32
    %c0_i32_1 = arith.constant 0 : i32
    return %c0_i32, %c0_i32_0 : i32, i32
  }
  func.func @transform_7(%arg0: i32) -> (i32, i32) {
    %c0_i32 = arith.constant 0 : i32
    %c0_i32_0 = arith.constant 0 : i32
    %c0_i32_1 = arith.constant 0 : i32
    return %c0_i32, %c0_i32_0 : i32, i32
  }
  func.func @transform_8(%arg0: i32) -> (i32, i32) {
    %c0_i32 = arith.constant 0 : i32
    %c0_i32_0 = arith.constant 0 : i32
    %c0_i32_1 = arith.constant 0 : i32
    return %c0_i32, %c0_i32_0 : i32, i32
  }
  func.func @transform_9(%arg0: i32) -> (i32, i32, i32) {
    %c0_i32 = arith.constant 0 : i32
    %c0_i32_0 = arith.constant 0 : i32
    %c0_i32_1 = arith.constant 0 : i32
    return %arg0, %c0_i32, %c0_i32_0 : i32, i32, i32
  }
}

</mosaic_0001>

<bundles_post_ra>
// kernel: tpu_custom_call.1
= control target key start
LH: loop header
LB: loop body
LE: loop exit
PB: predicated region body
PF: predicated region fallthrough
CT: control target
= control target key end

     0   :  { %s3903_s30 = smov 0   ;;  %s4974_s0 = inlined_call_operand.vmem [shape: f32[2,16,16,4], index: 0, kind: input, shape index: {}]   ;;  %s4975_s1 = inlined_call_operand.vmem [shape: f32[1,4], index: 1, kind: input, shape index: {}]   ;;  %s4976_s2 = inlined_call_operand.vmem [shape: f32[1,4], index: 2, kind: input, shape index: {}]   ;;  %s4977_s3 = inlined_call_operand.vmem [shape: bf16[3,12,8], index: 3, kind: input, shape index: {}]   ;;  %s4978_s4 = inlined_call_operand.vmem [shape: f32[1,8], index: 4, kind: input, shape index: {}]   ;;  %s4979_s5 = inlined_call_operand.vmem [shape: bf16[3,24,8], index: 5, kind: input, shape index: {}]   ;;  %s4980_s6 = inlined_call_operand.vmem [shape: f32[1,8], index: 6, kind: input, shape index: {}]   ;;  %s4981_s7 = inlined_call_operand.vmem [shape: bf16[4,8], index: 7, kind: input, shape index: {}]   ;;  %s4982_s8 = inlined_call_operand.vmem [shape: f32[1,8], index: 8, kind: input, shape index: {}]   ;;  %s4983_s9 = inlined_call_operand.vmem [shape: f32[2,64,8], index: 9, kind: output, shape index: {}]  }
   0x1 LB: > { %s3263_s10 = sadd.s32 4294967295, %s3846_s30   ;;  %p3267_p0 = scmp.ge.s32.totalorder %s3846_s30, 1  ;;  %s3846_s30 = sphi %s3903_s30, %s19_s30  }
   0x2   : > { %p287_p1 = scmp.lt.s32.totalorder %s3846_s30, 3 }
   0x4   : > { %p288_p2 = pnand %p3267_p0, %p287_p1 }
   0x5   : > { %p323_p3 = scmp.lt.s32.totalorder (!%p288_p2), %s3263_s10, 1  ;;  %s3849_s19 = smov (!%p288_p2), 8  }
   0x6   : > { %291 = sbr.rel (%p288_p2) target bundleno = 917 (0x395), region = 56  ;;  %s3850_s20 = smov (!%p288_p2), 4  }
   0xb   : > { %vm569_vm0 = vcmask 27648   ;;  %vm572_vm1 = vcmask 24576   ;;  %vm579_vm2 = vsmask.f32 256  ;;  %v584_v0 = vld [vmem:[#allocation2 + $0xc] sm:$0x1] }
   0xc   : > { %s4993_s10 = smov (!%p323_p3, %s3263_s10), 1  ;;  %vm3915_vm3 = vmand %vm572_vm1, %vm579_vm2  ;;  %vm635_vm4 = vsmask.f32 7938  ;;  %v640_v2 = vld [vmem:[#allocation2 + $0x14] sm:$0x1]  ;;  %v3848_v6 = vmov 0  }
   0xd   : > { %v3922_v3 = vld [vmem:[%s4975_s1] ss:$0 sm:$0xff]  ;;  %v585_v4 = vsel %vm3915_vm3, 0, %v584_v0  ;;  %vm3928_vm5 = vmand %vm572_vm1, %vm635_vm4  ;;  %570 = vst.msk [vmem:[#allocation2] sm:$0xf] %vm569_vm0, %v3848_v6  ;;  %s3430_s13 = sshll.u32 %s4993_s10, 8 }
   0xe   : > { %571 = vst.msk [vmem:[#allocation2 + $0x4] sm:$0xf] %vm569_vm0, %v3848_v6  ;;  %575 = vst.msk [vmem:[#allocation2 + $0xcc] sm:$0xf] %vm569_vm0, %v3848_v6  ;;  %v3942_v7 = vld [vmem:[%s4976_s2] ss:$0 sm:$0xff]  ;;  %s3949_s18 = scalar_lea.vmem %s4974_s0, %s3430_s13 }
   0xf   : > { %573 = vst.msk [vmem:[#allocation2 + $0x8] sm:$0x1] %vm572_vm1, %v3848_v6  ;;  %577 = vst.msk [vmem:[#allocation2 + $0xd4] sm:$0x1] %vm572_vm1, %v3848_v6  ;;  %v641_v8 = vsel %vm3928_vm5, 0, %v640_v2  ;;  %v3954_v13 = vld [vmem:[%s3949_s18] sm:$0xff] }
  0x10   : > { %576 = vst.msk [vmem:[#allocation2 + $0xd0] sm:$0xf] %vm569_vm0, %v3848_v6  ;;  %586 = vst [vmem:[#allocation2 + $0xc] sm:$0x1] %v585_v4  ;;  %v587_v9 = vld [vmem:[#allocation2 + $0x18] sm:$0x1]  ;;  %v498_v18 = vmul.f32 %v3922_v3, %v3954_v13 }
  0x11   : > { %642 = vst [vmem:[#allocation2 + $0x14] sm:$0x1] %v641_v8  ;;  %v588_v10 = vsel %vm3915_vm3, 0, %v587_v9  ;;  %v643_v11 = vld [vmem:[#allocation2 + $0x20] sm:$0x1]  ;;  %v3957_v14 = vld [vmem:[%s3949_s18 + $0x8] sm:$0xff]  ;;  %vm4002_vm8 = vmand %vm569_vm0, %vm635_vm4 }
  0x12   : > { %v593_v12 = vld [vmem:[#allocation2 + $0x30] sm:$0x1]  ;;  %589 = vst [vmem:[#allocation2 + $0x18] sm:$0x1] %v588_v10  ;;  %v644_v16 = vsel %vm3928_vm5, 0, %v643_v11  ;;  %v499_v19 = vmul.f32 %v3922_v3, %v3957_v14  ;;  %v337_v20 = vld [vmem:[%s3949_s18 + $0x18] sm:$0xff]  ;;  %v537_v30 = vadd.f32 %v3942_v7, %v498_v18 }
  0x13   : > { %v336_v15 = vld [vmem:[%s3949_s18 + $0x10] sm:$0xff]  ;;  %v594_v17 = vsel %vm3915_vm3, 0, %v593_v12  ;;  %645 = vst [vmem:[#allocation2 + $0x20] sm:$0x1] %v644_v16  ;;  %v341_v23 = vld [vmem:[%s3949_s18 + $0x38] sm:$0xff]  ;;  %v501_v24 = vmul.f32 %v3922_v3, %v337_v20  ;;  %v3976_v28 = vld [vmem:[%s3949_s18 + $0x20] sm:$0xff] }
  0x14   : > { %v500_v21 = vmul.f32 %v3922_v3, %v336_v15  ;;  %v340_v22 = vld [vmem:[%s3949_s18 + $0x30] sm:$0xff]  ;;  %595 = vst [vmem:[#allocation2 + $0x30] sm:$0x1] %v594_v17  ;;  %vm787_vm6 = vsmask.f32 4368  ;;  %v505_v26 = vmul.f32 %v3922_v3, %v341_v23  ;;  %v3979_v29 = vld [vmem:[%s3949_s18 + $0x28] sm:$0xff]  ;;  %v538_v31 = vadd.f32 %v3942_v7, %v499_v19 }
  0x15   : > { %v504_v25 = vmul.f32 %v3922_v3, %v340_v22  ;;  %v649_v27 = vld [vmem:[#allocation2 + $0x38] sm:$0x1]  ;;  %v540_v34 = vadd.f32 %v3942_v7, %v501_v24  ;;  %v502_v37 = vmul.f32 %v3922_v3, %v3976_v28  ;;  %v3432_v38 = vpack.c.bf16 %v537_v30, %v537_v30  ;;  %vm3996_vm7 = vmor %vm579_vm2, %vm787_vm6  ;;  %v590_v18 = vld [vmem:[#allocation2 + $0x24] sm:$0x1]  ;;  %s3431_s14 = sshll.u32 %s4993_s10, 6 }
  0x16   : > { %v539_v32 = vadd.f32 %v3942_v7, %v500_v21  ;;  %v650_v33 = vsel %vm3928_vm5, 0, %v649_v27  ;;  %v544_v36 = vadd.f32 %v3942_v7, %v505_v26  ;;  %v3433_v39 = vpack.c.bf16 %v538_v31, %v538_v31  ;;  %v646_v23 = vld [vmem:[#allocation2 + $0x2c] sm:$0x1]  ;;  %v344_v31 = vld [vmem:[%s3949_s18 + $0x50] sm:$0xff]  ;;  %v3824_v60 = vld [vmem:[%s4977_s3] sm:$0x3f]   ;;  %s4947_s17 = scalar_lea.vmem %s4983_s9, %s3431_s14 }
  0x17   : > { %v543_v35 = vadd.f32 %v3942_v7, %v504_v25  ;;  %651 = vst [vmem:[#allocation2 + $0x38] sm:$0x1] %v650_v33  ;;  %v503_v41 = vmul.f32 %v3922_v3, %v3979_v29  ;;  %v3435_v42 = vpack.c.bf16 %v540_v34, %v540_v34  ;;  %v541_v45 = vadd.f32 %v3942_v7, %v502_v37  ;;  %v1112_v57 = vld [vmem:[#allocation2 + $0xc] sm:$0xf] }
  0x18   : > { %v3434_v40 = vpack.c.bf16 %v539_v32, %v539_v32  ;;  %v3439_v44 = vpack.c.bf16 %v544_v36, %v544_v36  ;;  %v790_v46 = vshrl.u32 %v3432_v38, 16  ;;  %v793_v47 = vshll.u32 %v3432_v38, 16  ;;  %v1116_v61 = vld [vmem:[#allocation2 + $0x14] sm:$0x1]  ;;  %v345_v32 = vld [vmem:[%s3949_s18 + $0x58] sm:$0xff] }
  0x19   : > { %v3438_v43 = vpack.c.bf16 %v543_v35, %v543_v35  ;;  %v798_v48 = vshrl.u32 %v3433_v39, 16  ;;  %v801_v49 = vshll.u32 %v3433_v39, 16  ;;  %v815_v52 = vshrl.u32 %v3435_v42, 16  ;;  %v1119_v10 = vld [vmem:[#allocation2 + $0x18] sm:$0xf] }
  0x1a   : > { %v807_v50 = vshrl.u32 %v3434_v40, 16  ;;  %v810_v51 = vshll.u32 %v3434_v40, 16  ;;  %v818_v53 = vshll.u32 %v3435_v42, 16  ;;  %v792_v55 = vrot.slane %v790_v46, 7  ;;  %v1123_v11 = vld [vmem:[#allocation2 + $0x20] sm:$0x1] }
  0x1b   : > { %v800_v56 = vrot.slane %v798_v48, 7  ;;  %v841_v58 = vshrl.u32 %v3438_v43, 16  ;;  %v844_v59 = vshll.u32 %v3438_v43, 16  ;;  %v817_v63 = vrot.slane %v815_v52, 7  ;;  %v1133_v30 = vld [vmem:[#allocation2 + $0x30] sm:$0xf] }
  0x1c   : > { %v809_v62 = vrot.slane %v807_v50, 7  ;;  %v849_v0 = vshrl.u32 %v3439_v44, 16  ;;  %v852_v2 = vshll.u32 %v3439_v44, 16  ;;  %v795_v4 = vor.u32 %v793_v47, %v792_v55  ;;  %v599_v47 = vld [vmem:[#allocation2 + $0x48] sm:$0x1] }
  0x1d   : > { %v796_v6 = vrot.slane %v792_v55, 4  ;;  %v803_v8 = vor.u32 %v801_v49, %v800_v56  ;;  %v805_v9 = vrot.slane %v800_v56, 4  ;;  %v820_v16 = vor.u32 %v818_v53, %v817_v63  ;;  %v655_v48 = vld [vmem:[#allocation2 + $0x50] sm:$0x1]  ;;  %v4034_v49 = vld [vmem:[%s3949_s18 + $0x40] sm:$0xff]  ;;  %v4041_v53 = vld [vmem:[%s3949_s18 + $0x48] sm:$0xff] }
  0x1e   : > { %v812_v12 = vor.u32 %v810_v51, %v809_v62  ;;  %v813_v15 = vrot.slane %v809_v62, 4  ;;  %v822_v17 = vrot.slane %v817_v63, 4  ;;  %v1113_v20 = vsel %vm4002_vm8, %v795_v4, %v1112_v57  ;;  %v1137_v35 = vld [vmem:[#allocation2 + $0x38] sm:$0x1]  ;;  %v348_v55 = vld [vmem:[%s3949_s18 + $0x70] sm:$0xff]  ;;  %v4051_v62 = vld [vmem:[%s3949_s18 + $0x60] sm:$0xff] }
  0x1f   : > { %v804_v19 = vsel %vm3996_vm7, %v796_v6, %v803_v8  ;;  %v1117_v21 = vsel %vm3915_vm3, %v805_v9, %v1116_v61  ;;  %v843_v22 = vrot.slane %v841_v58, 7  ;;  %1114 = vst [vmem:[#allocation2 + $0xc] sm:$0xf] %v1113_v20  ;;  %v851_v27 = vrot.slane %v849_v0, 7  ;;  %v349_v61 = vld [vmem:[%s3949_s18 + $0x78] sm:$0xff]  ;;  %v4062_v6 = vld [vmem:[%s3949_s18 + $0x68] sm:$0xff] }
  0x20   : > { %1115 = vst.msk [vmem:[#allocation2 + $0x10] sm:$0xf] %vm569_vm0, %v804_v19  ;;  %1118 = vst [vmem:[#allocation2 + $0x14] sm:$0x1] %v1117_v21  ;;  %v821_v24 = vsel %vm3996_vm7, %v813_v15, %v820_v16  ;;  %v1120_v25 = vsel %vm4002_vm8, %v812_v12, %v1119_v10  ;;  %v1124_v26 = vsel %vm3915_vm3, %v822_v17, %v1123_v11  ;;  %vm1631_vm9 = vcmask 1046528  }
  0x21   : > { %1121 = vst [vmem:[#allocation2 + $0x18] sm:$0xf] %v1120_v25  ;;  %1122 = vst.msk [vmem:[#allocation2 + $0x1c] sm:$0xf] %vm569_vm0, %v821_v24  ;;  %v846_v33 = vor.u32 %v844_v59, %v843_v22  ;;  %v847_v34 = vrot.slane %v843_v22, 4  ;;  %v542_v36 = vadd.f32 %v3942_v7, %v503_v41  ;;  %v591_v37 = vsel %vm3915_vm3, 0, %v590_v18 }
  0x22   : > { %1125 = vst [vmem:[#allocation2 + $0x20] sm:$0x1] %v1124_v26  ;;  %v854_v38 = vor.u32 %v852_v2, %v851_v27  ;;  %v856_v39 = vrot.slane %v851_v27, 4  ;;  %592 = vst [vmem:[#allocation2 + $0x24] sm:$0x1] %v591_v37  ;;  %v647_v40 = vsel %vm3928_vm5, 0, %v646_v23  ;;  %v3436_v42 = vpack.c.bf16 %v541_v45, %v541_v45 }
  0x23   : > { %v1134_v43 = vsel %vm4002_vm8, %v846_v33, %v1133_v30  ;;  %648 = vst [vmem:[#allocation2 + $0x2c] sm:$0x1] %v647_v40  ;;  %v4029_v44 = vpack.c.bf16 %v542_v36, %v542_v36  ;;  %v508_v41 = vmul.f32 %v3922_v3, %v344_v31  ;;  %v509_v46 = vmul.f32 %v3922_v3, %v345_v32 }
  0x24   : > { %v855_v50 = vsel %vm3996_vm7, %v847_v34, %v854_v38  ;;  %1135 = vst [vmem:[#allocation2 + $0x30] sm:$0xf] %v1134_v43  ;;  %v1138_v45 = vsel %vm3915_vm3, %v856_v39, %v1137_v35  ;;  %v824_v51 = vshrl.u32 %v3436_v42, 16  ;;  %v827_v52 = vshll.u32 %v3436_v42, 16 }
  0x25   : > { %vm1406_vm10 = vsmask.f32 7424  ;;  %1136 = vst.msk [vmem:[#allocation2 + $0x34] sm:$0xf] %vm569_vm0, %v855_v50  ;;  %1139 = vst [vmem:[#allocation2 + $0x38] sm:$0x1] %v1138_v45  ;;  %v547_v58 = vadd.f32 %v3942_v7, %v508_v41  ;;  %v548_v59 = vadd.f32 %v3942_v7, %v509_v46  ;;  %v506_v4 = vmul.f32 %v3922_v3, %v4034_v49 }
  0x26   : > { %v832_v56 = vshrl.u32 %v4029_v44, 16  ;;  %v835_v57 = vshll.u32 %v4029_v44, 16  ;;  %v4053_v63 = vrot.slane %v824_v51, 7  ;;  %v600_v0 = vsel %vm3915_vm3, 0, %v599_v47 }
  0x27   : > { %v656_v2 = vsel %vm3928_vm5, 0, %v655_v48  ;;  %601 = vst [vmem:[#allocation2 + $0x48] sm:$0x1] %v600_v0  ;;  %v4064_v8 = vpack.c.bf16 %v547_v58, %v547_v58  ;;  %v4066_v9 = vpack.c.bf16 %v548_v59, %v548_v59  ;;  %v507_v10 = vmul.f32 %v3922_v3, %v4041_v53  ;;  %v3786_v12 = vld [vmem:[#allocation2 + $0xc] sm:$0xff]  }
  0x28   : > { %657 = vst [vmem:[#allocation2 + $0x50] sm:$0x1] %v656_v2  ;;  %v512_v11 = vmul.f32 %v3922_v3, %v348_v55  ;;  %v3787_v15 = vld [vmem:[#allocation2 + $0x14] ss:$0 sps:$4 sm:$0x11]   ;;  %v829_v16 = vor.u32 %v827_v52, %v4053_v63  ;;  %v545_v17 = vadd.f32 %v3942_v7, %v506_v4  ;;  %v4074_v18 = vmul.f32 %v3922_v3, %v349_v61  ;;  %v3788_v20 = vld [vmem:[#allocation2 + $0x18] sm:$0xff]  }
  0x29   : > { %v4078_v19 = vmul.f32 %v3922_v3, %v4051_v62  ;;  %v830_v21 = vrot.slane %v4053_v63, 4  ;;  %v546_v22 = vadd.f32 %v3942_v7, %v507_v10  ;;  %v4087_v24 = vmul.f32 %v3922_v3, %v4062_v6  ;;  %v1126_v31 = vld [vmem:[#allocation2 + $0x24] sm:$0xf]  ;;  %v3789_v33 = vld [vmem:[#allocation2 + $0x20] ss:$0 sps:$4 sm:$0x11]  }
  0x2a   : > { %v4083_v23 = vadd.f32 %v3942_v7, %v512_v11  ;;  %v1635_v25 = vrot.slane %v3786_v12, 1  ;;  %v1636_v26 = vrot.slane %v3787_v15, 1  ;;  %v1420_v27 = vshrl.u32 %v3786_v12, 16  ;;  %v1130_v4 = vld [vmem:[#allocation2 + $0x2c] sm:$0x1] }
  0x2b   : > { %v1422_v30 = vshll.u32 %v3786_v12, 16  ;;  %v1427_v32 = vshll.u32 %v3787_v15, 16  ;;  %v1638_v34 = vrot.slane %v3788_v20, 1  ;;  %v1432_v35 = vshrl.u32 %v3788_v20, 16  ;;  %v596_v15 = vld [vmem:[#allocation2 + $0x3c] sm:$0x1] }
  0x2c   : > { %v1127_v36 = vsel %vm4002_vm8, %v829_v16, %v1126_v31  ;;  %v1637_v37 = vsel %vm1631_vm9, %v1635_v25, %v1636_v26  ;;  %v1434_v39 = vshll.u32 %v3788_v20, 16  ;;  %v4092_v40 = vpack.c.bf16 %v545_v17, %v545_v17  ;;  %v3790_v41 = vld [vmem:[#allocation2 + $0x30] sm:$0xff]   ;;  %v3791_v50 = vld [vmem:[#allocation2 + $0x38] ss:$0 sps:$4 sm:$0x11]  }
  0x2d   : > { %v1424_v38 = vrot.slane %v1422_v30, 1  ;;  %1128 = vst [vmem:[#allocation2 + $0x24] sm:$0xf] %v1127_v36  ;;  %1682 = vrot.lane.b32.xlu1 %v1637_v37, %s3849_s19  ;;  %v1429_v42 = vrot.slane %v1427_v32, 1  ;;  %v1639_v43 = vrot.slane %v3789_v33, 1  ;;  %v1439_v44 = vshll.u32 %v3789_v33, 16 }
  0x2e   : > { %v4095_v46 = vpack.c.bf16 %v546_v22, %v546_v22  ;;  %v1436_v48 = vrot.slane %v1434_v39, 1  ;;  %v834_v45 = vrot.slane %v832_v56, 7  ;;  %v875_v51 = vshrl.u32 %v4064_v8, 16  ;;  %v652_v25 = vld [vmem:[#allocation2 + $0x44] sm:$0x1] }
  0x2f   : > { %v1425_v47 = vor.u32 %v1424_v38, %v1420_v27  ;;  %v1640_v52 = vsel %vm1631_vm9, %v1638_v34, %v1639_v43  ;;  %v1441_v55 = vrot.slane %v1439_v44, 1  ;;  %v1456_v58 = vshrl.u32 %v3790_v41, 16  ;;  %v605_v31 = vld [vmem:[#allocation2 + $0x60] sm:$0x1]  ;;  %v661_v39 = vld [vmem:[#allocation2 + $0x68] sm:$0x1] }
  0x30   : > { %v1458_v59 = vshll.u32 %v3790_v41, 16  ;;  %v1437_v63 = vor.u32 %v1436_v48, %v1432_v35  ;;  %v1463_v0 = vshll.u32 %v3791_v50, 16  ;;  %v837_v2 = vor.u32 %v835_v57, %v834_v45 }
  0x31   : > { %v1430_v61 = vsel %vm1406_vm10, %v1425_v47, %v1429_v42  ;;  %1684 = vrot.lane.b32.xlu1 %v1640_v52, %s3849_s19  ;;  %v839_v56 = vrot.slane %v834_v45, 4  ;;  %v1644_v11 = vrot.slane %v3790_v41, 1  ;;  %v1645_v12 = vrot.slane %v3791_v50, 1  ;;  %v1151_v47 = vld [vmem:[#allocation2 + $0x50] sm:$0x1] }
  0x32   : > { %1601 = vrot.lane.b32.xlu0 %v1430_v61, %s3850_s20  ;;  %v1460_v10 = vrot.slane %v1458_v59, 1  ;;  %v1442_v16 = vsel %vm1406_vm10, %v1437_v63, %v1441_v55  ;;  %v1465_v17 = vrot.slane %v1463_v0, 1  ;;  %v838_v20 = vsel %vm3996_vm7, %v830_v21, %v837_v2  ;;  %v1147_v21 = vld [vmem:[#allocation2 + $0x48] sm:$0xf] }
  0x33   : > { %v877_v22 = vrot.slane %v875_v51, 7  ;;  %1129 = vst.msk [vmem:[#allocation2 + $0x28] sm:$0xf] %vm569_vm0, %v838_v20  ;;  %v1131_v26 = vsel %vm3915_vm3, %v839_v56, %v1130_v4  ;;  %v1646_v27 = vsel %vm1631_vm9, %v1644_v11, %v1645_v12  ;;  %v878_v30 = vshll.u32 %v4064_v8, 16 }
  0x34   : > { %v1461_v57 = vor.u32 %v1460_v10, %v1456_v58  ;;  %1132 = vst [vmem:[#allocation2 + $0x2c] sm:$0x1] %v1131_v26  ;;  %v883_v33 = vshrl.u32 %v4066_v9, 16  ;;  %v886_v34 = vshll.u32 %v4066_v9, 16  ;;  %v597_v35 = vsel %vm3915_vm3, 0, %v596_v15 }
  0x35   : > { %v881_v32 = vrot.slane %v877_v22, 4  ;;  %v880_v37 = vor.u32 %v878_v30, %v877_v22  ;;  %598 = vst [vmem:[#allocation2 + $0x3c] sm:$0x1] %v597_v35  ;;  %v653_v8 = vsel %vm3928_vm5, 0, %v652_v25  ;;  %v858_v38 = vshrl.u32 %v4092_v40, 16  ;;  %v353_v35 = vld [vmem:[%s3949_s18 + $0x98] sm:$0xff] }
  0x36   : > { %1603 = vrot.lane.b32.xlu0 %v1442_v16, %s3850_s20  ;;  %v1466_v36 = vsel %vm1406_vm10, %v1461_v57, %v1465_v17  ;;  %v885_v42 = vrot.slane %v883_v33, 7  ;;  %654 = vst [vmem:[#allocation2 + $0x44] sm:$0x1] %v653_v8  ;;  %v861_v9 = vshll.u32 %v4092_v40, 16  ;;  %v866_v43 = vshrl.u32 %v4095_v46, 16 }
  0x37   : > { %1607 = vrot.lane.b32.xlu1 %v1466_v36, %s3850_s20  ;;  %v869_v44 = vshll.u32 %v4095_v46, 16  ;;  %v1148_v41 = vsel %vm4002_vm8, %v880_v37, %v1147_v21  ;;  %v860_v48 = vrot.slane %v858_v38, 7  ;;  %v552_v50 = vadd.f32 %v3942_v7, %v4074_v18  ;;  %v352_v46 = vld [vmem:[%s3949_s18 + $0x90] sm:$0xff]  ;;  %v658_v26 = vld [vmem:[#allocation2 + $0x5c] sm:$0x1] }
  0x38   : > { %v606_v45 = vsel %vm3915_vm3, 0, %v605_v31  ;;  %v888_v51 = vor.u32 %v886_v34, %v885_v42  ;;  %v890_v52 = vrot.slane %v885_v42, 4  ;;  %1149 = vst [vmem:[#allocation2 + $0x48] sm:$0xf] %v1148_v41  ;;  %v868_v55 = vrot.slane %v866_v43, 7 }
  0x39   : > { %607 = vst [vmem:[#allocation2 + $0x60] sm:$0x1] %v606_v45  ;;  %v662_v40 = vsel %vm3928_vm5, 0, %v661_v39  ;;  %v863_v58 = vor.u32 %v861_v9, %v860_v48  ;;  %v864_v59 = vrot.slane %v860_v48, 4  ;;  %v3446_v61 = vpack.c.bf16 %v4083_v23, %v4083_v23  ;;  %v602_v15 = vld [vmem:[#allocation2 + $0x54] sm:$0x1] }
  0x3a   : > { %663 = vst [vmem:[#allocation2 + $0x68] sm:$0x1] %v662_v40  ;;  %v3447_v63 = vpack.c.bf16 %v552_v50, %v552_v50  ;;  %v3792_v18 = vld [vmem:[#allocation2 + $0x24] sm:$0xff]   ;;  %v889_v0 = vsel %vm3996_vm7, %v881_v32, %v888_v51  ;;  %v1152_v2 = vsel %vm3915_vm3, %v890_v52, %v1151_v47  ;;  %v871_v4 = vor.u32 %v869_v44, %v868_v55 }
  0x3b   : > { %1688 = vrot.lane.b32.xlu1 %v1646_v27, %s3849_s19  ;;  %v873_v10 = vrot.slane %v868_v55, 4  ;;  %v3793_v56 = vld [vmem:[#allocation2 + $0x2c] ss:$0 sps:$4 sm:$0x11]   ;;  %1150 = vst.msk [vmem:[#allocation2 + $0x4c] sm:$0xf] %vm569_vm0, %v889_v0  ;;  %v549_v23 = vadd.f32 %v3942_v7, %v4078_v19  ;;  %v550_v12 = vadd.f32 %v3942_v7, %v4087_v24  ;;  %v516_v16 = vmul.f32 %v3922_v3, %v352_v46 }
  0x3c   : > { %1153 = vst [vmem:[#allocation2 + $0x50] sm:$0x1] %v1152_v2  ;;  %v909_v11 = vshrl.u32 %v3446_v61, 16  ;;  %v1444_v17 = vshrl.u32 %v3792_v18, 16  ;;  %v1446_v20 = vshll.u32 %v3792_v18, 16  ;;  %v1641_v22 = vrot.slane %v3792_v18, 1 }
  0x3d   : > { %v872_v25 = vsel %vm3996_vm7, %v864_v59, %v871_v4  ;;  %v1140_v57 = vld [vmem:[#allocation2 + $0x3c] sm:$0xf]  ;;  %v1451_v27 = vshll.u32 %v3793_v56, 16  ;;  %v1642_v30 = vrot.slane %v3793_v56, 1  ;;  %v1144_v24 = vld [vmem:[#allocation2 + $0x44] sm:$0x1]  ;;  %v3444_v48 = vpack.c.bf16 %v549_v23, %v549_v23 }
  0x3e   : > { %v1141_v19 = vsel %vm4002_vm8, %v863_v58, %v1140_v57  ;;  %1143 = vst.msk [vmem:[#allocation2 + $0x40] sm:$0xf] %vm569_vm0, %v872_v25  ;;  %v911_v31 = vrot.slane %v909_v11, 7  ;;  %v1448_v32 = vrot.slane %v1446_v20, 1  ;;  %v1145_v33 = vsel %vm3915_vm3, %v873_v10, %v1144_v24  ;;  %v4160_v51 = vld [vmem:[%s3949_s18 + $0x80] sm:$0xff] }
  0x3f   : > { %1142 = vst [vmem:[#allocation2 + $0x3c] sm:$0xf] %v1141_v19  ;;  %v912_v34 = vshll.u32 %v3446_v61, 16  ;;  %v917_v21 = vshrl.u32 %v3447_v63, 16  ;;  %v1453_v36 = vrot.slane %v1451_v27, 1  ;;  %v1643_v37 = vsel %vm1631_vm9, %v1641_v22, %v1642_v30 }
  0x40   : > { %1146 = vst [vmem:[#allocation2 + $0x44] sm:$0x1] %v1145_v33  ;;  %v915_v8 = vrot.slane %v911_v31, 4  ;;  %v920_v38 = vshll.u32 %v3447_v63, 16  ;;  %v1449_v39 = vor.u32 %v1448_v32, %v1444_v17  ;;  %v1161_v43 = vld [vmem:[#allocation2 + $0x60] sm:$0xf]  ;;  %v3445_v50 = vpack.c.bf16 %v550_v12, %v550_v12 }
  0x41   : > { %v914_v42 = vor.u32 %v912_v34, %v911_v31  ;;  %v919_v9 = vrot.slane %v917_v21, 7  ;;  %v603_v44 = vsel %vm3915_vm3, 0, %v602_v15  ;;  %v1165_v41 = vld [vmem:[#allocation2 + $0x68] sm:$0x1]  ;;  %v659_v47 = vsel %vm3928_vm5, 0, %v658_v26 }
  0x42   : > { %604 = vst [vmem:[#allocation2 + $0x54] sm:$0x1] %v603_v44  ;;  %v517_v45 = vmul.f32 %v3922_v3, %v353_v35  ;;  %v1454_v52 = vsel %vm1406_vm10, %v1449_v39, %v1453_v36  ;;  %v3794_v55 = vld [vmem:[#allocation2 + $0x48] sm:$0xff]   ;;  %660 = vst [vmem:[#allocation2 + $0x5c] sm:$0x1] %v659_v47  ;;  %v892_v61 = vshrl.u32 %v3444_v48, 16  ;;  %v555_v0 = vadd.f32 %v3942_v7, %v516_v16 }
  0x43   : > { %v922_v40 = vor.u32 %v920_v38, %v919_v9  ;;  %v924_v46 = vrot.slane %v919_v9, 4  ;;  %v1162_v58 = vsel %vm4002_vm8, %v914_v42, %v1161_v43  ;;  %1605 = vrot.lane.b32.xlu0 %v1454_v52, %s3850_s20  ;;  %v3795_v59 = vld [vmem:[#allocation2 + $0x50] ss:$0 sps:$4 sm:$0x11]   ;;  %v895_v63 = vshll.u32 %v3444_v48, 16  ;;  %v4180_v42 = vld [vmem:[%s3949_s18 + $0x88] sm:$0xff] }
  0x44   : > { %1163 = vst [vmem:[#allocation2 + $0x60] sm:$0xf] %v1162_v58  ;;  %v900_v18 = vshrl.u32 %v3445_v50, 16  ;;  %v1480_v2 = vshrl.u32 %v3794_v55, 16  ;;  %v1482_v4 = vshll.u32 %v3794_v55, 16  ;;  %v1650_v10 = vrot.slane %v3794_v55, 1 }
  0x45   : > { %v923_v56 = vsel %vm3996_vm7, %v915_v8, %v922_v40  ;;  %v1487_v11 = vshll.u32 %v3795_v59, 16  ;;  %v1651_v12 = vrot.slane %v3795_v59, 1  ;;  %v1166_v15 = vsel %vm3915_vm3, %v924_v46, %v1165_v41  ;;  %v611_v24 = vld [vmem:[#allocation2 + $0x78] sm:$0x1]  ;;  %v667_v39 = vld [vmem:[#allocation2 + $0x80] sm:$0x1] }
  0x46   : > { %v3796_v23 = vld [vmem:[#allocation2 + $0x3c] sm:$0xff]   ;;  %1164 = vst.msk [vmem:[#allocation2 + $0x64] sm:$0xf] %vm569_vm0, %v923_v56  ;;  %v894_v17 = vrot.slane %v892_v61, 7  ;;  %v1484_v20 = vrot.slane %v1482_v4, 1  ;;  %v556_v16 = vadd.f32 %v3942_v7, %v517_v45  ;;  %v4173_v25 = vpack.c.bf16 %v555_v0, %v555_v0 }
  0x47   : > { %v3797_v22 = vld [vmem:[#allocation2 + $0x44] ss:$0 sps:$4 sm:$0x11]   ;;  %1167 = vst [vmem:[#allocation2 + $0x68] sm:$0x1] %v1166_v15  ;;  %v514_v57 = vmul.f32 %v3922_v3, %v4160_v51  ;;  %1686 = vrot.lane.b32.xlu0 %v1643_v37, %s3849_s19  ;;  %v1489_v26 = vrot.slane %v1487_v11, 1  ;;  %v1652_v19 = vsel %vm1631_vm9, %v1650_v10, %v1651_v12  ;;  %v515_v0 = vmul.f32 %v3922_v3, %v4180_v42 }
  0x48   : > { %v1468_v27 = vshrl.u32 %v3796_v23, 16  ;;  %v1470_v30 = vshll.u32 %v3796_v23, 16  ;;  %v1485_v31 = vor.u32 %v1484_v20, %v1480_v2  ;;  %v1475_v32 = vshll.u32 %v3797_v22, 16  ;;  %v608_v2 = vld [vmem:[#allocation2 + $0x6c] sm:$0x1]  ;;  %v356_v12 = vld [vmem:[%s3949_s18 + $0xb0] sm:$0xff] }
  0x49   : > { %v1647_v33 = vrot.slane %v3796_v23, 1  ;;  %v1648_v34 = vrot.slane %v3797_v22, 1  ;;  %v1154_v21 = vld [vmem:[#allocation2 + $0x54] sm:$0xf]  ;;  %v897_v36 = vor.u32 %v895_v63, %v894_v17  ;;  %v898_v8 = vrot.slane %v894_v17, 4  ;;  %v357_v15 = vld [vmem:[%s3949_s18 + $0xb8] sm:$0xff] }
  0x4a   : > { %v1472_v35 = vrot.slane %v1470_v30, 1  ;;  %v902_v38 = vrot.slane %v900_v18, 7  ;;  %v1490_v37 = vsel %vm1406_vm10, %v1485_v31, %v1489_v26  ;;  %v1477_v9 = vrot.slane %v1475_v32, 1  ;;  %v1158_v41 = vld [vmem:[#allocation2 + $0x5c] sm:$0x1] }
  0x4b   : > { %v1649_v43 = vsel %vm1631_vm9, %v1647_v33, %v1648_v34  ;;  %v903_v44 = vshll.u32 %v3445_v50, 16  ;;  %1611 = vrot.lane.b32.xlu1 %v1490_v37, %s3850_s20  ;;  %v1155_v45 = vsel %vm4002_vm8, %v897_v36, %v1154_v21  ;;  %v612_v52 = vsel %vm3915_vm3, 0, %v611_v24  ;;  %v664_v4 = vld [vmem:[#allocation2 + $0x74] sm:$0x1]  ;;  %v4214_v36 = vld [vmem:[%s3949_s18 + $0xa0] sm:$0xff] }
  0x4c   : > { %v1473_v47 = vor.u32 %v1472_v35, %v1468_v27  ;;  %v907_v48 = vrot.slane %v902_v38, 4  ;;  %1156 = vst [vmem:[#allocation2 + $0x54] sm:$0xf] %v1155_v45  ;;  %613 = vst [vmem:[#allocation2 + $0x78] sm:$0x1] %v612_v52  ;;  %v668_v46 = vsel %vm3928_vm5, 0, %v667_v39  ;;  %v3451_v58 = vpack.c.bf16 %v556_v16, %v556_v16 }
  0x4d   : > { %v3798_v55 = vld [vmem:[#allocation2 + $0x60] sm:$0xff]   ;;  %v905_v40 = vor.u32 %v903_v44, %v902_v38  ;;  %v943_v50 = vshrl.u32 %v4173_v25, 16  ;;  %669 = vst [vmem:[#allocation2 + $0x80] sm:$0x1] %v668_v46  ;;  %v946_v18 = vshll.u32 %v4173_v25, 16  ;;  %v553_v27 = vadd.f32 %v3942_v7, %v514_v57 }
  0x4e   : > { %v1478_v59 = vsel %vm1406_vm10, %v1473_v47, %v1477_v9  ;;  %v3799_v61 = vld [vmem:[#allocation2 + $0x68] ss:$0 sps:$4 sm:$0x11]   ;;  %v1159_v63 = vsel %vm3915_vm3, %v907_v48, %v1158_v41  ;;  %v1504_v10 = vshrl.u32 %v3798_v55, 16  ;;  %v1506_v56 = vshll.u32 %v3798_v55, 16 }
  0x4f   : > { %1609 = vrot.lane.b32.xlu0 %v1478_v59, %s3850_s20  ;;  %v906_v11 = vsel %vm3996_vm7, %v898_v8, %v905_v40  ;;  %1160 = vst [vmem:[#allocation2 + $0x5c] sm:$0x1] %v1159_v63  ;;  %v1656_v23 = vrot.slane %v3798_v55, 1  ;;  %1692 = vrot.lane.b32.xlu1 %v1652_v19, %s3849_s19  ;;  %v1511_v17 = vshll.u32 %v3799_v61, 16  ;;  %v1657_v20 = vrot.slane %v3799_v61, 1 }
  0x50   : > { %1157 = vst.msk [vmem:[#allocation2 + $0x58] sm:$0xf] %vm569_vm0, %v906_v11  ;;  %v945_v22 = vrot.slane %v943_v50, 7  ;;  %v951_v16 = vshrl.u32 %v3451_v58, 16  ;;  %v1508_v25 = vrot.slane %v1506_v56, 1  ;;  %v954_v26 = vshll.u32 %v3451_v58, 16 }
  0x51   : > { %v554_v30 = vadd.f32 %v3942_v7, %v515_v0  ;;  %v1513_v24 = vrot.slane %v1511_v17, 1  ;;  %v1658_v31 = vsel %vm1631_vm9, %v1656_v23, %v1657_v20  ;;  %v609_v21 = vsel %vm3915_vm3, 0, %v608_v2  ;;  %v617_v48 = vld [vmem:[#allocation2 + $0x90] sm:$0x1] }
  0x52   : > { %v948_v32 = vor.u32 %v946_v18, %v945_v22  ;;  %v949_v33 = vrot.slane %v945_v22, 4  ;;  %v1509_v19 = vor.u32 %v1508_v25, %v1504_v10  ;;  %v953_v34 = vrot.slane %v951_v16, 7  ;;  %610 = vst [vmem:[#allocation2 + $0x6c] sm:$0x1] %v609_v21  ;;  %v4240_v16 = vld [vmem:[%s3949_s18 + $0xa8] sm:$0xff] }
  0x53   : > { %1690 = vrot.lane.b32.xlu0 %v1649_v43, %s3849_s19  ;;  %v665_v35 = vsel %vm3928_vm5, 0, %v664_v4  ;;  %v1175_v57 = vld [vmem:[#allocation2 + $0x78] sm:$0xf]  ;;  %v3448_v8 = vpack.c.bf16 %v553_v27, %v553_v27  ;;  %v3449_v38 = vpack.c.bf16 %v554_v30, %v554_v30  ;;  %v520_v39 = vmul.f32 %v3922_v3, %v356_v12  ;;  %v614_v21 = vld [vmem:[#allocation2 + $0x84] sm:$0x1] }
  0x54   : > { %666 = vst [vmem:[#allocation2 + $0x74] sm:$0x1] %v665_v35  ;;  %v521_v37 = vmul.f32 %v3922_v3, %v357_v15  ;;  %v1514_v9 = vsel %vm1406_vm10, %v1509_v19, %v1513_v24  ;;  %v956_v43 = vor.u32 %v954_v26, %v953_v34  ;;  %v958_v44 = vrot.slane %v953_v34, 4  ;;  %v1179_v47 = vld [vmem:[#allocation2 + $0x80] sm:$0x1] }
  0x55   : > { %v1176_v41 = vsel %vm4002_vm8, %v948_v32, %v1175_v57  ;;  %1615 = vrot.lane.b32.xlu1 %v1514_v9, %s3850_s20  ;;  %v926_v52 = vshrl.u32 %v3448_v8, 16  ;;  %v559_v55 = vadd.f32 %v3942_v7, %v520_v39  ;;  %v518_v46 = vmul.f32 %v3922_v3, %v4214_v36  ;;  %v673_v12 = vld [vmem:[#allocation2 + $0x98] sm:$0x1]  ;;  %v670_v39 = vld [vmem:[#allocation2 + $0x8c] sm:$0x1] }
  0x56   : > { %v3801_v45 = vld [vmem:[#allocation2 + $0x5c] ss:$0 sps:$4 sm:$0x11]   ;;  %1177 = vst [vmem:[#allocation2 + $0x78] sm:$0xf] %v1176_v41  ;;  %v560_v40 = vadd.f32 %v3942_v7, %v521_v37  ;;  %v957_v50 = vsel %vm3996_vm7, %v949_v33, %v956_v43  ;;  %v1180_v59 = vsel %vm3915_vm3, %v958_v44, %v1179_v47  ;;  %v929_v61 = vshll.u32 %v3448_v8, 16 }
  0x57   : > { %v4226_v58 = vld [vmem:[#allocation2 + $0x54] sm:$0xff]   ;;  %v934_v63 = vshrl.u32 %v3449_v38, 16  ;;  %v1499_v18 = vshll.u32 %v3801_v45, 16  ;;  %v1654_v0 = vrot.slane %v3801_v45, 1  ;;  %1178 = vst.msk [vmem:[#allocation2 + $0x7c] sm:$0xf] %vm569_vm0, %v957_v50  ;;  %v3454_v19 = vpack.c.bf16 %v559_v55, %v559_v55 }
  0x58   : > { %1181 = vst [vmem:[#allocation2 + $0x80] sm:$0x1] %v1180_v59  ;;  %v928_v2 = vrot.slane %v926_v52, 7  ;;  %v937_v4 = vshll.u32 %v3449_v38, 16  ;;  %v1492_v10 = vshrl.u32 %v4226_v58, 16  ;;  %v1494_v56 = vshll.u32 %v4226_v58, 16 }
  0x59   : > { %v1653_v11 = vrot.slane %v4226_v58, 1  ;;  %v936_v23 = vrot.slane %v934_v63, 7  ;;  %v1501_v15 = vrot.slane %v1499_v18, 1  ;;  %1696 = vrot.lane.b32.xlu1 %v1658_v31, %s3849_s19  ;;  %v618_v22 = vsel %vm3915_vm3, 0, %v617_v48  ;;  %v1168_v24 = vld [vmem:[#allocation2 + $0x6c] sm:$0xf] }
  0x5a   : > { %v931_v17 = vor.u32 %v929_v61, %v928_v2  ;;  %v932_v20 = vrot.slane %v928_v2, 4  ;;  %v1496_v25 = vrot.slane %v1494_v56, 1  ;;  %619 = vst [vmem:[#allocation2 + $0x90] sm:$0x1] %v618_v22  ;;  %v674_v31 = vsel %vm3928_vm5, 0, %v673_v12  ;;  %v360_v37 = vld [vmem:[%s3949_s18 + $0xd0] sm:$0xff] }
  0x5b   : > { %v1655_v26 = vsel %vm1631_vm9, %v1653_v11, %v1654_v0  ;;  %v939_v27 = vor.u32 %v937_v4, %v936_v23  ;;  %v941_v30 = vrot.slane %v936_v23, 4  ;;  %v1172_v32 = vld [vmem:[#allocation2 + $0x74] sm:$0x1]  ;;  %v3455_v34 = vpack.c.bf16 %v560_v40, %v560_v40  ;;  %675 = vst [vmem:[#allocation2 + $0x98] sm:$0x1] %v674_v31 }
  0x5c   : > { %v1169_v33 = vsel %vm4002_vm8, %v931_v17, %v1168_v24  ;;  %v1497_v35 = vor.u32 %v1496_v25, %v1492_v10  ;;  %v519_v38 = vmul.f32 %v3922_v3, %v4240_v16  ;;  %v977_v9 = vshrl.u32 %v3454_v19, 16  ;;  %v4268_v61 = vld [vmem:[%s4975_s1] ss:$0 sm:$0xff] }
  0x5d   : > { %v940_v57 = vsel %vm3996_vm7, %v932_v20, %v939_v27  ;;  %1170 = vst [vmem:[#allocation2 + $0x6c] sm:$0xf] %v1169_v33  ;;  %v1173_v8 = vsel %vm3915_vm3, %v941_v30, %v1172_v32  ;;  %v980_v43 = vshll.u32 %v3454_v19, 16  ;;  %v985_v44 = vshrl.u32 %v3455_v34, 16  ;;  %v361_v20 = vld [vmem:[%s3949_s18 + $0xd8] sm:$0xff] }
  0x5e   : > { %1171 = vst.msk [vmem:[#allocation2 + $0x70] sm:$0xf] %vm569_vm0, %v940_v57  ;;  %1174 = vst [vmem:[#allocation2 + $0x74] sm:$0x1] %v1173_v8  ;;  %v988_v41 = vshll.u32 %v3455_v34, 16  ;;  %v1502_v47 = vsel %vm1406_vm10, %v1497_v35, %v1501_v15  ;;  %v4256_v48 = vld [vmem:[#allocation2 + $0x78] sm:$0xff]   ;;  %v557_v45 = vadd.f32 %v3942_v7, %v518_v46  ;;  %v558_v52 = vadd.f32 %v3942_v7, %v519_v38 }
  0x5f   : > { %v615_v3 = vsel %vm3915_vm3, 0, %v614_v21  ;;  %1613 = vrot.lane.b32.xlu0 %v1502_v47, %s3850_s20  ;;  %v3803_v55 = vld [vmem:[#allocation2 + $0x80] ss:$0 sps:$4 sm:$0x11]   ;;  %v979_v40 = vrot.slane %v977_v9, 7  ;;  %v987_v50 = vrot.slane %v985_v44, 7  ;;  %v524_v7 = vmul.f32 %v4268_v61, %v360_v37 }
  0x60   : > { %616 = vst [vmem:[#allocation2 + $0x84] sm:$0x1] %v615_v3  ;;  %v671_v59 = vsel %vm3928_vm5, 0, %v670_v39  ;;  %v1528_v46 = vshrl.u32 %v4256_v48, 16  ;;  %v1530_v63 = vshll.u32 %v4256_v48, 16  ;;  %v1662_v18 = vrot.slane %v4256_v48, 1 }
  0x61   : > { %672 = vst [vmem:[#allocation2 + $0x8c] sm:$0x1] %v671_v59  ;;  %v3452_v0 = vpack.c.bf16 %v557_v45, %v557_v45  ;;  %v1535_v2 = vshll.u32 %v3803_v55, 16  ;;  %v1663_v4 = vrot.slane %v3803_v55, 1  ;;  %v982_v10 = vor.u32 %v980_v43, %v979_v40  ;;  %v1189_v11 = vld [vmem:[#allocation2 + $0x90] sm:$0xf] }
  0x62   : > { %v983_v56 = vrot.slane %v979_v40, 4  ;;  %v1532_v23 = vrot.slane %v1530_v63, 1  ;;  %v990_v12 = vor.u32 %v988_v41, %v987_v50  ;;  %v992_v15 = vrot.slane %v987_v50, 4  ;;  %v1193_v30 = vld [vmem:[#allocation2 + $0x98] sm:$0x1]  ;;  %v4300_v63 = vld [vmem:[%s3949_s18 + $0xc0] sm:$0xff] }
  0x63   : > { %v3453_v17 = vpack.c.bf16 %v558_v52, %v558_v52  ;;  %1694 = vrot.lane.b32.xlu0 %v1655_v26, %s3849_s19  ;;  %v1537_v22 = vrot.slane %v1535_v2, 1  ;;  %v1664_v25 = vsel %vm1631_vm9, %v1662_v18, %v1663_v4  ;;  %v1190_v27 = vsel %vm4002_vm8, %v982_v10, %v1189_v11  ;;  %v623_v26 = vld [vmem:[#allocation2 + $0xa8] sm:$0x1]  ;;  %v679_v3 = vld [vmem:[#allocation2 + $0xb0] sm:$0x1] }
  0x64   : > { %v960_v24 = vshrl.u32 %v3452_v0, 16  ;;  %v1533_v32 = vor.u32 %v1532_v23, %v1528_v46  ;;  %v991_v31 = vsel %vm3996_vm7, %v983_v56, %v990_v12  ;;  %1191 = vst [vmem:[#allocation2 + $0x90] sm:$0xf] %v1190_v27  ;;  %v1194_v19 = vsel %vm3915_vm3, %v992_v15, %v1193_v30  ;;  %v4295_v50 = vld [vmem:[%s4976_s2] ss:$0 sm:$0xff]  ;;  %v4303_v18 = vld [vmem:[%s3949_s18 + $0xc8] sm:$0xff] }
  0x65   : > { %v4279_v33 = vld [vmem:[#allocation2 + $0x6c] sm:$0xff]   ;;  %v963_v34 = vshll.u32 %v3452_v0, 16  ;;  %v3805_v21 = vld [vmem:[#allocation2 + $0x74] ss:$0 sps:$4 sm:$0x11]   ;;  %v968_v57 = vshrl.u32 %v3453_v17, 16  ;;  %v525_v38 = vmul.f32 %v4268_v61, %v361_v20  ;;  %v563_v59 = vadd.f32 %v4295_v50, %v524_v7 }
  0x66   : > { %1192 = vst.msk [vmem:[#allocation2 + $0x94] sm:$0xf] %vm569_vm0, %v991_v31  ;;  %1195 = vst [vmem:[#allocation2 + $0x98] sm:$0x1] %v1194_v19  ;;  %v962_v35 = vrot.slane %v960_v24, 7  ;;  %v971_v8 = vshll.u32 %v3453_v17, 16  ;;  %v1538_v39 = vsel %vm1406_vm10, %v1533_v32, %v1537_v22  ;;  %v522_v22 = vmul.f32 %v4268_v61, %v4300_v63 }
  0x67   : > { %v1516_v37 = vshrl.u32 %v4279_v33, 16  ;;  %v1518_v9 = vshll.u32 %v4279_v33, 16  ;;  %v1659_v43 = vrot.slane %v4279_v33, 1  ;;  %v1182_v44 = vld [vmem:[#allocation2 + $0x84] sm:$0xf]  ;;  %1619 = vrot.lane.b32.xlu1 %v1538_v39, %s3850_s20  ;;  %v1523_v41 = vshll.u32 %v3805_v21, 16 }
  0x68   : > { %v1660_v47 = vrot.slane %v3805_v21, 1  ;;  %v965_v45 = vor.u32 %v963_v34, %v962_v35  ;;  %v966_v52 = vrot.slane %v962_v35, 4  ;;  %v970_v40 = vrot.slane %v968_v57, 7  ;;  %v1186_v10 = vld [vmem:[#allocation2 + $0x8c] sm:$0x1] }
  0x69   : > { %v1520_v55 = vrot.slane %v1518_v9, 1  ;;  %v564_v46 = vadd.f32 %v4295_v50, %v525_v38  ;;  %v1525_v0 = vrot.slane %v1523_v41, 1  ;;  %v624_v56 = vsel %vm3915_vm3, 0, %v623_v26  ;;  %v620_v11 = vld [vmem:[#allocation2 + $0x9c] sm:$0x1] }
  0x6a   : > { %v1661_v2 = vsel %vm1631_vm9, %v1659_v43, %v1660_v47  ;;  %v1183_v4 = vsel %vm4002_vm8, %v965_v45, %v1182_v44  ;;  %v973_v12 = vor.u32 %v971_v8, %v970_v40  ;;  %v975_v7 = vrot.slane %v970_v40, 4  ;;  %625 = vst [vmem:[#allocation2 + $0xa8] sm:$0x1] %v624_v56  ;;  %v676_v30 = vld [vmem:[#allocation2 + $0xa4] sm:$0x1] }
  0x6b   : > { %v1521_v23 = vor.u32 %v1520_v55, %v1516_v37  ;;  %1184 = vst [vmem:[#allocation2 + $0x84] sm:$0xf] %v1183_v4  ;;  %v680_v15 = vsel %vm3928_vm5, 0, %v679_v3  ;;  %1700 = vrot.lane.b32.xlu1 %v1664_v25, %s3849_s19  ;;  %v3458_v17 = vpack.c.bf16 %v563_v59, %v563_v59  ;;  %v3459_v20 = vpack.c.bf16 %v564_v46, %v564_v46  ;;  %v4336_v55 = vld [vmem:[%s3949_s18 + $0xe0] sm:$0xff] }
  0x6c   : > { %681 = vst [vmem:[#allocation2 + $0xb0] sm:$0x1] %v680_v15  ;;  %v523_v27 = vmul.f32 %v4268_v61, %v4303_v18  ;;  %v974_v31 = vsel %vm3996_vm7, %v966_v52, %v973_v12  ;;  %v1187_v25 = vsel %vm3915_vm3, %v975_v7, %v1186_v10  ;;  %v621_v19 = vsel %vm3915_vm3, 0, %v620_v11  ;;  %v4341_v7 = vld [vmem:[%s3949_s18 + $0xe8] sm:$0xff] }
  0x6d   : > { %v1526_v24 = vsel %vm1406_vm10, %v1521_v23, %v1525_v0  ;;  %v4318_v32 = vld [vmem:[#allocation2 + $0x90] sm:$0xff]   ;;  %v3807_v34 = vld [vmem:[#allocation2 + $0x98] ss:$0 sps:$4 sm:$0x11]   ;;  %1185 = vst.msk [vmem:[#allocation2 + $0x88] sm:$0xf] %vm569_vm0, %v974_v31  ;;  %v561_v57 = vadd.f32 %v4295_v50, %v522_v22 }
  0x6e   : > { %1617 = vrot.lane.b32.xlu0 %v1526_v24, %s3850_s20  ;;  %1188 = vst [vmem:[#allocation2 + $0x8c] sm:$0x1] %v1187_v25  ;;  %v1011_v26 = vshrl.u32 %v3458_v17, 16  ;;  %v1014_v21 = vshll.u32 %v3458_v17, 16  ;;  %v1019_v35 = vshrl.u32 %v3459_v20, 16  ;;  %v1552_v8 = vshrl.u32 %v4318_v32, 16 }
  0x6f   : > { %622 = vst [vmem:[#allocation2 + $0x9c] sm:$0x1] %v621_v19  ;;  %v1554_v38 = vshll.u32 %v4318_v32, 16  ;;  %v1668_v39 = vrot.slane %v4318_v32, 1  ;;  %v1022_v37 = vshll.u32 %v3459_v20, 16  ;;  %v1559_v9 = vshll.u32 %v3807_v34, 16 }
  0x70   : > { %v1669_v43 = vrot.slane %v3807_v34, 1  ;;  %v1013_v44 = vrot.slane %v1011_v26, 7  ;;  %v1021_v41 = vrot.slane %v1019_v35, 7  ;;  %v562_v45 = vadd.f32 %v4295_v50, %v523_v27  ;;  %v626_v25 = vld [vmem:[#allocation2 + $0xb4] sm:$0x1] }
  0x71   : > { %v1556_v47 = vrot.slane %v1554_v38, 1  ;;  %v677_v52 = vsel %vm3928_vm5, 0, %v676_v30  ;;  %v3456_v3 = vpack.c.bf16 %v561_v57, %v561_v57  ;;  %v1561_v40 = vrot.slane %v1559_v9, 1  ;;  %v1203_v4 = vld [vmem:[#allocation2 + $0xa8] sm:$0xf] }
  0x72   : > { %1698 = vrot.lane.b32.xlu0 %v1661_v2, %s3849_s19  ;;  %v1670_v59 = vsel %vm1631_vm9, %v1668_v39, %v1669_v43  ;;  %v1016_v46 = vor.u32 %v1014_v21, %v1013_v44  ;;  %v1017_v0 = vrot.slane %v1013_v44, 4  ;;  %678 = vst [vmem:[#allocation2 + $0xa4] sm:$0x1] %v677_v52  ;;  %v1024_v56 = vor.u32 %v1022_v37, %v1021_v41 }
  0x73   : > { %v1557_v10 = vor.u32 %v1556_v47, %v1552_v8  ;;  %v1026_v11 = vrot.slane %v1021_v41, 4  ;;  %v1207_v23 = vld [vmem:[#allocation2 + $0xb0] sm:$0x1]  ;;  %v3457_v12 = vpack.c.bf16 %v562_v45, %v562_v45  ;;  %v994_v17 = vshrl.u32 %v3456_v3, 16  ;;  %v682_v47 = vld [vmem:[#allocation2 + $0xbc] sm:$0x1] }
  0x74   : > { %v1204_v15 = vsel %vm4002_vm8, %v1016_v46, %v1203_v4  ;;  %v997_v20 = vshll.u32 %v3456_v3, 16  ;;  %v526_v2 = vmul.f32 %v4268_v61, %v4336_v55  ;;  %v4348_v27 = vld [vmem:[#allocation2 + $0x84] sm:$0xff]   ;;  %v1025_v30 = vsel %vm3996_vm7, %v1017_v0, %v1024_v56  ;;  %v364_v0 = vld [vmem:[%s3949_s18 + $0xf0] sm:$0xff] }
  0x75   : > { %v1562_v22 = vsel %vm1406_vm10, %v1557_v10, %v1561_v40  ;;  %1205 = vst [vmem:[#allocation2 + $0xa8] sm:$0xf] %v1204_v15  ;;  %v1208_v24 = vsel %vm3915_vm3, %v1026_v11, %v1207_v23  ;;  %v1002_v31 = vshrl.u32 %v3457_v12, 16  ;;  %v3809_v19 = vld [vmem:[#allocation2 + $0x8c] ss:$0 sps:$4 sm:$0x11]   ;;  %v527_v21 = vmul.f32 %v4268_v61, %v4341_v7 }
  0x76   : > { %1623 = vrot.lane.b32.xlu1 %v1562_v22, %s3850_s20  ;;  %1206 = vst.msk [vmem:[#allocation2 + $0xac] sm:$0xf] %vm569_vm0, %v1025_v30  ;;  %1209 = vst [vmem:[#allocation2 + $0xb0] sm:$0x1] %v1208_v24  ;;  %v996_v34 = vrot.slane %v994_v17, 7  ;;  %v1005_v26 = vshll.u32 %v3457_v12, 16  ;;  %v565_v35 = vadd.f32 %v4295_v50, %v526_v2  ;;  %v528_v22 = vmul.f32 %v4268_v61, %v364_v0 }
  0x77   : > { %v1540_v57 = vshrl.u32 %v4348_v27, 16  ;;  %v1542_v8 = vshll.u32 %v4348_v27, 16  ;;  %v1665_v38 = vrot.slane %v4348_v27, 1  ;;  %v1004_v39 = vrot.slane %v1002_v31, 7  ;;  %v1196_v37 = vld [vmem:[#allocation2 + $0x9c] sm:$0xf] }
  0x78   : > { %v1547_v9 = vshll.u32 %v3809_v19, 16  ;;  %v1666_v43 = vrot.slane %v3809_v19, 1  ;;  %v999_v44 = vor.u32 %v997_v20, %v996_v34  ;;  %v1000_v41 = vrot.slane %v996_v34, 4  ;;  %v365_v11 = vld [vmem:[%s3949_s18 + $0xf8] sm:$0xff]  ;;  %v629_v23 = vld [vmem:[#allocation2 + $0xc0] sm:$0x1] }
  0x79   : > { %v1544_v45 = vrot.slane %v1542_v8, 1  ;;  %v1007_v52 = vor.u32 %v1005_v26, %v1004_v39  ;;  %v1009_v3 = vrot.slane %v1004_v39, 4  ;;  %v1200_v40 = vld [vmem:[#allocation2 + $0xa4] sm:$0x1]  ;;  %v566_v46 = vadd.f32 %v4295_v50, %v527_v21  ;;  %v685_v30 = vld [vmem:[#allocation2 + $0xc8] sm:$0x1] }
  0x7a   : > { %v1549_v4 = vrot.slane %v1547_v9, 1  ;;  %1704 = vrot.lane.b32.xlu1 %v1670_v59, %s3849_s19  ;;  %v1197_v10 = vsel %vm4002_vm8, %v999_v44, %v1196_v37  ;;  %v627_v56 = vsel %vm3915_vm3, 0, %v626_v25  ;;  %v683_v59 = vsel %vm3928_vm5, 0, %v682_v47  ;;  %s3852_s18 = smov 16  }
  0x7b   : > { %v1545_v12 = vor.u32 %v1544_v45, %v1540_v57  ;;  %v1008_v15 = vsel %vm3996_vm7, %v1000_v41, %v1007_v52  ;;  %1198 = vst [vmem:[#allocation2 + $0x9c] sm:$0xf] %v1197_v10  ;;  %v1201_v17 = vsel %vm3915_vm3, %v1009_v3, %v1200_v40  ;;  %628 = vst [vmem:[#allocation2 + $0xb4] sm:$0x1] %v627_v56  ;;  %v630_v34 = vsel %vm3915_vm3, 0, %v629_v23 }
  0x7c   : > { %1199 = vst.msk [vmem:[#allocation2 + $0xa0] sm:$0xf] %vm569_vm0, %v1008_v15  ;;  %1202 = vst [vmem:[#allocation2 + $0xa4] sm:$0x1] %v1201_v17  ;;  %v3460_v20 = vpack.c.bf16 %v565_v35, %v565_v35  ;;  %v3461_v2 = vpack.c.bf16 %v566_v46, %v566_v46  ;;  %v1667_v31 = vsel %vm1631_vm9, %v1665_v38, %v1666_v43  ;;  %v686_v52 = vsel %vm3928_vm5, 0, %v685_v30 }
  0x7d   : > { %684 = vst [vmem:[#allocation2 + $0xbc] sm:$0x1] %v683_v59  ;;  %v1550_v24 = vsel %vm1406_vm10, %v1545_v12, %v1549_v4  ;;  %v4380_v25 = vld [vmem:[#allocation2 + $0xa8] sm:$0xff]   ;;  %v529_v19 = vmul.f32 %v4268_v61, %v365_v11  ;;  %v3811_v26 = vld [vmem:[#allocation2 + $0xb0] ss:$0 sps:$4 sm:$0x11]   ;;  %v567_v8 = vadd.f32 %v4295_v50, %v528_v22 }
  0x7e   : > { %1621 = vrot.lane.b32.xlu0 %v1550_v24, %s3850_s20  ;;  %v1028_v21 = vshrl.u32 %v3460_v20, 16  ;;  %v1031_v35 = vshll.u32 %v3460_v20, 16  ;;  %v1036_v57 = vshrl.u32 %v3461_v2, 16  ;;  %631 = vst [vmem:[#allocation2 + $0xc0] sm:$0x1] %v630_v34  ;;  %v1576_v39 = vshrl.u32 %v4380_v25, 16 }
  0x7f   : > { %v1578_v38 = vshll.u32 %v4380_v25, 16  ;;  %v1674_v37 = vrot.slane %v4380_v25, 1  ;;  %v1039_v9 = vshll.u32 %v3461_v2, 16  ;;  %v1583_v61 = vshll.u32 %v3811_v26, 16  ;;  %687 = vst [vmem:[#allocation2 + $0xc8] sm:$0x1] %v686_v52 }
  0x80   : > { %v1675_v43 = vrot.slane %v3811_v26, 1  ;;  %v1030_v44 = vrot.slane %v1028_v21, 7  ;;  %v1038_v41 = vrot.slane %v1036_v57, 7  ;;  %v568_v45 = vadd.f32 %v4295_v50, %v529_v19  ;;  %v581_v24 = vld [vmem:[#allocation2] sm:$0x1] }
  0x81   : > { %v1580_v47 = vrot.slane %v1578_v38, 1  ;;  %v3462_v3 = vpack.c.bf16 %v567_v8, %v567_v8  ;;  %v1585_v40 = vrot.slane %v1583_v61, 1  ;;  %v637_v21 = vld [vmem:[#allocation2 + $0x8] sm:$0x1]  ;;  %vm366_vm11 = vcmask 31744  }
  0x82   : > { %1702 = vrot.lane.b32.xlu0 %v1667_v31, %s3849_s19  ;;  %v1033_v46 = vor.u32 %v1031_v35, %v1030_v44  ;;  %v1034_v0 = vrot.slane %v1030_v44, 4  ;;  %v1210_v4 = vld [vmem:[#allocation2 + $0xb4] sm:$0xf]  ;;  %v1041_v11 = vor.u32 %v1039_v9, %v1038_v41  ;;  %v1043_v23 = vrot.slane %v1038_v41, 4  ;;  %v3820_v38 = vld [vmem:[%s4977_s3 + $0x8] sm:$0x3f]  }
  0x83   : > { %v1581_v10 = vor.u32 %v1580_v47, %v1576_v39  ;;  %v4394_v56 = vld [vmem:[#allocation2 + $0x9c] sm:$0xff]   ;;  %v3463_v12 = vpack.c.bf16 %v568_v45, %v568_v45  ;;  %v4396_v15 = vld [vmem:[#allocation2 + $0xa4] ss:$0 sps:$4 sm:$0x11]   ;;  %v1045_v59 = vshrl.u32 %v3462_v3, 16  ;;  %v1676_v30 = vsel %vm1631_vm9, %v1674_v37, %v1675_v43  ;;  %367 = vst.msk [vmem:[#allocation4] sm:$0xff] %vm366_vm11, %v3954_v13 }
  0x84   : > { %v1211_v50 = vsel %vm4002_vm8, %v1033_v46, %v1210_v4  ;;  %v1214_v17 = vld [vmem:[#allocation2 + $0xbc] sm:$0x1]  ;;  %v1564_v2 = vshrl.u32 %v4394_v56, 16  ;;  %v1566_v22 = vshll.u32 %v4394_v56, 16  ;;  %v1571_v31 = vshll.u32 %v4396_v15, 16  ;;  %368 = vst.msk [vmem:[#allocation4 + $0x8] sm:$0xff] %vm366_vm11, %v3957_v14 }
  0x85   : > { %v1586_v20 = vsel %vm1406_vm10, %v1581_v10, %v1585_v40  ;;  %1212 = vst [vmem:[#allocation2 + $0xb4] sm:$0xf] %v1211_v50  ;;  %v1671_v19 = vrot.slane %v4394_v56, 1  ;;  %v1042_v34 = vsel %vm3996_vm7, %v1034_v0, %v1041_v11  ;;  %v1215_v26 = vsel %vm3915_vm3, %v1043_v23, %v1214_v17  ;;  %v1217_v43 = vld [vmem:[#allocation2 + $0xc0] sm:$0xf]  ;;  %369 = vst.msk [vmem:[#allocation4 + $0x10] sm:$0xff] %vm366_vm11, %v3976_v28 }
  0x86   : > { %1627 = vrot.lane.b32.xlu1 %v1586_v20, %s3850_s20  ;;  %v1568_v35 = vrot.slane %v1566_v22, 1  ;;  %1213 = vst.msk [vmem:[#allocation2 + $0xb8] sm:$0xf] %vm569_vm0, %v1042_v34  ;;  %1216 = vst [vmem:[#allocation2 + $0xbc] sm:$0x1] %v1215_v26  ;;  %v1047_v57 = vrot.slane %v1045_v59, 7 }
  0x87   : > { %v1048_v8 = vshll.u32 %v3462_v3, 16  ;;  %v1053_v39 = vshrl.u32 %v3463_v12, 16  ;;  %v1573_v37 = vrot.slane %v1571_v31, 1  ;;  %v1672_v9 = vrot.slane %v4396_v15, 1  ;;  %v4421_v41 = vld [vmem:[%s4977_s3 + $0x10] sm:$0x3f]  }
  0x88   : > { %v1056_v61 = vshll.u32 %v3463_v12, 16  ;;  %v582_v44 = vsel %vm3915_vm3, 0, %v581_v24  ;;  %v1569_v47 = vor.u32 %v1568_v35, %v1564_v2  ;;  %v1051_v52 = vrot.slane %v1047_v57, 4  ;;  %v632_v40 = vld [vmem:[#allocation2 + $0xcc] sm:$0x1]  ;;  %370 = vst.msk [vmem:[#allocation4 + $0x18] sm:$0xff] %vm366_vm11, %v3979_v29 }
  0x89   : > { %v1050_v45 = vor.u32 %v1048_v8, %v1047_v57  ;;  %v1055_v3 = vrot.slane %v1053_v39, 7  ;;  %583 = vst [vmem:[#allocation2] sm:$0x1] %v582_v44  ;;  %v688_v46 = vld [vmem:[#allocation2 + $0xd4] sm:$0x1]  ;;  %v638_v4 = vsel %vm3928_vm5, 0, %v637_v21  ;;  %v1673_v14 = vsel %vm1631_vm9, %v1671_v19, %v1672_v9 }
  0x8a   : > { %1708 = vrot.lane.b32.xlu1 %v1676_v30, %s3849_s19  ;;  %v1221_v0 = vld [vmem:[#allocation2 + $0xc8] sm:$0x1]  ;;  %vm1851_vm12 = vcmask 1045504   ;;  %v1574_v10 = vsel %vm1406_vm10, %v1569_v47, %v1573_v37  ;;  %639 = vst [vmem:[#allocation2 + $0x8] sm:$0x1] %v638_v4  ;;  %371 = vst.msk [vmem:[#allocation4 + $0x20] sm:$0xff] %vm366_vm11, %v4034_v49 }
  0x8b   : > { %v1058_v11 = vor.u32 %v1056_v61, %v1055_v3  ;;  %v1060_v23 = vrot.slane %v1055_v3, 4  ;;  %v1218_v12 = vsel %vm4002_vm8, %v1050_v45, %v1217_v43  ;;  %372 = vst.msk [vmem:[#allocation4 + $0x28] sm:$0xff] %vm366_vm11, %v4041_v53  ;;  %373 = vst.msk [vmem:[#allocation4 + $0x30] sm:$0xff] %vm366_vm11, %v4051_v62  ;;  %3687 = vmatprep.subr.msk.bf16.mxu1 %vm1851_vm12, %v3820_v38  ;;  %v402_v13 = vld [vmem:[%s4981_s7] sm:$0x3]  ;;  %1625 = vrot.lane.b32.xlu0 %v1574_v10, %s3850_s20  ;;  %vm422_vm13 = vcmask 1041408  }
  0x8c   : > { %374 = vst.msk [vmem:[#allocation4 + $0x38] sm:$0xff] %vm366_vm11, %v4062_v6  ;;  %375 = vst.msk [vmem:[#allocation4 + $0x40] sm:$0xff] %vm366_vm11, %v4160_v51  ;;  %v1853_v28 = vsel %vm1851_vm12, %v3820_v38, 0  ;;  %v633_v29 = vsel %vm3915_vm3, 0, %v632_v40  ;;  %v689_v62 = vsel %vm3928_vm5, 0, %v688_v46  ;;  %3686 = vmatprep.subr.msk.bf16.mxu0 %vm422_vm13, %v402_v13  ;;  %v424_v54 = vsel %vm422_vm13, %v402_v13, 0 }
  0x8d   : > { %376 = vst.msk [vmem:[#allocation4 + $0x48] sm:$0xff] %vm366_vm11, %v4180_v42  ;;  %377 = vst.msk [vmem:[#allocation4 + $0x50] sm:$0xff] %vm366_vm11, %v4214_v36  ;;  %v1059_v49 = vsel %vm3996_vm7, %v1051_v52, %v1058_v11  ;;  %v1222_v53 = vsel %vm3915_vm3, %v1060_v23, %v1221_v0  ;;  %3549 = vmatpush3.bf16.msra.mxu1 %v1853_v28  ;;  %v4479_v6 = vld [vmem:[#allocation2 + $0xb4] sm:$0xff]   ;;  %v3815_v51 = vld [vmem:[#allocation2 + $0xbc] ss:$0 sps:$4 sm:$0x11]   ;;  %3539 = vmatpush3.bf16.msra.mxu0 %v424_v54 }
  0x8e   : > { %378 = vst.msk [vmem:[#allocation4 + $0x58] sm:$0xff] %vm366_vm11, %v4240_v16  ;;  %379 = vst.msk [vmem:[#allocation4 + $0x60] sm:$0xff] %vm366_vm11, %v4300_v63  ;;  %3689 = vmatprep.subr.msk.bf16.mxu1 %vm1851_vm12, %v4421_v41  ;;  %v1588_v1 = vshrl.u32 %v4479_v6, 16  ;;  %v1590_v5 = vshll.u32 %v4479_v6, 16  ;;  %v1677_v42 = vrot.slane %v4479_v6, 1  ;;  %3688 = vmatprep.subr.msk.bf16.mxu0 %vm1851_vm12, %v3824_v60  ;;  %v1595_v16 = vshll.u32 %v3815_v51, 16 }
  0x8f   : > { %380 = vst.msk [vmem:[#allocation4 + $0x68] sm:$0xff] %vm366_vm11, %v4303_v18  ;;  %381 = vst.msk [vmem:[#allocation4 + $0x70] sm:$0xff] %vm366_vm11, %v4336_v55  ;;  %1706 = vrot.lane.b32.xlu0 %v1673_v14, %s3849_s19  ;;  %v1678_v63 = vrot.slane %v3815_v51, 1  ;;  %v383_v37 = vld [vmem:[#allocation4] ss:$2 sm:$0xff]  ;;  %v2024_v44 = vsel %vm1851_vm12, %v3824_v60, 0 }
  0x90   : > { %382 = vst.msk [vmem:[#allocation4 + $0x78] sm:$0xff] %vm366_vm11, %v4341_v7  ;;  %1219 = vst [vmem:[#allocation2 + $0xc0] sm:$0xf] %v1218_v12  ;;  %v4488_v36 = vld [vmem:[#allocation2] sm:$0xff]   ;;  %v1592_v18 = vrot.slane %v1590_v5, 1  ;;  %v1597_v7 = vrot.slane %v1595_v16, 1 }
  0x91   : > { %634 = vst [vmem:[#allocation2 + $0xcc] sm:$0x1] %v633_v29  ;;  %1220 = vst.msk [vmem:[#allocation2 + $0xc4] sm:$0xf] %vm569_vm0, %v1059_v49  ;;  %v1679_v15 = vsel %vm1631_vm9, %v1677_v42, %v1678_v63  ;;  %v1410_v50 = vshll.u32 %v4488_v36, 16  ;;  %v1408_v59 = vshrl.u32 %v4488_v36, 16 }
  0x92   : > { %1223 = vst [vmem:[#allocation2 + $0xc8] sm:$0x1] %v1222_v53  ;;  %690 = vst [vmem:[#allocation2 + $0xd4] sm:$0x1] %v689_v62  ;;  %v1593_v17 = vor.u32 %v1592_v18, %v1588_v1  ;;  %1710 = vrot.lane.b32.xlu1 %v1679_v15, %s3849_s19  ;;  %v1632_v30 = vrot.slane %v4488_v36, 1  ;;  %vm1744_vm14 = vcmask 64512  }
  0x93   : > { %v3819_v55 = vld [vmem:[#allocation2 + $0x8] ss:$0 sps:$4 sm:$0x11]   ;;  %v1412_v19 = vrot.slane %v1410_v50, 1  ;;  %v385_v43 = vld [vmem:[#allocation4 + $0x10] ss:$2 sm:$0xff] }
  0x94   : > { %v1415_v20 = vshll.u32 %v3819_v55, 16  ;;  %v1598_v24 = vsel %vm1406_vm10, %v1593_v17, %v1597_v7  ;;  %v1633_v39 = vrot.slane %v3819_v55, 1  ;;  %v387_v40 = vld [vmem:[#allocation4 + $0x20] ss:$2 sm:$0xff]  ;;  %v398_v10 = vpack.c.bf16 %v385_v43, %v383_v37  ;;  %v389_v11 = vld [vmem:[#allocation4 + $0x30] ss:$2 sm:$0xff] }
  0x95   : > { %1629 = vrot.lane.b32.xlu0 %v1598_v24, %s3850_s20  ;;  %v1413_v52 = vor.u32 %v1412_v19, %v1408_v59  ;;  %v391_v23 = vld [vmem:[#allocation4 + $0x40] ss:$2 sm:$0xff]  ;;  %v399_v28 = vpack.c.bf16 %v389_v11, %v387_v40  ;;  %v393_v29 = vld [vmem:[#allocation4 + $0x50] ss:$2 sm:$0xff]  ;;  %vm1818_vm15 = vcmask 97280   ;;  %vm2529_vm0 = vcmask 58368  }
  0x96   : > { %v1417_v61 = vrot.slane %v1415_v20, 1  ;;  %v1634_v12 = vsel %vm1631_vm9, %v1632_v30, %v1633_v39  ;;  %3540 = vmatprep.mubr.msk.bf16.mxu0 %vm366_vm11, %v398_v10  ;;  %v400_v49 = vpack.c.bf16 %v393_v29, %v391_v23  ;;  %v395_v51 = vld [vmem:[#allocation4 + $0x60] ss:$2 sm:$0xff]  ;;  %v3834_v59 = vld [vmem:[#allocation2 + $0x18] sm:$0xff]   ;;  %v2229_v30 = vsel %vm1851_vm12, %v4421_v41, 0 }
  0x97   : > { %3541 = vmatmul.mubr.msk.bf16.vlgmr.msra.gmra.mxu0 %vm366_vm11, %v399_v28  ;;  %v397_v1 = vld [vmem:[#allocation4 + $0x70] ss:$2 sm:$0xff]  ;;  %v3833_v55 = vld [vmem:[#allocation2 + $0xc] sm:$0xff]   ;;  %vm2535_vm1 = vcmask 57344   ;;  %vm2904_vm2 = vcmask 1043456  }
  0x98   : > { %v4495_v2 = vld [vmem:[#allocation2 + $0xcc] sm:$0xff]   ;;  %v4497_v22 = vld [vmem:[#allocation2 + $0xc0] sm:$0xff]   ;;  %v1418_v53 = vsel %vm1406_vm10, %v1413_v52, %v1417_v61  ;;  %3583 = vmatpush3.bf16.msra.mxu0 %v2024_v44  ;;  %3544 = vmatprep.mubr.msk.bf16.mxu0 %vm366_vm11, %v400_v49  ;;  %v401_v42 = vpack.c.bf16 %v397_v1, %v395_v51 }
  0x99   : > { %v3817_v31 = vld [vmem:[#allocation2 + $0xc8] ss:$0 sps:$4 sm:$0x11]   ;;  %v1788_v34 = vshrl.u32 %v4497_v22, 16  ;;  %v1790_v26 = vshll.u32 %v4497_v22, 16  ;;  %v1801_v21 = vrot.slane %v4497_v22, 1 }
  0x9a   : > { %v3823_v35 = vld [vmem:[#allocation2 + $0xd4] ss:$0 sps:$4 sm:$0x11]   ;;  %v1795_v57 = vshll.u32 %v3817_v31, 16  ;;  %v1802_v8 = vrot.slane %v3817_v31, 1  ;;  %v2198_v38 = vshll.u32 %v4495_v2, 16 }
  0x9b   : > { %v1792_v9 = vrot.slane %v1790_v26, 1  ;;  %v2196_v3 = vshrl.u32 %v4495_v2, 16  ;;  %v2203_v4 = vshll.u32 %v3823_v35, 16  ;;  %v2209_v13 = vrot.slane %v4495_v2, 1  ;;  %v3835_v26 = vld [vmem:[#allocation2 + $0x30] sm:$0xff]   ;;  %v3838_v44 = vld [vmem:[#allocation2 + $0x3c] sm:$0xff]  }
  0x9c   : > { %v1797_v47 = vrot.slane %v1795_v57, 1  ;;  %v1803_v45 = vsel %vm1631_vm9, %v1801_v21, %v1802_v8  ;;  %v2200_v0 = vrot.slane %v2198_v38, 1  ;;  %v2210_v14 = vrot.slane %v3823_v35, 1  ;;  %v3836_v35 = vld [vmem:[#allocation2 + $0x24] sm:$0xff]  }
  0x9d   : > { %v1793_v46 = vor.u32 %v1792_v9, %v1788_v34  ;;  %1804 = vrot.lane.b32.xlu1 %v1803_v45, %s3849_s19  ;;  %v2205_v54 = vrot.slane %v2203_v4, 1  ;;  %v3837_v9 = vld [vmem:[#allocation2 + $0x48] sm:$0xff]  }
  0x9e   : > { %v2201_v62 = vor.u32 %v2200_v0, %v2196_v3  ;;  %v2211_v5 = vsel %vm1631_vm9, %v2209_v13, %v2210_v14  ;;  %v3839_v0 = vld [vmem:[#allocation2 + $0x60] sm:$0xff]  }
  0x9f   : > { %v1798_v60 = vsel %vm1406_vm10, %v1793_v46, %v1797_v47  ;;  %v1683_v16 = vpop.permute.xlu1 %1682  ;;  %3545 = vmatmul.mubr.msk.bf16.gmra.mxu0 %vm366_vm11, %v401_v42 }
  0xa0   : > { %1799 = vrot.lane.b32.xlu0 %v1798_v60, %s3850_s20  ;;  %v2206_v63 = vsel %vm1406_vm10, %v2201_v62, %v2205_v54 }
  0xa1   : > { %1680 = vrot.lane.b32.xlu1 %v1634_v12, %s3849_s19 }
  0xa3   : > { %v1685_v17 = vpop.permute.xlu1 %1684 }
  0xa4   : > { %1599 = vrot.lane.b32.xlu0 %v1418_v53, %s3850_s20  ;;  %v1602_v18 = vpop.permute.xlu0 %1601 }
  0xa5   : > { %2212 = vrot.lane.b32.xlu1 %v2211_v5, %s3849_s19  ;;  %v1715_v7 = vsel %vm366_vm11, %v3833_v55, %v1602_v18 }
  0xa6   : > { %v4525_v15 = vsel %vm1744_vm14, %v1715_v7, %v1683_v16 }
  0xa7   : > { %3550 = vmatprep.mubr.msk.bf16.mxu1 %vm1818_vm15, %v4525_v15 }
  0xa8   : > { %2207 = vrot.lane.b32.xlu0 %v2206_v63, %s3850_s20  ;;  %v1604_v50 = vpop.permute.xlu0 %1603 }
  0xa9   : > { %v1717_v20 = vsel %vm366_vm11, %v3834_v59, %v1604_v50  ;;  %v1608_v31 = vpop.permute.xlu1 %1607 }
  0xaa   : > { %v4535_v24 = vsel %vm1744_vm14, %v1717_v20, %v1685_v17  ;;  %v1721_v21 = vsel %vm366_vm11, %v3835_v26, %v1608_v31 }
  0xab   : > { %3551 = vmatmul.mubr.msk.bf16.vlgmr.msra.gmra.mxu1 %vm1818_vm15, %v4535_v24 }
  0xac   : > { %3617 = vmatpush3.bf16.msra.mxu1 %v2229_v30 }
  0xad   : > { %v1689_v34 = vpop.permute.xlu1 %1688 }
  0xae   : > { %v4545_v41 = vsel %vm1744_vm14, %v1721_v21, %v1689_v34 }
  0xb5   : > { %v1606_v19 = vpop.permute.xlu0 %1605 }
  0xb6   : > { %v1719_v57 = vsel %vm366_vm11, %v3836_v35, %v1606_v19 }
  0xb9   : > { %v1687_v8 = vpop.permute.xlu0 %1686 }
  0xba   : > { %v4542_v39 = vsel %vm1744_vm14, %v1719_v57, %v1687_v8  ;;  %v3851_v57 = vmov 0.0  }
  0xbb   : > { %3554 = vmatprep.mubr.msk.bf16.mxu1 %vm1818_vm15, %v4542_v39  ;;  %2527 = vst.msk [vmem:[#allocation3] sm:$0xff] %vm1744_vm14, %v3851_v57  ;;  %2528 = vst.msk [vmem:[#allocation3 + $0x8] sm:$0xff] %vm1744_vm14, %v3851_v57 }
  0xbc   : > { %3555 = vmatmul.mubr.msk.bf16.gmra.mxu1 %vm1818_vm15, %v4545_v41  ;;  %2530 = vst.msk [vmem:[#allocation3 + $0x10] sm:$0x3] %vm2529_vm0, %v3851_v57 }
  0xbd   : > { %v1612_v38 = vpop.permute.xlu1 %1611  ;;  %2537 = vst.msk [vmem:[#allocation3 + $0x18] sm:$0x1] %vm2535_vm1, %v3851_v57  ;;  %2538 = vst.msk [vmem:[#allocation3 + $0x30] sm:$0x1] %vm2535_vm1, %v3851_v57 }
  0xbe   : > { %v1725_v61 = vsel %vm366_vm11, %v3837_v9, %v1612_v38  ;;  %2539 = vst.msk [vmem:[#allocation3 + $0x48] sm:$0x1] %vm2535_vm1, %v3851_v57  ;;  %2540 = vst.msk [vmem:[#allocation3 + $0x60] sm:$0x1] %vm2535_vm1, %v3851_v57 }
  0xbf   : > { %2541 = vst.msk [vmem:[#allocation3 + $0x78] sm:$0x1] %vm2535_vm1, %v3851_v57  ;;  %2542 = vst.msk [vmem:[#allocation3 + $0x90] sm:$0x1] %vm2535_vm1, %v3851_v57 }
  0xc0   : > { %2543 = vst.msk [vmem:[#allocation3 + $0xa8] sm:$0x1] %vm2535_vm1, %v3851_v57  ;;  %2544 = vst.msk [vmem:[#allocation3 + $0xc0] sm:$0x1] %vm2535_vm1, %v3851_v57 }
  0xc1   : > { %v1610_v37 = vpop.permute.xlu0 %1609  ;;  %v1693_v43 = vpop.permute.xlu1 %1692  ;;  %2545 = vst.msk [vmem:[#allocation3 + $0xd8] sm:$0x1] %vm2535_vm1, %v3851_v57  ;;  %2546 = vst.msk [vmem:[#allocation3 + $0xf0] sm:$0x1] %vm2535_vm1, %v3851_v57 }
  0xc2   : > { %v1723_v47 = vsel %vm366_vm11, %v3838_v44, %v1610_v37  ;;  %v4557_v3 = vsel %vm1744_vm14, %v1725_v61, %v1693_v43  ;;  %2547 = vst.msk [vmem:[#allocation3 + $0x108] sm:$0x1] %vm2535_vm1, %v3851_v57  ;;  %2548 = vst.msk [vmem:[#allocation3 + $0x120] sm:$0x1] %vm2535_vm1, %v3851_v57 }
  0xc3   : > { %2549 = vst.msk [vmem:[#allocation3 + $0x138] sm:$0x1] %vm2535_vm1, %v3851_v57  ;;  %2550 = vst.msk [vmem:[#allocation3 + $0x150] sm:$0x1] %vm2535_vm1, %v3851_v57 }
  0xc4   : > { %2551 = vst.msk [vmem:[#allocation3 + $0x168] sm:$0x1] %vm2535_vm1, %v3851_v57  ;;  %2552 = vst.msk [vmem:[#allocation3 + $0x180] sm:$0x1] %vm2535_vm1, %v3851_v57 }
  0xc5   : > { %v1691_v45 = vpop.permute.xlu0 %1690  ;;  %2536 = vst.msk [vmem:[#allocation3] sm:$0x1] %vm2535_vm1, %v3851_v57 }
  0xc6   : > { %v4554_v52 = vsel %vm1744_vm14, %v1723_v47, %v1691_v45 }
  0xc7   : > { %3558 = vmatprep.mubr.msk.bf16.mxu1 %vm1818_vm15, %v4554_v52  ;;  %v1616_v40 = vpop.permute.xlu1 %1615 }
  0xc8   : > { %3559 = vmatmul.mubr.msk.bf16.gmra.mxu1 %vm1818_vm15, %v4557_v3  ;;  %v1729_v4 = vsel %vm366_vm11, %v3839_v0, %v1616_v40 }
  0xcb   : > { %v1697_v10 = vpop.permute.xlu1 %1696 }
  0xcc   : > { %v1762_v13 = vsel %vm1744_vm14, %v1729_v4, %v1697_v10 }
  0xd1   : > { %v1614_v46 = vpop.permute.xlu0 %1613 }
  0xd2   : > { %v1727_v11 = vsel %vm366_vm11, %v4226_v58, %v1614_v46 }
  0xd5   : > { %v1695_v23 = vpop.permute.xlu0 %1694 }
  0xd6   : > { %v1760_v12 = vsel %vm1744_vm14, %v1727_v11, %v1695_v23 }
  0xd7   : > { %3562 = vmatprep.mubr.msk.bf16.mxu1 %vm1818_vm15, %v1760_v12 }
  0xd8   : > { %3563 = vmatmul.mubr.msk.bf16.gmra.mxu1 %vm1818_vm15, %v1762_v13 }
  0xd9   : > { %v1620_v14 = vpop.permute.xlu1 %1619 }
  0xda   : > { %v1733_v29 = vsel %vm366_vm11, %v4256_v48, %v1620_v14 }
  0xdd   : > { %v1701_v60 = vpop.permute.xlu1 %1700 }
  0xde   : > { %v1766_v62 = vsel %vm1744_vm14, %v1733_v29, %v1701_v60  ;;  %v3825_v60 = vld [vmem:[%s4979_s5 + $0x14] ss:$0 sps:$4 sm:$0xff]  }
  0xdf   : > { %3690 = vmatprep.subr.msk.bf16.mxu0 %vm2904_vm2, %v3825_v60 }
  0xe0   : > { %v1618_v28 = vpop.permute.xlu0 %1617 }
  0xe1   : > { %v1731_v49 = vsel %vm366_vm11, %v4279_v33, %v1618_v28 }
  0xe4   : > { %v1699_v53 = vpop.permute.xlu0 %1698 }
  0xe5   : > { %v1764_v58 = vsel %vm1744_vm14, %v1731_v49, %v1699_v53  ;;  %v2906_v53 = vsel %vm2904_vm2, %v3825_v60, 0 }
  0xe6   : > { %3566 = vmatprep.mubr.msk.bf16.mxu1 %vm1818_vm15, %v1764_v58 }
  0xe7   : > { %3567 = vmatmul.mubr.msk.bf16.gmra.mxu1 %vm1818_vm15, %v1766_v62 }
  0xe8   : > { %v1624_v54 = vpop.permute.xlu1 %1623 }
  0xe9   : > { %v1737_v1 = vsel %vm366_vm11, %v4318_v32, %v1624_v54 }
  0xec   : > { %v1705_v5 = vpop.permute.xlu1 %1704 }
  0xed   : > { %v1770_v16 = vsel %vm1744_vm14, %v1737_v1, %v1705_v5 }
  0xf0   : > { %v1622_v51 = vpop.permute.xlu0 %1621 }
  0xf1   : > { %v1735_v48 = vsel %vm366_vm11, %v4348_v27, %v1622_v51 }
  0xf4   : > { %v1703_v42 = vpop.permute.xlu0 %1702 }
  0xf5   : > { %v1768_v33 = vsel %vm1744_vm14, %v1735_v48, %v1703_v42 }
  0xf6   : > { %3570 = vmatprep.mubr.msk.bf16.mxu1 %vm1818_vm15, %v1768_v33 }
  0xf7   : > { %3571 = vmatmul.mubr.msk.bf16.gmra.mxu1 %vm1818_vm15, %v1770_v16 }
  0xf8   : > { %v1628_v63 = vpop.permute.xlu1 %1627 }
  0xf9   : > { %v1741_v55 = vsel %vm366_vm11, %v4380_v25, %v1628_v63 }
  0xfc   : > { %v1709_v7 = vpop.permute.xlu1 %1708 }
  0xfd   : > { %v1626_v18 = vpop.permute.xlu0 %1625  ;;  %v1774_v17 = vsel %vm1744_vm14, %v1741_v55, %v1709_v7 }
  0xfe   : > { %v1739_v32 = vsel %vm366_vm11, %v4394_v56, %v1626_v18 }
 0x101   : > { %v1707_v50 = vpop.permute.xlu0 %1706 }
 0x102   : > { %v1772_v27 = vsel %vm1744_vm14, %v1739_v32, %v1707_v50 }
 0x103   : > { %3574 = vmatprep.mubr.msk.bf16.mxu1 %vm1818_vm15, %v1772_v27 }
 0x104   : > { %3575 = vmatmul.mubr.msk.bf16.gmra.mxu1 %vm1818_vm15, %v1774_v17  ;;  %v1711_v59 = vpop.permute.xlu1 %1710 }
 0x107   : > { %v1630_v20 = vpop.permute.xlu0 %1629 }
 0x108   : > { %v1743_v30 = vsel %vm366_vm11, %v4479_v6, %v1630_v20 }
 0x109   : > { %v1776_v25 = vsel %vm1744_vm14, %v1743_v30, %v1711_v59  ;;  %v4750_v59 = vld [vmem:[%s4978_s4] ss:$0 sm:$0xff] }
 0x10a   : > { %3578 = vmatprep.mubr.msk.bf16.mxu1 %vm1818_vm15, %v1776_v25 }
 0x10f   : > { %v1805_v31 = vpop.permute.xlu1 %1804 }
 0x112   : > { %v1800_v56 = vpop.permute.xlu0 %1799 }
 0x113   : > { %v1807_v19 = vsel %vm366_vm11, %v4497_v22, %v1800_v56  ;;  %v1681_v26 = vpop.permute.xlu1 %1680 }
 0x114   : > { %v1809_v34 = vsel %vm1744_vm14, %v1807_v19, %v1805_v31 }
 0x115   : > { %3579 = vmatmul.mubr.msk.bf16.gmra.mxu1 %vm1818_vm15, %v1809_v34 }
 0x116   : > { %3618 = vmatprep.mubr.msk.bf16.mxu1 %vm1818_vm15, %v4535_v24  ;;  %v1600_v21 = vpop.permute.xlu0 %1599 }
 0x117   : > { %v1713_v6 = vsel %vm366_vm11, %v4488_v36, %v1600_v21 }
 0x118   : > { %v1746_v35 = vsel %vm1744_vm14, %v1713_v6, %v1681_v26 }
 0x119   : > { %3584 = vmatprep.mubr.msk.bf16.mxu0 %vm1818_vm15, %v1746_v35 }
 0x11a   : > { %3585 = vmatmul.mubr.msk.bf16.vlgmr.msra.gmra.mxu0 %vm1818_vm15, %v4525_v15  ;;  %v2208_v36 = vpop.permute.xlu0 %2207  ;;  %v2213_v15 = vpop.permute.xlu1 %2212 }
 0x11b   : > { %3588 = vmatprep.mubr.msk.bf16.mxu0 %vm1818_vm15, %v4535_v24  ;;  %v2215_v22 = vsel %vm366_vm11, %v4495_v2, %v2208_v36  ;;  %3651 = vmatpush3.bf16.msra.mxu0 %v2906_v53 }
 0x11c   : > { %v2217_v24 = vsel %vm1744_vm14, %v2215_v22, %v2213_v15 }
 0x11d   : > { %3619 = vmatmul.mubr.msk.bf16.vlgmr.msra.gmra.mxu1 %vm1818_vm15, %v4542_v39 }
 0x11e   : > { %3622 = vmatprep.mubr.msk.bf16.mxu1 %vm1818_vm15, %v4545_v41 }
 0x122   : > { %3589 = vmatmul.mubr.msk.bf16.gmra.mxu0 %vm1818_vm15, %v4542_v39 }
 0x123   : > { %3592 = vmatprep.mubr.msk.bf16.mxu0 %vm1818_vm15, %v4545_v41 }
 0x125   : > { %3623 = vmatmul.mubr.msk.bf16.gmra.mxu1 %vm1818_vm15, %v4554_v52 }
 0x126   : > { %3626 = vmatprep.mubr.msk.bf16.mxu1 %vm1818_vm15, %v4557_v3 }
 0x12a   : > { %3593 = vmatmul.mubr.msk.bf16.gmra.mxu0 %vm1818_vm15, %v4554_v52 }
 0x12b   : > { %3596 = vmatprep.mubr.msk.bf16.mxu0 %vm1818_vm15, %v4557_v3 }
 0x12d   : > { %3627 = vmatmul.mubr.msk.bf16.gmra.mxu1 %vm1818_vm15, %v1760_v12 }
 0x12e   : > { %3630 = vmatprep.mubr.msk.bf16.mxu1 %vm1818_vm15, %v1762_v13 }
 0x132   : > { %3597 = vmatmul.mubr.msk.bf16.gmra.mxu0 %vm1818_vm15, %v1760_v12 }
 0x133   : > { %3600 = vmatprep.mubr.msk.bf16.mxu0 %vm1818_vm15, %v1762_v13 }
 0x135   : > { %3631 = vmatmul.mubr.msk.bf16.gmra.mxu1 %vm1818_vm15, %v1764_v58 }
 0x136   : > { %3634 = vmatprep.mubr.msk.bf16.mxu1 %vm1818_vm15, %v1766_v62 }
 0x13a   : > { %3601 = vmatmul.mubr.msk.bf16.gmra.mxu0 %vm1818_vm15, %v1764_v58 }
 0x13b   : > { %3604 = vmatprep.mubr.msk.bf16.mxu0 %vm1818_vm15, %v1766_v62 }
 0x13d   : > { %3635 = vmatmul.mubr.msk.bf16.gmra.mxu1 %vm1818_vm15, %v1768_v33 }
 0x13e   : > { %3638 = vmatprep.mubr.msk.bf16.mxu1 %vm1818_vm15, %v1770_v16 }
 0x142   : > { %3605 = vmatmul.mubr.msk.bf16.gmra.mxu0 %vm1818_vm15, %v1768_v33 }
 0x143   : > { %3608 = vmatprep.mubr.msk.bf16.mxu0 %vm1818_vm15, %v1770_v16 }
 0x145   : > { %3639 = vmatmul.mubr.msk.bf16.gmra.mxu1 %vm1818_vm15, %v1772_v27 }
 0x146   : > { %3642 = vmatprep.mubr.msk.bf16.mxu1 %vm1818_vm15, %v1774_v17 }
 0x14a   : > { %3609 = vmatmul.mubr.msk.bf16.gmra.mxu0 %vm1818_vm15, %v1772_v27 }
 0x14b   : > { %3612 = vmatprep.mubr.msk.bf16.mxu0 %vm1818_vm15, %v1774_v17 }
 0x14d   : > { %3643 = vmatmul.mubr.msk.bf16.gmra.mxu1 %vm1818_vm15, %v1776_v25 }
 0x14e   : > { %3646 = vmatprep.mubr.msk.bf16.mxu1 %vm1818_vm15, %v1809_v34 }
 0x152   : > { %3613 = vmatmul.mubr.msk.bf16.gmra.mxu0 %vm1818_vm15, %v1776_v25 }
 0x155   : > { %3647 = vmatmul.mubr.msk.bf16.gmra.mxu1 %vm1818_vm15, %v2217_v24 }
 0x157   : > { %v4706_v13 = vpop.f32.mrf.mxu0 }
 0x159   : > { %v4710_v28 = vpop.f32.mrf.mxu0 }
 0x15b   : > { %v4717_v49 = vpop.f32.mrf.mxu0 }
 0x15d   : > { %v4723_v62 = vpop.f32.mrf.mxu0 }
 0x15f   : > { %v4727_v51 = vpop.f32.mrf.mxu0 }
 0x161   : > { %v4731_v5 = vpop.f32.mrf.mxu0 }
 0x163   : > { %v4735_v42 = vpop.f32.mrf.mxu0 }
 0x165   : > { %v4741_v63 = vpop.f32.mrf.mxu0 }
 0x16b   : > { %v3552_v2 = vpop.f32.mrf.mxu1 }
 0x16d   : > { %v1889_v8 = vpop.f32.mrf.mxu1 }
 0x16f   : > { %v3553_v39 = vpop.f32.mrf.mxu1 }
 0x171   : > { %v1892_v41 = vpop.f32.mrf.mxu1 }
 0x17c   : > { %v4670_v38 = vpop.f32.mrf.mxu1 }
 0x17e   : > { %v4672_v37 = vpop.f32.mrf.mxu1 }
 0x180   : > { %v4674_v9 = vpop.f32.mrf.mxu1 }
 0x182   : > { %v4676_v61 = vpop.f32.mrf.mxu1 }
 0x188   : > { %v4678_v43 = vpop.f32.mrf.mxu1 }
 0x18a   : > { %v4680_v44 = vpop.f32.mrf.mxu1 }
 0x18c   : > { %v4682_v47 = vpop.f32.mrf.mxu1 }
 0x18e   : > { %v4684_v45 = vpop.f32.mrf.mxu1 }
 0x198   : > { %v4686_v52 = vpop.f32.mrf.mxu1 }
 0x19a   : > { %v4688_v3 = vpop.f32.mrf.mxu1 }
 0x19c   : > { %v4690_v40 = vpop.f32.mrf.mxu1 }
 0x19e   : > { %v4692_v46 = vpop.f32.mrf.mxu1 }
 0x1a7   : > { %v4694_v0 = vpop.f32.mrf.mxu1 }
 0x1a9   : > { %v4696_v4 = vpop.f32.mrf.mxu1 }
 0x1ab   : > { %v4698_v10 = vpop.f32.mrf.mxu1 }
 0x1ad   : > { %v4700_v11 = vpop.f32.mrf.mxu1 }
 0x1b7   : > { %v4702_v23 = vpop.f32.mrf.mxu1 }
 0x1b9   : > { %v4704_v12 = vpop.f32.mrf.mxu1 }
 0x1bb   : > { %v4708_v14 = vpop.f32.mrf.mxu1 }
 0x1bd   : > { %v4712_v29 = vpop.f32.mrf.mxu1 }
 0x1c4   : > { %v4721_v58 = vpop.f32.mrf.mxu1 }
 0x1c6   : > { %v4725_v54 = vpop.f32.mrf.mxu1 }
 0x1c8   : > { %v4729_v1 = vpop.f32.mrf.mxu1 }
 0x1ca   : > { %v4733_v48 = vpop.f32.mrf.mxu1 }
 0x1d5   : > { %v4737_v33 = vpop.f32.mrf.mxu1 }
 0x1d7   : > { %v4739_v16 = vpop.f32.mrf.mxu1 }
 0x1d9   : > { %v4743_v18 = vpop.f32.mrf.mxu1 }
 0x1da   : > { %v3586_v55 = vpop.f32.mrf.mxu0 }
 0x1db   : > { %v2069_v7 = vadd.f32 %v3586_v55, %v3552_v2  ;;  %v4745_v32 = vpop.f32.mrf.mxu1 }
 0x1dc   : > { %v2060_v50 = vpop.f32.mrf.mxu0 }
 0x1dd   : > { %v2061_v27 = vadd.f32 %v2060_v50, %v1889_v8  ;;  %v3620_v17 = vpop.f32.mrf.mxu1 }
 0x1de   : > { %v2394_v20 = vadd.f32 %v3620_v17, %v2069_v7  ;;  %v3587_v30 = vpop.f32.mrf.mxu0 }
 0x1df   : > { %v2072_v25 = vadd.f32 %v3587_v30, %v3553_v39  ;;  %v2265_v31 = vpop.f32.mrf.mxu1 }
 0x1e0   : > { %vm2426_vm3 = vcmp.ge.f32.partialorder %v2394_v20, 0.0  ;;  %v2465_v56 = vmul.f32 %v4750_v59, %v2394_v20  ;;  %v2392_v19 = vadd.f32 %v2265_v31, %v2061_v27  ;;  %v2063_v34 = vpop.f32.mrf.mxu0 }
 0x1e1   : > { %v2064_v26 = vadd.f32 %v2063_v34, %v1892_v41  ;;  %v3621_v21 = vpop.f32.mrf.mxu1 }
 0x1e2   : > { %v2497_v6 = vsel %vm2426_vm3, %v2394_v20, %v2465_v56  ;;  %vm2424_vm4 = vcmp.ge.f32.partialorder %v2392_v19, 0.0  ;;  %v2463_v35 = vmul.f32 %v4750_v59, %v2392_v19  ;;  %v2395_v36 = vadd.f32 %v3621_v21, %v2072_v25  ;;  %v3590_v22 = vpop.f32.mrf.mxu0 }
 0x1e3   : > { %2575 = vst.msk [vmem:[#allocation3 + $0x31] sm:$0xff] %vm1744_vm14, %v2497_v6  ;;  %v2085_v15 = vadd.f32 %v3590_v22, %v4670_v38  ;;  %v2268_v24 = vpop.f32.mrf.mxu1 }
 0x1e4   : > { %v2495_v57 = vsel %vm2424_vm4, %v2392_v19, %v2463_v35  ;;  %vm2427_vm5 = vcmp.ge.f32.partialorder %v2395_v36, 0.0  ;;  %v2466_v2 = vmul.f32 %v4750_v59, %v2395_v36  ;;  %v2393_v8 = vadd.f32 %v2268_v24, %v2064_v26  ;;  %v2076_v39 = vpop.f32.mrf.mxu0 }
 0x1e5   : > { %2573 = vst.msk [vmem:[#allocation3 + $0x19] sm:$0xff] %vm1744_vm14, %v2495_v57  ;;  %v2077_v41 = vadd.f32 %v2076_v39, %v4672_v37  ;;  %v3624_v60 = vpop.f32.mrf.mxu1 }
 0x1e6   : > { %v2498_v53 = vsel %vm2427_vm5, %v2395_v36, %v2466_v2  ;;  %vm2425_vm6 = vcmp.ge.f32.partialorder %v2393_v8, 0.0  ;;  %v2464_v55 = vmul.f32 %v4750_v59, %v2393_v8  ;;  %v2398_v7 = vadd.f32 %v3624_v60, %v2085_v15  ;;  %v3591_v50 = vpop.f32.mrf.mxu0 }
 0x1e7   : > { %2576 = vst.msk [vmem:[#allocation3 + $0x39] sm:$0xff] %vm1744_vm14, %v2498_v53  ;;  %v2088_v38 = vadd.f32 %v3591_v50, %v4674_v9  ;;  %v2281_v27 = vpop.f32.mrf.mxu1 }
 0x1e8   : > { %v2496_v17 = vsel %vm2425_vm6, %v2393_v8, %v2464_v55  ;;  %vm2430_vm7 = vcmp.ge.f32.partialorder %v2398_v7, 0.0  ;;  %v2469_v20 = vmul.f32 %v4750_v59, %v2398_v7  ;;  %v2396_v30 = vadd.f32 %v2281_v27, %v2077_v41  ;;  %v2079_v25 = vpop.f32.mrf.mxu0 }
 0x1e9   : > { %2574 = vst.msk [vmem:[#allocation3 + $0x21] sm:$0xff] %vm1744_vm14, %v2496_v17  ;;  %v2080_v37 = vadd.f32 %v2079_v25, %v4676_v61  ;;  %v3625_v31 = vpop.f32.mrf.mxu1 }
 0x1ea   : > { %v2501_v56 = vsel %vm2430_vm7, %v2398_v7, %v2469_v20  ;;  %vm2428_vm8 = vcmp.ge.f32.partialorder %v2396_v30, 0.0  ;;  %v2467_v19 = vmul.f32 %v4750_v59, %v2396_v30  ;;  %v2399_v34 = vadd.f32 %v3625_v31, %v2088_v38  ;;  %v3594_v26 = vpop.f32.mrf.mxu0 }
 0x1eb   : > { %2579 = vst.msk [vmem:[#allocation3 + $0x61] sm:$0xff] %vm1744_vm14, %v2501_v56  ;;  %v2101_v9 = vadd.f32 %v3594_v26, %v4678_v43  ;;  %v2284_v21 = vpop.f32.mrf.mxu1 }
 0x1ec   : > { %v2499_v6 = vsel %vm2428_vm8, %v2396_v30, %v2467_v19  ;;  %vm2431_vm9 = vcmp.ge.f32.partialorder %v2399_v34, 0.0  ;;  %v2470_v35 = vmul.f32 %v4750_v59, %v2399_v34  ;;  %v2397_v36 = vadd.f32 %v2284_v21, %v2080_v37  ;;  %v2092_v22 = vpop.f32.mrf.mxu0 }
 0x1ed   : > { %2577 = vst.msk [vmem:[#allocation3 + $0x49] sm:$0xff] %vm1744_vm14, %v2499_v6  ;;  %v2093_v61 = vadd.f32 %v2092_v22, %v4680_v44  ;;  %v3628_v15 = vpop.f32.mrf.mxu1 }
 0x1ee   : > { %v2502_v24 = vsel %vm2431_vm9, %v2399_v34, %v2470_v35  ;;  %vm2429_vm10 = vcmp.ge.f32.partialorder %v2397_v36, 0.0  ;;  %v2468_v57 = vmul.f32 %v4750_v59, %v2397_v36  ;;  %v2402_v2 = vadd.f32 %v3628_v15, %v2101_v9  ;;  %v3595_v8 = vpop.f32.mrf.mxu0 }
 0x1ef   : > { %2580 = vst.msk [vmem:[#allocation3 + $0x69] sm:$0xff] %vm1744_vm14, %v2502_v24  ;;  %v2104_v43 = vadd.f32 %v3595_v8, %v4682_v47  ;;  %v2297_v39 = vpop.f32.mrf.mxu1 }
 0x1f0   : > { %v2500_v41 = vsel %vm2429_vm10, %v2397_v36, %v2468_v57  ;;  %vm2434_vm11 = vcmp.ge.f32.partialorder %v2402_v2, 0.0  ;;  %v2473_v60 = vmul.f32 %v4750_v59, %v2402_v2  ;;  %v2400_v53 = vadd.f32 %v2297_v39, %v2093_v61  ;;  %v2095_v55 = vpop.f32.mrf.mxu0  ;;  %v2641_v61 = vld [vmem:[#allocation3 + $0x19] ss:$2 sm:$0xff] }
 0x1f1   : > { %2578 = vst.msk [vmem:[#allocation3 + $0x51] sm:$0xff] %vm1744_vm14, %v2500_v41  ;;  %v2096_v44 = vadd.f32 %v2095_v55, %v4684_v45  ;;  %v3629_v7 = vpop.f32.mrf.mxu1 }
 0x1f2   : > { %v2505_v50 = vsel %vm2434_vm11, %v2402_v2, %v2473_v60  ;;  %vm2432_vm12 = vcmp.ge.f32.partialorder %v2400_v53, 0.0  ;;  %v2471_v38 = vmul.f32 %v4750_v59, %v2400_v53  ;;  %v2403_v27 = vadd.f32 %v3629_v7, %v2104_v43  ;;  %v3598_v17 = vpop.f32.mrf.mxu0  ;;  %v2675_v7 = vld [vmem:[#allocation3 + $0x1a] ss:$2 sm:$0xff] }
 0x1f3   : > { %2583 = vst.msk [vmem:[#allocation3 + $0x91] sm:$0xff] %vm1744_vm14, %v2505_v50  ;;  %v2117_v47 = vadd.f32 %v3598_v17, %v4686_v52  ;;  %v2300_v20 = vpop.f32.mrf.mxu1 }
 0x1f4   : > { %v2503_v30 = vsel %vm2432_vm12, %v2400_v53, %v2471_v38  ;;  %vm2435_vm13 = vcmp.ge.f32.partialorder %v2403_v27, 0.0  ;;  %v2474_v25 = vmul.f32 %v4750_v59, %v2403_v27  ;;  %v2401_v37 = vadd.f32 %v2300_v20, %v2096_v44  ;;  %v2108_v31 = vpop.f32.mrf.mxu0 }
 0x1f5   : > { %2581 = vst.msk [vmem:[#allocation3 + $0x79] sm:$0xff] %vm1744_vm14, %v2503_v30  ;;  %v2109_v45 = vadd.f32 %v2108_v31, %v4688_v3  ;;  %v3632_v56 = vpop.f32.mrf.mxu1 }
 0x1f6   : > { %v2506_v19 = vsel %vm2435_vm13, %v2403_v27, %v2474_v25  ;;  %vm2433_vm15 = vcmp.ge.f32.partialorder %v2401_v37, 0.0  ;;  %v2472_v34 = vmul.f32 %v4750_v59, %v2401_v37  ;;  %v2406_v26 = vadd.f32 %v3632_v56, %v2117_v47  ;;  %v3599_v9 = vpop.f32.mrf.mxu0  ;;  %v3826_v56 = vld [vmem:[%s4979_s5 + $0xc] sm:$0xff]  }
 0x1f7   : > { %2584 = vst.msk [vmem:[#allocation3 + $0x99] sm:$0xff] %vm1744_vm14, %v2506_v19  ;;  %v2120_v52 = vadd.f32 %v3599_v9, %v4690_v40  ;;  %v2313_v21 = vpop.f32.mrf.mxu1  ;;  %3652 = vmatprep.subr.bf16.mxu0 %v3826_v56 }
 0x1f8   : > { %v2504_v6 = vsel %vm2433_vm15, %v2401_v37, %v2472_v34  ;;  %vm2438_vm0 = vcmp.ge.f32.partialorder %v2406_v26, 0.0  ;;  %v2477_v35 = vmul.f32 %v4750_v59, %v2406_v26  ;;  %v2404_v36 = vadd.f32 %v2313_v21, %v2109_v45  ;;  %v2111_v22 = vpop.f32.mrf.mxu0  ;;  %v2645_v3 = vld [vmem:[#allocation3 + $0x49] ss:$2 sm:$0xff]  ;;  %v2679_v39 = vld [vmem:[#allocation3 + $0x4a] ss:$2 sm:$0xff]  ;;  %3653 = vmatpush3.bf16.msra.mxu0 %v3826_v56 }
 0x1f9   : > { %2582 = vst.msk [vmem:[#allocation3 + $0x81] sm:$0xff] %vm1744_vm14, %v2504_v6  ;;  %v2112_v15 = vadd.f32 %v2111_v22, %v4692_v46  ;;  %v3633_v24 = vpop.f32.mrf.mxu1  ;;  %v3706_v57 = vpack.i.bf16 %v2645_v3, %v2641_v61  ;;  %v3711_v27 = vpack.i.bf16 %v2679_v39, %v2675_v7 }
 0x1fa   : > { %v2509_v2 = vsel %vm2438_vm0, %v2406_v26, %v2477_v35  ;;  %vm2436_vm1 = vcmp.ge.f32.partialorder %v2404_v36, 0.0  ;;  %v2475_v8 = vmul.f32 %v4750_v59, %v2404_v36  ;;  %v2407_v40 = vadd.f32 %v3633_v24, %v2120_v52  ;;  %v3602_v43 = vpop.f32.mrf.mxu0 }
 0x1fb   : > { %2587 = vst.msk [vmem:[#allocation3 + $0xc1] sm:$0xff] %vm1744_vm14, %v2509_v2  ;;  %v2133_v41 = vadd.f32 %v3602_v43, %v4694_v0  ;;  %v2316_v60 = vpop.f32.mrf.mxu1  ;;  %3707 = vrot.lane.b32.xlu0 %v3706_v57, %s3849_s19 }
 0x1fc   : > { %v2507_v53 = vsel %vm2436_vm1, %v2404_v36, %v2475_v8  ;;  %vm2439_vm3 = vcmp.ge.f32.partialorder %v2407_v40, 0.0  ;;  %v2478_v46 = vmul.f32 %v4750_v59, %v2407_v40  ;;  %v2405_v55 = vadd.f32 %v2316_v60, %v2112_v15  ;;  %v2124_v44 = vpop.f32.mrf.mxu0 }
 0x1fd   : > { %2585 = vst.msk [vmem:[#allocation3 + $0xa9] sm:$0xff] %vm1744_vm14, %v2507_v53  ;;  %v2125_v50 = vadd.f32 %v2124_v44, %v4696_v4  ;;  %v3636_v38 = vpop.f32.mrf.mxu1 }
 0x1fe   : > { %v2510_v17 = vsel %vm2439_vm3, %v2407_v40, %v2478_v46  ;;  %vm2437_vm4 = vcmp.ge.f32.partialorder %v2405_v55, 0.0  ;;  %v2476_v0 = vmul.f32 %v4750_v59, %v2405_v55  ;;  %v2410_v47 = vadd.f32 %v3636_v38, %v2133_v41  ;;  %v3603_v20 = vpop.f32.mrf.mxu0 }
 0x1ff   : > { %2588 = vst.msk [vmem:[#allocation3 + $0xc9] sm:$0xff] %vm1744_vm14, %v2510_v17  ;;  %v2136_v30 = vadd.f32 %v3603_v20, %v4698_v10  ;;  %v2329_v25 = vpop.f32.mrf.mxu1  ;;  %3712 = vrot.lane.b32.xlu0 %v3711_v27, %s3852_s18 }
 0x200   : > { %v2508_v37 = vsel %vm2437_vm4, %v2405_v55, %v2476_v0  ;;  %vm2442_vm5 = vcmp.ge.f32.partialorder %v2410_v47, 0.0  ;;  %v2481_v4 = vmul.f32 %v4750_v59, %v2410_v47  ;;  %v2408_v31 = vadd.f32 %v2329_v25, %v2125_v50  ;;  %v2127_v45 = vpop.f32.mrf.mxu0  ;;  %v2649_v60 = vld [vmem:[#allocation3 + $0x79] ss:$2 sm:$0xff] }
 0x201   : > { %2586 = vst.msk [vmem:[#allocation3 + $0xb1] sm:$0xff] %vm1744_vm14, %v2508_v37  ;;  %v2128_v19 = vadd.f32 %v2127_v45, %v4700_v11  ;;  %v3637_v34 = vpop.f32.mrf.mxu1 }
 0x202   : > { %v2513_v10 = vsel %vm2442_vm5, %v2410_v47, %v2481_v4  ;;  %vm2440_vm6 = vcmp.ge.f32.partialorder %v2408_v31, 0.0  ;;  %v2479_v26 = vmul.f32 %v4750_v59, %v2408_v31  ;;  %v2411_v9 = vadd.f32 %v3637_v34, %v2136_v30  ;;  %v3606_v52 = vpop.f32.mrf.mxu0  ;;  %v2683_v30 = vld [vmem:[#allocation3 + $0x7a] ss:$2 sm:$0xff] }
 0x203   : > { %2591 = vst.msk [vmem:[#allocation3 + $0xf1] sm:$0xff] %vm1744_vm14, %v2513_v10  ;;  %v2149_v21 = vadd.f32 %v3606_v52, %v4702_v23  ;;  %v2332_v6 = vpop.f32.mrf.mxu1 }
 0x204   : > { %v2511_v35 = vsel %vm2440_vm6, %v2408_v31, %v2479_v26  ;;  %vm2443_vm7 = vcmp.ge.f32.partialorder %v2411_v9, 0.0  ;;  %v2482_v36 = vmul.f32 %v4750_v59, %v2411_v9  ;;  %v2409_v22 = vadd.f32 %v2332_v6, %v2128_v19  ;;  %v2140_v11 = vpop.f32.mrf.mxu0 }
 0x205   : > { %2589 = vst.msk [vmem:[#allocation3 + $0xd9] sm:$0xff] %vm1744_vm14, %v2511_v35  ;;  %v2141_v61 = vadd.f32 %v2140_v11, %v4704_v12  ;;  %v3640_v3 = vpop.f32.mrf.mxu1 }
 0x206   : > { %v2514_v15 = vsel %vm2443_vm7, %v2411_v9, %v2482_v36  ;;  %vm2441_vm8 = vcmp.ge.f32.partialorder %v2409_v22, 0.0  ;;  %v2480_v24 = vmul.f32 %v4750_v59, %v2409_v22  ;;  %v2414_v57 = vadd.f32 %v3640_v3, %v2149_v21  ;;  %v3607_v2 = vpop.f32.mrf.mxu0 }
 0x207   : > { %2592 = vst.msk [vmem:[#allocation3 + $0xf9] sm:$0xff] %vm1744_vm14, %v2514_v15  ;;  %v2152_v23 = vadd.f32 %v3607_v2, %v4708_v14  ;;  %v2345_v8 = vpop.f32.mrf.mxu1  ;;  %vm2778_vm7 = vcmask 130048  }
 0x208   : > { %v2512_v40 = vsel %vm2441_vm8, %v2409_v22, %v2480_v24  ;;  %vm2446_vm9 = vcmp.ge.f32.partialorder %v2414_v57, 0.0  ;;  %v2485_v43 = vmul.f32 %v4750_v59, %v2414_v57  ;;  %v2412_v39 = vadd.f32 %v2345_v8, %v2141_v61  ;;  %v2143_v41 = vpop.f32.mrf.mxu0  ;;  %v2653_v12 = vld [vmem:[#allocation3 + $0xa9] ss:$2 sm:$0xff]  ;;  %v2687_v38 = vld [vmem:[#allocation3 + $0xaa] ss:$2 sm:$0xff] }
 0x209   : > { %2590 = vst.msk [vmem:[#allocation3 + $0xe1] sm:$0xff] %vm1744_vm14, %v2512_v40  ;;  %v2144_v53 = vadd.f32 %v2143_v41, %v4712_v29  ;;  %v3641_v46 = vpop.f32.mrf.mxu1  ;;  %v3716_v55 = vpack.i.bf16 %v2653_v12, %v2649_v60  ;;  %v3721_v4 = vpack.i.bf16 %v2687_v38, %v2683_v30  ;;  %v2639_v30 = vld [vmem:[#allocation3 + $0x1] ss:$2 sm:$0xff]  ;;  %vm2891_vm8 = vcmask 195584  }
 0x20a   : > { %v2517_v44 = vsel %vm2446_vm9, %v2414_v57, %v2485_v43  ;;  %vm2444_vm10 = vcmp.ge.f32.partialorder %v2412_v39, 0.0  ;;  %v2483_v7 = vmul.f32 %v4750_v59, %v2412_v39  ;;  %v2415_v14 = vadd.f32 %v3641_v46, %v2152_v23  ;;  %v3610_v50 = vpop.f32.mrf.mxu0 }
 0x20b   : > { %2595 = vst.msk [vmem:[#allocation3 + $0x121] sm:$0xff] %vm1744_vm14, %v2517_v44  ;;  %v2165_v27 = vadd.f32 %v3610_v50, %v4721_v58  ;;  %v2348_v17 = vpop.f32.mrf.mxu1  ;;  %3717 = vrot.lane.b32.xlu1 %v3716_v55, %s3849_s19 }
 0x20c   : > { %v2515_v0 = vsel %vm2444_vm10, %v2412_v39, %v2483_v7  ;;  %vm2447_vm11 = vcmp.ge.f32.partialorder %v2415_v14, 0.0  ;;  %v2486_v29 = vmul.f32 %v4750_v59, %v2415_v14  ;;  %v2413_v47 = vadd.f32 %v2348_v17, %v2144_v53  ;;  %v2156_v20 = vpop.f32.mrf.mxu0 }
 0x20d   : > { %2593 = vst.msk [vmem:[#allocation3 + $0x109] sm:$0xff] %vm1744_vm14, %v2515_v0  ;;  %v2157_v25 = vadd.f32 %v2156_v20, %v4725_v54  ;;  %v3644_v37 = vpop.f32.mrf.mxu1 }
 0x20e   : > { %v2518_v31 = vsel %vm2447_vm11, %v2415_v14, %v2486_v29  ;;  %vm2445_vm12 = vcmp.ge.f32.partialorder %v2413_v47, 0.0  ;;  %v2484_v58 = vmul.f32 %v4750_v59, %v2413_v47  ;;  %v2418_v45 = vadd.f32 %v3644_v37, %v2165_v27  ;;  %v3611_v56 = vpop.f32.mrf.mxu0 }
 0x20f   : > { %2596 = vst.msk [vmem:[#allocation3 + $0x129] sm:$0xff] %vm1744_vm14, %v2518_v31  ;;  %v2168_v19 = vadd.f32 %v3611_v56, %v4729_v1  ;;  %v2361_v34 = vpop.f32.mrf.mxu1  ;;  %3722 = vrot.lane.b32.xlu1 %v3721_v4, %s3852_s18  ;;  %v4856_v31 = vld [vmem:[%s4979_s5 + $0x8] ss:$0 sps:$4 sm:$0xff]   ;;  %v2659_v56 = vld [vmem:[#allocation3 + $0xf1] ss:$2 sm:$0xff] }
 0x210   : > { %v2516_v10 = vsel %vm2445_vm12, %v2413_v47, %v2484_v58  ;;  %vm2450_vm13 = vcmp.ge.f32.partialorder %v2418_v45, 0.0  ;;  %v2489_v26 = vmul.f32 %v4750_v59, %v2418_v45  ;;  %v2416_v54 = vadd.f32 %v2361_v34, %v2157_v25  ;;  %v2159_v9 = vpop.f32.mrf.mxu0  ;;  %v2657_v53 = vld [vmem:[#allocation3 + $0xd9] ss:$2 sm:$0xff]  ;;  %v2691_v29 = vld [vmem:[#allocation3 + $0xda] ss:$2 sm:$0xff]  ;;  %3691 = vmatprep.subr.msk.bf16.mxu0 %vm2904_vm2, %v4856_v31 }
 0x211   : > { %2594 = vst.msk [vmem:[#allocation3 + $0x111] sm:$0xff] %vm1744_vm14, %v2516_v10  ;;  %v2160_v52 = vadd.f32 %v2159_v9, %v4733_v48  ;;  %v3645_v21 = vpop.f32.mrf.mxu1  ;;  %v2643_v25 = vld [vmem:[#allocation3 + $0x31] ss:$2 sm:$0xff]  ;;  %v2673_v58 = vld [vmem:[#allocation3 + $0x2] ss:$2 sm:$0xff] }
 0x212   : > { %v2521_v6 = vsel %vm2450_vm13, %v2418_v45, %v2489_v26  ;;  %vm2448_vm15 = vcmp.ge.f32.partialorder %v2416_v54, 0.0  ;;  %v2487_v35 = vmul.f32 %v4750_v59, %v2416_v54  ;;  %v2419_v36 = vadd.f32 %v3645_v21, %v2168_v19  ;;  %v3614_v1 = vpop.f32.mrf.mxu0  ;;  %v2677_v45 = vld [vmem:[#allocation3 + $0x32] ss:$2 sm:$0xff]  ;;  %v2655_v10 = vld [vmem:[#allocation3 + $0xc1] ss:$2 sm:$0xff] }
 0x213   : > { %2599 = vst.msk [vmem:[#allocation3 + $0x151] sm:$0xff] %vm1744_vm14, %v2521_v6  ;;  %v2181_v22 = vadd.f32 %v3614_v1, %v4737_v33  ;;  %v2364_v11 = vpop.f32.mrf.mxu1  ;;  %v3736_v4 = vpack.i.bf16 %v2643_v25, %v2639_v30  ;;  %v2689_v6 = vld [vmem:[#allocation3 + $0xc2] ss:$2 sm:$0xff]  ;;  %v2651_v1 = vld [vmem:[#allocation3 + $0x91] ss:$2 sm:$0xff] }
 0x214   : > { %v2519_v61 = vsel %vm2448_vm15, %v2416_v54, %v2487_v35  ;;  %vm2451_vm0 = vcmp.ge.f32.partialorder %v2419_v36, 0.0  ;;  %v2490_v3 = vmul.f32 %v4750_v59, %v2419_v36  ;;  %v2417_v15 = vadd.f32 %v2364_v11, %v2160_v52  ;;  %v2172_v24 = vpop.f32.mrf.mxu0  ;;  %v2693_v52 = vld [vmem:[#allocation3 + $0xf2] ss:$2 sm:$0xff] }
 0x215   : > { %2597 = vst.msk [vmem:[#allocation3 + $0x139] sm:$0xff] %vm1744_vm14, %v2519_v61  ;;  %v2173_v48 = vadd.f32 %v2172_v24, %v4739_v16  ;;  %v3648_v57 = vpop.f32.mrf.mxu1  ;;  %v3766_v54 = vpack.i.bf16 %v2659_v56, %v2655_v10  ;;  %v2623_v10 = vld [vmem:[#allocation3 + $0xd8] ss:$2 sm:$0xff] }
 0x216   : > { %v2522_v2 = vsel %vm2451_vm0, %v2419_v36, %v2490_v3  ;;  %vm2449_vm1 = vcmp.ge.f32.partialorder %v2417_v15, 0.0  ;;  %v2488_v23 = vmul.f32 %v4750_v59, %v2417_v15  ;;  %v2422_v8 = vadd.f32 %v3648_v57, %v2181_v22  ;;  %v3615_v40 = vpop.f32.mrf.mxu0  ;;  %v2647_v22 = vld [vmem:[#allocation3 + $0x61] ss:$2 sm:$0xff]  ;;  %v2685_v3 = vld [vmem:[#allocation3 + $0x92] ss:$2 sm:$0xff] }
 0x217   : > { %2600 = vst.msk [vmem:[#allocation3 + $0x159] sm:$0xff] %vm1744_vm14, %v2522_v2  ;;  %v2184_v33 = vadd.f32 %v3615_v40, %v4743_v18  ;;  %v2377_v43 = vpop.f32.mrf.mxu1  ;;  %v3776_v36 = vpack.i.bf16 %v2693_v52, %v2689_v6  ;;  %v3751_v11 = vpack.i.bf16 %v2651_v1, %v2647_v22  ;;  %v2663_v57 = vld [vmem:[#allocation3 + $0x121] ss:$2 sm:$0xff] }
 0x218   : > { %v2520_v39 = vsel %vm2449_vm1, %v2417_v15, %v2488_v23  ;;  %vm2454_vm3 = vcmp.ge.f32.partialorder %v2422_v8, 0.0  ;;  %v2493_v41 = vmul.f32 %v4750_v59, %v2422_v8  ;;  %v2420_v60 = vadd.f32 %v2377_v43, %v2173_v48  ;;  %v2175_v12 = vpop.f32.mrf.mxu0  ;;  %v2661_v16 = vld [vmem:[#allocation3 + $0x109] ss:$2 sm:$0xff]  ;;  %v2695_v50 = vld [vmem:[#allocation3 + $0x10a] ss:$2 sm:$0xff] }
 0x219   : > { %2598 = vst.msk [vmem:[#allocation3 + $0x141] sm:$0xff] %vm1744_vm14, %v2520_v39  ;;  %v2176_v46 = vadd.f32 %v2175_v12, %v4745_v32  ;;  %v3649_v55 = vpop.f32.mrf.mxu1  ;;  %v3726_v44 = vpack.i.bf16 %v2661_v16, %v2657_v53  ;;  %v3731_v32 = vpack.i.bf16 %v2695_v50, %v2691_v29  ;;  %v2681_v15 = vld [vmem:[#allocation3 + $0x62] ss:$2 sm:$0xff] }
 0x21a   : > { %v2525_v7 = vsel %vm2454_vm3, %v2422_v8, %v2493_v41  ;;  %vm2452_vm4 = vcmp.ge.f32.partialorder %v2420_v60, 0.0  ;;  %v2491_v14 = vmul.f32 %v4750_v59, %v2420_v60  ;;  %v2423_v18 = vadd.f32 %v3649_v55, %v2184_v33  ;;  %v2697_v8 = vld [vmem:[#allocation3 + $0x122] ss:$2 sm:$0xff] }
 0x21b   : > { %2603 = vst.msk [vmem:[#allocation3 + $0x181] sm:$0xff] %vm1744_vm14, %v2525_v7  ;;  %v2380_v38 = vpop.f32.mrf.mxu1  ;;  %3727 = vrot.lane.b32.xlu0 %v3726_v44, %s3849_s19  ;;  %v3761_v24 = vpack.i.bf16 %v2685_v3, %v2681_v15  ;;  %v2611_v12 = vld [vmem:[#allocation3 + $0x48] ss:$2 sm:$0xff]  ;;  %v2607_v53 = vld [vmem:[#allocation3 + $0x18] ss:$2 sm:$0xff] }
 0x21c   : > { %v2523_v27 = vsel %vm2452_vm4, %v2420_v60, %v2491_v14  ;;  %vm2455_vm5 = vcmp.ge.f32.partialorder %v2423_v18, 0.0  ;;  %v2494_v17 = vmul.f32 %v4750_v59, %v2423_v18  ;;  %v2421_v0 = vadd.f32 %v2380_v38, %v2176_v46  ;;  %v2615_v29 = vld [vmem:[#allocation3 + $0x78] ss:$2 sm:$0xff] }
 0x21d   : > { %2601 = vst.msk [vmem:[#allocation3 + $0x169] sm:$0xff] %vm1744_vm14, %v2523_v27 }
 0x21e   : > { %v2526_v47 = vsel %vm2455_vm5, %v2423_v18, %v2494_v17  ;;  %vm2453_vm6 = vcmp.ge.f32.partialorder %v2421_v0, 0.0  ;;  %v2492_v20 = vmul.f32 %v4750_v59, %v2421_v0  ;;  %v3756_v59 = vpack.i.bf16 %v2677_v45, %v2673_v58  ;;  %v2667_v48 = vld [vmem:[#allocation3 + $0x151] ss:$2 sm:$0xff]  ;;  %v2701_v23 = vld [vmem:[#allocation3 + $0x152] ss:$2 sm:$0xff]  ;;  %v3828_v45 = vld [vmem:[%s4979_s5] sm:$0xff]  }
 0x21f   : > { %2604 = vst.msk [vmem:[#allocation3 + $0x189] sm:$0xff] %vm1744_vm14, %v2526_v47  ;;  %3732 = vrot.lane.b32.xlu0 %v3731_v32, %s3852_s18  ;;  %v3771_v2 = vpack.i.bf16 %v2667_v48, %v2663_v57  ;;  %v3781_v40 = vpack.i.bf16 %v2701_v23, %v2697_v8  ;;  %v2995_v58 = vsel %vm2904_vm2, %v4856_v31, 0  ;;  %v2609_v8 = vld [vmem:[#allocation3 + $0x30] ss:$2 sm:$0xff] }
 0x220   : > { %v2524_v37 = vsel %vm2453_vm6, %v2421_v0, %v2492_v20  ;;  %v2665_v19 = vld [vmem:[#allocation3 + $0x139] ss:$2 sm:$0xff]  ;;  %v2699_v21 = vld [vmem:[#allocation3 + $0x13a] ss:$2 sm:$0xff] }
 0x221   : > { %2602 = vst.msk [vmem:[#allocation3 + $0x171] sm:$0xff] %vm1744_vm14, %v2524_v37  ;;  %v2619_v0 = vld [vmem:[#allocation3 + $0xa8] ss:$2 sm:$0xff] }
 0x223   : > { %3737 = vrot.lane.b32.xlu0 %v3736_v4, %s3849_s19 }
 0x226   : > { %v2671_v61 = vld [vmem:[#allocation3 + $0x181] ss:$2 sm:$0xff]  ;;  %v2705_v33 = vld [vmem:[#allocation3 + $0x182] ss:$2 sm:$0xff] }
 0x227   : > { %3757 = vrot.lane.b32.xlu0 %v3756_v59, %s3852_s18  ;;  %v4890_v59 = vld [vmem:[%s4979_s5 + $0x20] ss:$0 sps:$4 sm:$0xff]  }
 0x228   : > { %v2669_v34 = vld [vmem:[#allocation3 + $0x169] ss:$2 sm:$0xff]  ;;  %v2703_v9 = vld [vmem:[#allocation3 + $0x16a] ss:$2 sm:$0xff] }
 0x229   : > { %v3741_v26 = vpack.i.bf16 %v2669_v34, %v2665_v19  ;;  %v3746_v35 = vpack.i.bf16 %v2703_v9, %v2699_v21 }
 0x22b   : > { %3742 = vrot.lane.b32.xlu1 %v3741_v26, %s3849_s19  ;;  %3767 = vrot.lane.b32.xlu0 %v3766_v54, %s3849_s19  ;;  %v2627_v26 = vld [vmem:[#allocation3 + $0x108] ss:$2 sm:$0xff] }
 0x22f   : > { %3747 = vrot.lane.b32.xlu1 %v3746_v35, %s3852_s18  ;;  %3777 = vrot.lane.b32.xlu0 %v3776_v36, %s3852_s18 }
 0x233   : > { %3752 = vrot.lane.b32.xlu1 %v3751_v11, %s3849_s19  ;;  %3063 = vrot.lane.b32.xlu0 %v2671_v61, %s3849_s19 }
 0x237   : > { %3762 = vrot.lane.b32.xlu1 %v3761_v24, %s3852_s18  ;;  %v2605_v24 = vld [vmem:[#allocation3] ss:$2 sm:$0xff] }
 0x23b   : > { %3772 = vrot.lane.b32.xlu1 %v3771_v2, %s3849_s19 }
 0x23f   : > { %3782 = vrot.lane.b32.xlu1 %v3781_v40, %s3852_s18 }
 0x243   : > { %3067 = vrot.lane.b32.xlu1 %v2705_v33, %s3852_s18 }
 0x26d   : > { %v3708_v43 = vpop.permute.xlu0 %3707 }
 0x26e   : > { %v3710_v39 = vunpack.i.h.bf16 %v3708_v43  ;;  %v3709_v41 = vunpack.i.l.bf16 %v3708_v43 }
 0x270   : > { %v2859_v55 = vsel %vm1744_vm14, %v2611_v12, %v3710_v39  ;;  %v2858_v44 = vsel %vm1744_vm14, %v2607_v53, %v3709_v41  ;;  %v2631_v39 = vld [vmem:[#allocation3 + $0x138] ss:$2 sm:$0xff]  ;;  %v2635_v41 = vld [vmem:[#allocation3 + $0x168] ss:$2 sm:$0xff] }
 0x271   : > { %v3713_v60 = vpop.permute.xlu0 %3712 }
 0x272   : > { %v3715_v16 = vunpack.i.h.bf16 %v3713_v60  ;;  %v3714_v46 = vunpack.i.l.bf16 %v3713_v60 }
 0x274   : > { %v2866_v7 = vsel %vm2778_vm7, %v2858_v44, %v3714_v46  ;;  %v2867_v14 = vsel %vm2778_vm7, %v2859_v55, %v3715_v16 }
 0x275   : > { %v2874_v18 = vpack.c.bf16 %v2867_v14, %v2866_v7 }
 0x277   : > { %3654 = vmatprep.mubr.msk.bf16.mxu0 %vm2891_vm8, %v2874_v18 }
 0x27d   : > { %v3718_v50 = vpop.permute.xlu1 %3717 }
 0x27e   : > { %v3720_v38 = vunpack.i.h.bf16 %v3718_v50  ;;  %v3719_v27 = vunpack.i.l.bf16 %v3718_v50 }
 0x280   : > { %v2861_v20 = vsel %vm1744_vm14, %v2619_v0, %v3720_v38  ;;  %v2860_v30 = vsel %vm1744_vm14, %v2615_v29, %v3719_v27 }
 0x281   : > { %v3723_v17 = vpop.permute.xlu1 %3722 }
 0x282   : > { %v3725_v32 = vunpack.i.h.bf16 %v3723_v17  ;;  %v3724_v47 = vunpack.i.l.bf16 %v3723_v17 }
 0x284   : > { %v2868_v25 = vsel %vm2778_vm7, %v2860_v30, %v3724_v47  ;;  %v2869_v37 = vsel %vm2778_vm7, %v2861_v20, %v3725_v32  ;;  %v2621_v20 = vld [vmem:[#allocation3 + $0xc0] ss:$2 sm:$0xff]  ;;  %v2625_v30 = vld [vmem:[#allocation3 + $0xf0] ss:$2 sm:$0xff] }
 0x285   : > { %v2875_v4 = vpack.c.bf16 %v2869_v37, %v2868_v25 }
 0x287   : > { %3655 = vmatmul.mubr.msk.bf16.vlgmr.msra.gmra.mxu0 %vm2891_vm8, %v2875_v4 }
 0x288   : > { %3663 = vmatpush3.bf16.msra.mxu0 %v2995_v58  ;;  %v2613_v58 = vld [vmem:[#allocation3 + $0x60] ss:$2 sm:$0xff] }
 0x289   : > { %3664 = vmatprep.subr.bf16.mxu0 %v3828_v45 }
 0x28c   : > { %3665 = vmatpush3.bf16.msra.mxu0 %v3828_v45  ;;  %v2617_v45 = vld [vmem:[#allocation3 + $0x90] ss:$2 sm:$0xff] }
 0x28d   : > { %v3728_v56 = vpop.permute.xlu0 %3727  ;;  %3692 = vmatprep.subr.msk.bf16.mxu0 %vm2904_vm2, %v4890_v59 }
 0x28e   : > { %v3730_v19 = vunpack.i.h.bf16 %v3728_v56  ;;  %v3729_v31 = vunpack.i.l.bf16 %v3728_v56 }
 0x290   : > { %v2863_v52 = vsel %vm1744_vm14, %v2627_v26, %v3730_v19  ;;  %v2862_v21 = vsel %vm1744_vm14, %v2623_v10, %v3729_v31 }
 0x291   : > { %v3733_v34 = vpop.permute.xlu0 %3732 }
 0x292   : > { %v3735_v54 = vunpack.i.h.bf16 %v3733_v34  ;;  %v3734_v9 = vunpack.i.l.bf16 %v3733_v34 }
 0x294   : > { %v2870_v6 = vsel %vm2778_vm7, %v2862_v21, %v3734_v9  ;;  %v2871_v35 = vsel %vm2778_vm7, %v2863_v52, %v3735_v54 }
 0x295   : > { %v2876_v36 = vpack.c.bf16 %v2871_v35, %v2870_v6  ;;  %v3738_v1 = vpop.permute.xlu0 %3737  ;;  %v3102_v6 = vsel %vm2904_vm2, %v4890_v59, 0  ;;  %v3830_v35 = vld [vmem:[%s4979_s5 + $0x18] sm:$0xff]  }
 0x296   : > { %v3740_v61 = vunpack.i.h.bf16 %v3738_v1  ;;  %v3739_v3 = vunpack.i.l.bf16 %v3738_v1 }
 0x297   : > { %3658 = vmatprep.mubr.msk.bf16.mxu0 %vm2891_vm8, %v2876_v36 }
 0x298   : > { %v2771_v33 = vsel %vm1744_vm14, %v2609_v8, %v3740_v61  ;;  %v2770_v43 = vsel %vm1744_vm14, %v2605_v24, %v3739_v3  ;;  %v2629_v61 = vld [vmem:[#allocation3 + $0x120] ss:$2 sm:$0xff]  ;;  %v2633_v24 = vld [vmem:[#allocation3 + $0x150] ss:$2 sm:$0xff] }
 0x299   : > { %v3758_v22 = vpop.permute.xlu0 %3757 }
 0x29a   : > { %v3760_v48 = vunpack.i.h.bf16 %v3758_v22  ;;  %v3759_v57 = vunpack.i.l.bf16 %v3758_v22 }
 0x29c   : > { %v2779_v53 = vsel %vm2778_vm7, %v2770_v43, %v3759_v57  ;;  %v2780_v16 = vsel %vm2778_vm7, %v2771_v33, %v3760_v48 }
 0x29d   : > { %v3743_v11 = vpop.permute.xlu1 %3742  ;;  %v3768_v15 = vpop.permute.xlu0 %3767  ;;  %v2787_v38 = vpack.c.bf16 %v2780_v16, %v2779_v53 }
 0x29e   : > { %v3745_v2 = vunpack.i.h.bf16 %v3743_v11  ;;  %v3744_v23 = vunpack.i.l.bf16 %v3743_v11  ;;  %v3770_v27 = vunpack.i.h.bf16 %v3768_v15  ;;  %v3769_v17 = vunpack.i.l.bf16 %v3768_v15 }
 0x2a0   : > { %v2865_v46 = vsel %vm1744_vm14, %v2635_v41, %v3745_v2  ;;  %v2864_v55 = vsel %vm1744_vm14, %v2631_v39, %v3744_v23  ;;  %v2775_v37 = vsel %vm1744_vm14, %v2625_v30, %v3770_v27  ;;  %v2774_v4 = vsel %vm1744_vm14, %v2621_v20, %v3769_v17  ;;  %v2637_v41 = vld [vmem:[#allocation3 + $0x180] ss:$2 sm:$0xff] }
 0x2a1   : > { %v3748_v40 = vpop.permute.xlu1 %3747  ;;  %v3778_v14 = vpop.permute.xlu0 %3777 }
 0x2a2   : > { %v3750_v60 = vunpack.i.h.bf16 %v3748_v40  ;;  %v3749_v12 = vunpack.i.l.bf16 %v3748_v40  ;;  %v3780_v0 = vunpack.i.h.bf16 %v3778_v14  ;;  %v3779_v29 = vunpack.i.l.bf16 %v3778_v14 }
 0x2a4   : > { %v2872_v44 = vsel %vm2778_vm7, %v2864_v55, %v3749_v12  ;;  %v2873_v7 = vsel %vm2778_vm7, %v2865_v46, %v3750_v60  ;;  %v2783_v31 = vsel %vm2778_vm7, %v2774_v4, %v3779_v29  ;;  %v2784_v34 = vsel %vm2778_vm7, %v2775_v37, %v3780_v0  ;;  %v3427_v4 = vld [vmem:[%s4980_s6] ss:$0 sm:$0xff] }
 0x2a5   : > { %v2877_v18 = vpack.c.bf16 %v2873_v7, %v2872_v44  ;;  %v3753_v50 = vpop.permute.xlu1 %3752  ;;  %v2789_v36 = vpack.c.bf16 %v2784_v34, %v2783_v31  ;;  %v3064_v33 = vpop.permute.xlu0 %3063 }
 0x2a6   : > { %v3755_v32 = vunpack.i.h.bf16 %v3753_v50  ;;  %v3754_v47 = vunpack.i.l.bf16 %v3753_v50  ;;  %v3070_v60 = vsel %vm1744_vm14, %v2637_v41, %v3064_v33 }
 0x2a7   : > { %3659 = vmatmul.mubr.msk.bf16.gmra.mxu0 %vm2891_vm8, %v2877_v18 }
 0x2a8   : > { %3666 = vmatprep.mubr.msk.bf16.mxu0 %vm2891_vm8, %v2787_v38  ;;  %v2773_v10 = vsel %vm1744_vm14, %v2617_v45, %v3755_v32  ;;  %v2772_v26 = vsel %vm1744_vm14, %v2613_v58, %v3754_v47 }
 0x2a9   : > { %v3763_v25 = vpop.permute.xlu1 %3762 }
 0x2aa   : > { %v3765_v56 = vunpack.i.h.bf16 %v3763_v25  ;;  %v3764_v19 = vunpack.i.l.bf16 %v3763_v25  ;;  %v3272_v25 = vld [vmem:[%s4982_s8] ss:$0 sm:$0xff] }
 0x2ac   : > { %v2781_v54 = vsel %vm2778_vm7, %v2772_v26, %v3764_v19  ;;  %v2782_v9 = vsel %vm2778_vm7, %v2773_v10, %v3765_v56  ;;  %v469_v19 = vadd.f32 %v4706_v13, %v3272_v25  ;;  %v461_v26 = vadd.f32 %v3272_v25, %v4710_v28 }
 0x2ad   : > { %v2788_v52 = vpack.c.bf16 %v2782_v9, %v2781_v54  ;;  %v3773_v21 = vpop.permute.xlu1 %3772  ;;  %v3072_v8 = vpack.c.bf16 %v2781_v54, %v2780_v16  ;;  %v3073_v40 = vpack.c.bf16 %v2783_v31, %v2782_v9 }
 0x2ae   : > { %v3775_v1 = vunpack.i.h.bf16 %v3773_v21  ;;  %v3774_v22 = vunpack.i.l.bf16 %v3773_v21 }
 0x2af   : > { %3667 = vmatmul.mubr.msk.bf16.vlgmr.msra.gmra.mxu0 %vm2891_vm8, %v2788_v52 }
 0x2b0   : > { %3675 = vmatpush3.bf16.msra.mxu0 %v3102_v6  ;;  %3670 = vmatprep.mubr.msk.bf16.mxu0 %vm2891_vm8, %v2789_v36  ;;  %v2776_v59 = vsel %vm1744_vm14, %v2629_v61, %v3774_v22  ;;  %v2777_v48 = vsel %vm1744_vm14, %v2633_v24, %v3775_v1 }
 0x2b1   : > { %v3783_v11 = vpop.permute.xlu1 %3782  ;;  %3676 = vmatprep.subr.bf16.mxu0 %v3830_v35 }
 0x2b2   : > { %v3785_v3 = vunpack.i.h.bf16 %v3783_v11  ;;  %v3784_v15 = vunpack.i.l.bf16 %v3783_v11  ;;  %v464_v11 = vadd.f32 %v3272_v25, %v4723_v62  ;;  %v477_v62 = vadd.f32 %v3272_v25, %v4731_v5 }
 0x2b4   : > { %v2785_v57 = vsel %vm2778_vm7, %v2776_v59, %v3784_v15  ;;  %v2786_v2 = vsel %vm2778_vm7, %v2777_v48, %v3785_v3  ;;  %3677 = vmatpush3.bf16.msra.mxu0 %v3830_v35  ;;  %v472_v35 = vadd.f32 %v4717_v49, %v3272_v25  ;;  %v485_v49 = vadd.f32 %v4727_v51, %v3272_v25 }
 0x2b5   : > { %v2790_v23 = vpack.c.bf16 %v2786_v2, %v2785_v57  ;;  %v3074_v43 = vpack.c.bf16 %v2785_v57, %v2784_v34  ;;  %v3068_v39 = vpop.permute.xlu1 %3067 }
 0x2b6   : > { %v3071_v12 = vsel %vm2778_vm7, %v3070_v60, %v3068_v39  ;;  %v488_v60 = vadd.f32 %v4735_v42, %v3272_v25 }
 0x2b7   : > { %3671 = vmatmul.mubr.msk.bf16.gmra.mxu0 %vm2891_vm8, %v2790_v23  ;;  %v3075_v53 = vpack.c.bf16 %v3071_v12, %v2786_v2 }
 0x2b8   : > { %3678 = vmatprep.mubr.msk.bf16.mxu0 %vm2891_vm8, %v3072_v8 }
 0x2bf   : > { %3679 = vmatmul.mubr.msk.bf16.vlgmr.msra.gmra.mxu0 %vm2891_vm8, %v3073_v40 }
 0x2c0   : > { %3682 = vmatprep.mubr.msk.bf16.mxu0 %vm2891_vm8, %v3074_v43 }
 0x2c7   : > { %3683 = vmatmul.mubr.msk.bf16.gmra.mxu0 %vm2891_vm8, %v3075_v53 }
 0x347   : > { %v3656_v16 = vpop.f32.mrf.mxu0 }
 0x349   : > { %v2942_v46 = vpop.f32.mrf.mxu0 }
 0x34b   : > { %v3657_v55 = vpop.f32.mrf.mxu0 }
 0x34d   : > { %v2945_v44 = vpop.f32.mrf.mxu0 }
 0x367   : > { %v3660_v7 = vpop.f32.mrf.mxu0 }
 0x369   : > { %v2958_v14 = vpop.f32.mrf.mxu0 }
 0x36b   : > { %v3661_v18 = vpop.f32.mrf.mxu0 }
 0x36d   : > { %v2961_v50 = vpop.f32.mrf.mxu0 }
 0x36f   : > { %v3668_v38 = vpop.f32.mrf.mxu0 }
 0x370   : > { %v3040_v30 = vadd.f32 %v3668_v38, %v3656_v16 }
 0x371   : > { %v3031_v27 = vpop.f32.mrf.mxu0 }
 0x372   : > { %v3032_v58 = vadd.f32 %v3031_v27, %v2942_v46  ;;  %v480_v46 = vadd.f32 %v3272_v25, %v4741_v63 }
 0x373   : > { %v3669_v17 = vpop.f32.mrf.mxu0 }
 0x374   : > { %v3043_v31 = vadd.f32 %v3669_v17, %v3657_v55 }
 0x375   : > { %v3034_v0 = vpop.f32.mrf.mxu0 }
 0x376   : > { %v3035_v9 = vadd.f32 %v3034_v0, %v2945_v44 }
 0x377   : > { %v3672_v29 = vpop.f32.mrf.mxu0 }
 0x378   : > { %v3056_v36 = vadd.f32 %v3672_v29, %v3660_v7 }
 0x379   : > { %v3047_v32 = vpop.f32.mrf.mxu0 }
 0x37a   : > { %v3048_v3 = vadd.f32 %v3047_v32, %v2958_v14 }
 0x37b   : > { %v3673_v47 = vpop.f32.mrf.mxu0 }
 0x37c   : > { %v3059_v57 = vadd.f32 %v3673_v47, %v3661_v18 }
 0x37d   : > { %v3050_v20 = vpop.f32.mrf.mxu0 }
 0x37e   : > { %v3051_v33 = vadd.f32 %v3050_v20, %v2961_v50 }
 0x37f   : > { %v3680_v37 = vpop.f32.mrf.mxu0 }
 0x380   : > { %v3171_v45 = vadd.f32 %v3680_v37, %v3040_v30 }
 0x381   : > { %v3138_v56 = vpop.f32.mrf.mxu0 }
 0x382   : > { %v3186_v34 = vadd.f32 %v3427_v4, %v3171_v45  ;;  %v3169_v10 = vadd.f32 %v3138_v56, %v3032_v58 }
 0x383   : > { %v3681_v54 = vpop.f32.mrf.mxu0 }
 0x384   : > { %v3194_v52 = vadd.f32 %v3186_v34, %v469_v19  ;;  %v3184_v21 = vadd.f32 %v3427_v4, %v3169_v10  ;;  %v3172_v6 = vadd.f32 %v3681_v54, %v3043_v31 }
 0x385   : > { %v3141_v13 = vpop.f32.mrf.mxu0 }
 0x386   : > { %3202 = vst.msk [vmem:[%s4947_s17 + $0x10] sm:$0xff] %vm1744_vm14, %v3194_v52  ;;  %v3192_v28 = vadd.f32 %v3184_v21, %v461_v26  ;;  %v3187_v1 = vadd.f32 %v3427_v4, %v3172_v6  ;;  %v3170_v22 = vadd.f32 %v3141_v13, %v3035_v9 }
 0x387   : > { %v3684_v61 = vpop.f32.mrf.mxu0 }
 0x388   : > { %3200 = vst.msk [vmem:[%s4947_s17] sm:$0xff] %vm1744_vm14, %v3192_v28  ;;  %v3195_v15 = vadd.f32 %v3187_v1, %v472_v35  ;;  %v3185_v24 = vadd.f32 %v3427_v4, %v3170_v22  ;;  %v3175_v59 = vadd.f32 %v3684_v61, %v3056_v36 }
 0x389   : > { %v3154_v48 = vpop.f32.mrf.mxu0 }
 0x38a   : > { %3203 = vst.msk [vmem:[%s4947_s17 + $0x18] sm:$0xff] %vm1744_vm14, %v3195_v15  ;;  %v3193_v2 = vadd.f32 %v3185_v24, %v464_v11  ;;  %v3190_v23 = vadd.f32 %v3427_v4, %v3175_v59  ;;  %v3173_v8 = vadd.f32 %v3154_v48, %v3048_v3 }
 0x38b   : > { %v3685_v40 = vpop.f32.mrf.mxu0 }
 0x38c   : > { %3201 = vst.msk [vmem:[%s4947_s17 + $0x8] sm:$0xff] %vm1744_vm14, %v3193_v2  ;;  %v3198_v43 = vadd.f32 %v3190_v23, %v485_v49  ;;  %v3188_v39 = vadd.f32 %v3427_v4, %v3173_v8  ;;  %v3176_v51 = vadd.f32 %v3685_v40, %v3059_v57 }
 0x38d   : > { %v3157_v41 = vpop.f32.mrf.mxu0 }
 0x38e   : > { %3206 = vst.msk [vmem:[%s4947_s17 + $0x30] sm:$0xff] %vm1744_vm14, %v3198_v43  ;;  %v3196_v12 = vadd.f32 %v3188_v39, %v477_v62  ;;  %v3191_v53 = vadd.f32 %v3427_v4, %v3176_v51  ;;  %v3174_v16 = vadd.f32 %v3157_v41, %v3051_v33 }
 0x390   : > { %3204 = vst.msk [vmem:[%s4947_s17 + $0x20] sm:$0xff] %vm1744_vm14, %v3196_v12  ;;  %v3199_v5 = vadd.f32 %v3191_v53, %v488_v60  ;;  %v3189_v55 = vadd.f32 %v3427_v4, %v3174_v16 }
 0x392   : > { %3207 = vst.msk [vmem:[%s4947_s17 + $0x38] sm:$0xff] %vm1744_vm14, %v3199_v5  ;;  %v3197_v44 = vadd.f32 %v3189_v55, %v480_v46 }
 0x394   : > { %3205 = vst.msk [vmem:[%s4947_s17 + $0x28] sm:$0xff] %vm1744_vm14, %v3197_v44 }
 0x395 PF: > { %s19_s30 = sadd.s32 1, %s3846_s30  }
 0x396   : > { %p16_p4 = scmp.ge.s32.totalorder %s19_s30, 4  }
 0x398   :  { %18 = sbr.rel (!%p16_p4) target bundleno = 1 (0x1), region = 151 }

// kernel: tpu_custom_call.1
= control target key start
LH: loop header
LB: loop body
LE: loop exit
PB: predicated region body
PF: predicated region fallthrough
CT: control target
= control target key end

     0   :  { %s3903_s30 = smov 0   ;;  %s4974_s0 = inlined_call_operand.vmem [shape: f32[2,16,16,4], index: 0, kind: input, shape index: {}]   ;;  %s4975_s1 = inlined_call_operand.vmem [shape: f32[1,4], index: 1, kind: input, shape index: {}]   ;;  %s4976_s2 = inlined_call_operand.vmem [shape: f32[1,4], index: 2, kind: input, shape index: {}]   ;;  %s4977_s3 = inlined_call_operand.vmem [shape: bf16[3,12,8], index: 3, kind: input, shape index: {}]   ;;  %s4978_s4 = inlined_call_operand.vmem [shape: f32[1,8], index: 4, kind: input, shape index: {}]   ;;  %s4979_s5 = inlined_call_operand.vmem [shape: bf16[3,24,8], index: 5, kind: input, shape index: {}]   ;;  %s4980_s6 = inlined_call_operand.vmem [shape: f32[1,8], index: 6, kind: input, shape index: {}]   ;;  %s4981_s7 = inlined_call_operand.vmem [shape: bf16[4,8], index: 7, kind: input, shape index: {}]   ;;  %s4982_s8 = inlined_call_operand.vmem [shape: f32[1,8], index: 8, kind: input, shape index: {}]   ;;  %s4983_s9 = inlined_call_operand.vmem [shape: f32[2,64,8], index: 9, kind: output, shape index: {}]  }
   0x1 LB: > { %s3263_s10 = sadd.s32 4294967295, %s3846_s30   ;;  %p3267_p0 = scmp.ge.s32.totalorder %s3846_s30, 1  ;;  %s3846_s30 = sphi %s3903_s30, %s19_s30  }
   0x2   : > { %p287_p1 = scmp.lt.s32.totalorder %s3846_s30, 3 }
   0x4   : > { %p288_p2 = pnand %p3267_p0, %p287_p1 }
   0x5   : > { %p323_p3 = scmp.lt.s32.totalorder (!%p288_p2), %s3263_s10, 1  ;;  %s3849_s19 = smov (!%p288_p2), 8  }
   0x6   : > { %291 = sbr.rel (%p288_p2) target bundleno = 917 (0x395), region = 56  ;;  %s3850_s20 = smov (!%p288_p2), 4  }
   0xb   : > { %vm569_vm0 = vcmask 27648   ;;  %vm572_vm1 = vcmask 24576   ;;  %vm579_vm2 = vsmask.f32 256  ;;  %v584_v0 = vld [vmem:[#allocation2 + $0xc] sm:$0x1] }
   0xc   : > { %s4993_s10 = smov (!%p323_p3, %s3263_s10), 1  ;;  %vm3915_vm3 = vmand %vm572_vm1, %vm579_vm2  ;;  %vm635_vm4 = vsmask.f32 7938  ;;  %v640_v2 = vld [vmem:[#allocation2 + $0x14] sm:$0x1]  ;;  %v3848_v6 = vmov 0  }
   0xd   : > { %v3922_v3 = vld [vmem:[%s4975_s1] ss:$0 sm:$0xff]  ;;  %v585_v4 = vsel %vm3915_vm3, 0, %v584_v0  ;;  %vm3928_vm5 = vmand %vm572_vm1, %vm635_vm4  ;;  %570 = vst.msk [vmem:[#allocation2] sm:$0xf] %vm569_vm0, %v3848_v6  ;;  %s3430_s13 = sshll.u32 %s4993_s10, 8 }
   0xe   : > { %571 = vst.msk [vmem:[#allocation2 + $0x4] sm:$0xf] %vm569_vm0, %v3848_v6  ;;  %575 = vst.msk [vmem:[#allocation2 + $0xcc] sm:$0xf] %vm569_vm0, %v3848_v6  ;;  %v3942_v7 = vld [vmem:[%s4976_s2] ss:$0 sm:$0xff]  ;;  %s3949_s18 = scalar_lea.vmem %s4974_s0, %s3430_s13 }
   0xf   : > { %573 = vst.msk [vmem:[#allocation2 + $0x8] sm:$0x1] %vm572_vm1, %v3848_v6  ;;  %577 = vst.msk [vmem:[#allocation2 + $0xd4] sm:$0x1] %vm572_vm1, %v3848_v6  ;;  %v641_v8 = vsel %vm3928_vm5, 0, %v640_v2  ;;  %v3954_v13 = vld [vmem:[%s3949_s18] sm:$0xff] }
  0x10   : > { %576 = vst.msk [vmem:[#allocation2 + $0xd0] sm:$0xf] %vm569_vm0, %v3848_v6  ;;  %586 = vst [vmem:[#allocation2 + $0xc] sm:$0x1] %v585_v4  ;;  %v587_v9 = vld [vmem:[#allocation2 + $0x18] sm:$0x1]  ;;  %v498_v18 = vmul.f32 %v3922_v3, %v3954_v13 }
  0x11   : > { %642 = vst [vmem:[#allocation2 + $0x14] sm:$0x1] %v641_v8  ;;  %v588_v10 = vsel %vm3915_vm3, 0, %v587_v9  ;;  %v643_v11 = vld [vmem:[#allocation2 + $0x20] sm:$0x1]  ;;  %v3957_v14 = vld [vmem:[%s3949_s18 + $0x8] sm:$0xff]  ;;  %vm4002_vm8 = vmand %vm569_vm0, %vm635_vm4 }
  0x12   : > { %v593_v12 = vld [vmem:[#allocation2 + $0x30] sm:$0x1]  ;;  %589 = vst [vmem:[#allocation2 + $0x18] sm:$0x1] %v588_v10  ;;  %v644_v16 = vsel %vm3928_vm5, 0, %v643_v11  ;;  %v499_v19 = vmul.f32 %v3922_v3, %v3957_v14  ;;  %v337_v20 = vld [vmem:[%s3949_s18 + $0x18] sm:$0xff]  ;;  %v537_v30 = vadd.f32 %v3942_v7, %v498_v18 }
  0x13   : > { %v336_v15 = vld [vmem:[%s3949_s18 + $0x10] sm:$0xff]  ;;  %v594_v17 = vsel %vm3915_vm3, 0, %v593_v12  ;;  %645 = vst [vmem:[#allocation2 + $0x20] sm:$0x1] %v644_v16  ;;  %v341_v23 = vld [vmem:[%s3949_s18 + $0x38] sm:$0xff]  ;;  %v501_v24 = vmul.f32 %v3922_v3, %v337_v20  ;;  %v3976_v28 = vld [vmem:[%s3949_s18 + $0x20] sm:$0xff] }
  0x14   : > { %v500_v21 = vmul.f32 %v3922_v3, %v336_v15  ;;  %v340_v22 = vld [vmem:[%s3949_s18 + $0x30] sm:$0xff]  ;;  %595 = vst [vmem:[#allocation2 + $0x30] sm:$0x1] %v594_v17  ;;  %vm787_vm6 = vsmask.f32 4368  ;;  %v505_v26 = vmul.f32 %v3922_v3, %v341_v23  ;;  %v3979_v29 = vld [vmem:[%s3949_s18 + $0x28] sm:$0xff]  ;;  %v538_v31 = vadd.f32 %v3942_v7, %v499_v19 }
  0x15   : > { %v504_v25 = vmul.f32 %v3922_v3, %v340_v22  ;;  %v649_v27 = vld [vmem:[#allocation2 + $0x38] sm:$0x1]  ;;  %v540_v34 = vadd.f32 %v3942_v7, %v501_v24  ;;  %v502_v37 = vmul.f32 %v3922_v3, %v3976_v28  ;;  %v3432_v38 = vpack.c.bf16 %v537_v30, %v537_v30  ;;  %vm3996_vm7 = vmor %vm579_vm2, %vm787_vm6  ;;  %v590_v18 = vld [vmem:[#allocation2 + $0x24] sm:$0x1]  ;;  %s3431_s14 = sshll.u32 %s4993_s10, 6 }
  0x16   : > { %v539_v32 = vadd.f32 %v3942_v7, %v500_v21  ;;  %v650_v33 = vsel %vm3928_vm5, 0, %v649_v27  ;;  %v544_v36 = vadd.f32 %v3942_v7, %v505_v26  ;;  %v3433_v39 = vpack.c.bf16 %v538_v31, %v538_v31  ;;  %v646_v23 = vld [vmem:[#allocation2 + $0x2c] sm:$0x1]  ;;  %v344_v31 = vld [vmem:[%s3949_s18 + $0x50] sm:$0xff]  ;;  %v3824_v60 = vld [vmem:[%s4977_s3] sm:$0x3f]   ;;  %s4947_s17 = scalar_lea.vmem %s4983_s9, %s3431_s14 }
  0x17   : > { %v543_v35 = vadd.f32 %v3942_v7, %v504_v25  ;;  %651 = vst [vmem:[#allocation2 + $0x38] sm:$0x1] %v650_v33  ;;  %v503_v41 = vmul.f32 %v3922_v3, %v3979_v29  ;;  %v3435_v42 = vpack.c.bf16 %v540_v34, %v540_v34  ;;  %v541_v45 = vadd.f32 %v3942_v7, %v502_v37  ;;  %v1112_v57 = vld [vmem:[#allocation2 + $0xc] sm:$0xf] }
  0x18   : > { %v3434_v40 = vpack.c.bf16 %v539_v32, %v539_v32  ;;  %v3439_v44 = vpack.c.bf16 %v544_v36, %v544_v36  ;;  %v790_v46 = vshrl.u32 %v3432_v38, 16  ;;  %v793_v47 = vshll.u32 %v3432_v38, 16  ;;  %v1116_v61 = vld [vmem:[#allocation2 + $0x14] sm:$0x1]  ;;  %v345_v32 = vld [vmem:[%s3949_s18 + $0x58] sm:$0xff] }
  0x19   : > { %v3438_v43 = vpack.c.bf16 %v543_v35, %v543_v35  ;;  %v798_v48 = vshrl.u32 %v3433_v39, 16  ;;  %v801_v49 = vshll.u32 %v3433_v39, 16  ;;  %v815_v52 = vshrl.u32 %v3435_v42, 16  ;;  %v1119_v10 = vld [vmem:[#allocation2 + $0x18] sm:$0xf] }
  0x1a   : > { %v807_v50 = vshrl.u32 %v3434_v40, 16  ;;  %v810_v51 = vshll.u32 %v3434_v40, 16  ;;  %v818_v53 = vshll.u32 %v3435_v42, 16  ;;  %v792_v55 = vrot.slane %v790_v46, 7  ;;  %v1123_v11 = vld [vmem:[#allocation2 + $0x20] sm:$0x1] }
  0x1b   : > { %v800_v56 = vrot.slane %v798_v48, 7  ;;  %v841_v58 = vshrl.u32 %v3438_v43, 16  ;;  %v844_v59 = vshll.u32 %v3438_v43, 16  ;;  %v817_v63 = vrot.slane %v815_v52, 7  ;;  %v1133_v30 = vld [vmem:[#allocation2 + $0x30] sm:$0xf] }
  0x1c   : > { %v809_v62 = vrot.slane %v807_v50, 7  ;;  %v849_v0 = vshrl.u32 %v3439_v44, 16  ;;  %v852_v2 = vshll.u32 %v3439_v44, 16  ;;  %v795_v4 = vor.u32 %v793_v47, %v792_v55  ;;  %v599_v47 = vld [vmem:[#allocation2 + $0x48] sm:$0x1] }
  0x1d   : > { %v796_v6 = vrot.slane %v792_v55, 4  ;;  %v803_v8 = vor.u32 %v801_v49, %v800_v56  ;;  %v805_v9 = vrot.slane %v800_v56, 4  ;;  %v820_v16 = vor.u32 %v818_v53, %v817_v63  ;;  %v655_v48 = vld [vmem:[#allocation2 + $0x50] sm:$0x1]  ;;  %v4034_v49 = vld [vmem:[%s3949_s18 + $0x40] sm:$0xff]  ;;  %v4041_v53 = vld [vmem:[%s3949_s18 + $0x48] sm:$0xff] }
  0x1e   : > { %v812_v12 = vor.u32 %v810_v51, %v809_v62  ;;  %v813_v15 = vrot.slane %v809_v62, 4  ;;  %v822_v17 = vrot.slane %v817_v63, 4  ;;  %v1113_v20 = vsel %vm4002_vm8, %v795_v4, %v1112_v57  ;;  %v1137_v35 = vld [vmem:[#allocation2 + $0x38] sm:$0x1]  ;;  %v348_v55 = vld [vmem:[%s3949_s18 + $0x70] sm:$0xff]  ;;  %v4051_v62 = vld [vmem:[%s3949_s18 + $0x60] sm:$0xff] }
  0x1f   : > { %v804_v19 = vsel %vm3996_vm7, %v796_v6, %v803_v8  ;;  %v1117_v21 = vsel %vm3915_vm3, %v805_v9, %v1116_v61  ;;  %v843_v22 = vrot.slane %v841_v58, 7  ;;  %1114 = vst [vmem:[#allocation2 + $0xc] sm:$0xf] %v1113_v20  ;;  %v851_v27 = vrot.slane %v849_v0, 7  ;;  %v349_v61 = vld [vmem:[%s3949_s18 + $0x78] sm:$0xff]  ;;  %v4062_v6 = vld [vmem:[%s3949_s18 + $0x68] sm:$0xff] }
  0x20   : > { %1115 = vst.msk [vmem:[#allocation2 + $0x10] sm:$0xf] %vm569_vm0, %v804_v19  ;;  %1118 = vst [vmem:[#allocation2 + $0x14] sm:$0x1] %v1117_v21  ;;  %v821_v24 = vsel %vm3996_vm7, %v813_v15, %v820_v16  ;;  %v1120_v25 = vsel %vm4002_vm8, %v812_v12, %v1119_v10  ;;  %v1124_v26 = vsel %vm3915_vm3, %v822_v17, %v1123_v11  ;;  %vm1631_vm9 = vcmask 1046528  }
  0x21   : > { %1121 = vst [vmem:[#allocation2 + $0x18] sm:$0xf] %v1120_v25  ;;  %1122 = vst.msk [vmem:[#allocation2 + $0x1c] sm:$0xf] %vm569_vm0, %v821_v24  ;;  %v846_v33 = vor.u32 %v844_v59, %v843_v22  ;;  %v847_v34 = vrot.slane %v843_v22, 4  ;;  %v542_v36 = vadd.f32 %v3942_v7, %v503_v41  ;;  %v591_v37 = vsel %vm3915_vm3, 0, %v590_v18 }
  0x22   : > { %1125 = vst [vmem:[#allocation2 + $0x20] sm:$0x1] %v1124_v26  ;;  %v854_v38 = vor.u32 %v852_v2, %v851_v27  ;;  %v856_v39 = vrot.slane %v851_v27, 4  ;;  %592 = vst [vmem:[#allocation2 + $0x24] sm:$0x1] %v591_v37  ;;  %v647_v40 = vsel %vm3928_vm5, 0, %v646_v23  ;;  %v3436_v42 = vpack.c.bf16 %v541_v45, %v541_v45 }
  0x23   : > { %v1134_v43 = vsel %vm4002_vm8, %v846_v33, %v1133_v30  ;;  %648 = vst [vmem:[#allocation2 + $0x2c] sm:$0x1] %v647_v40  ;;  %v4029_v44 = vpack.c.bf16 %v542_v36, %v542_v36  ;;  %v508_v41 = vmul.f32 %v3922_v3, %v344_v31  ;;  %v509_v46 = vmul.f32 %v3922_v3, %v345_v32 }
  0x24   : > { %v855_v50 = vsel %vm3996_vm7, %v847_v34, %v854_v38  ;;  %1135 = vst [vmem:[#allocation2 + $0x30] sm:$0xf] %v1134_v43  ;;  %v1138_v45 = vsel %vm3915_vm3, %v856_v39, %v1137_v35  ;;  %v824_v51 = vshrl.u32 %v3436_v42, 16  ;;  %v827_v52 = vshll.u32 %v3436_v42, 16 }
  0x25   : > { %vm1406_vm10 = vsmask.f32 7424  ;;  %1136 = vst.msk [vmem:[#allocation2 + $0x34] sm:$0xf] %vm569_vm0, %v855_v50  ;;  %1139 = vst [vmem:[#allocation2 + $0x38] sm:$0x1] %v1138_v45  ;;  %v547_v58 = vadd.f32 %v3942_v7, %v508_v41  ;;  %v548_v59 = vadd.f32 %v3942_v7, %v509_v46  ;;  %v506_v4 = vmul.f32 %v3922_v3, %v4034_v49 }
  0x26   : > { %v832_v56 = vshrl.u32 %v4029_v44, 16  ;;  %v835_v57 = vshll.u32 %v4029_v44, 16  ;;  %v4053_v63 = vrot.slane %v824_v51, 7  ;;  %v600_v0 = vsel %vm3915_vm3, 0, %v599_v47 }
  0x27   : > { %v656_v2 = vsel %vm3928_vm5, 0, %v655_v48  ;;  %601 = vst [vmem:[#allocation2 + $0x48] sm:$0x1] %v600_v0  ;;  %v4064_v8 = vpack.c.bf16 %v547_v58, %v547_v58  ;;  %v4066_v9 = vpack.c.bf16 %v548_v59, %v548_v59  ;;  %v507_v10 = vmul.f32 %v3922_v3, %v4041_v53  ;;  %v3786_v12 = vld [vmem:[#allocation2 + $0xc] sm:$0xff]  }
  0x28   : > { %657 = vst [vmem:[#allocation2 + $0x50] sm:$0x1] %v656_v2  ;;  %v512_v11 = vmul.f32 %v3922_v3, %v348_v55  ;;  %v3787_v15 = vld [vmem:[#allocation2 + $0x14] ss:$0 sps:$4 sm:$0x11]   ;;  %v829_v16 = vor.u32 %v827_v52, %v4053_v63  ;;  %v545_v17 = vadd.f32 %v3942_v7, %v506_v4  ;;  %v4074_v18 = vmul.f32 %v3922_v3, %v349_v61  ;;  %v3788_v20 = vld [vmem:[#allocation2 + $0x18] sm:$0xff]  }
  0x29   : > { %v4078_v19 = vmul.f32 %v3922_v3, %v4051_v62  ;;  %v830_v21 = vrot.slane %v4053_v63, 4  ;;  %v546_v22 = vadd.f32 %v3942_v7, %v507_v10  ;;  %v4087_v24 = vmul.f32 %v3922_v3, %v4062_v6  ;;  %v1126_v31 = vld [vmem:[#allocation2 + $0x24] sm:$0xf]  ;;  %v3789_v33 = vld [vmem:[#allocation2 + $0x20] ss:$0 sps:$4 sm:$0x11]  }
  0x2a   : > { %v4083_v23 = vadd.f32 %v3942_v7, %v512_v11  ;;  %v1635_v25 = vrot.slane %v3786_v12, 1  ;;  %v1636_v26 = vrot.slane %v3787_v15, 1  ;;  %v1420_v27 = vshrl.u32 %v3786_v12, 16  ;;  %v1130_v4 = vld [vmem:[#allocation2 + $0x2c] sm:$0x1] }
  0x2b   : > { %v1422_v30 = vshll.u32 %v3786_v12, 16  ;;  %v1427_v32 = vshll.u32 %v3787_v15, 16  ;;  %v1638_v34 = vrot.slane %v3788_v20, 1  ;;  %v1432_v35 = vshrl.u32 %v3788_v20, 16  ;;  %v596_v15 = vld [vmem:[#allocation2 + $0x3c] sm:$0x1] }
  0x2c   : > { %v1127_v36 = vsel %vm4002_vm8, %v829_v16, %v1126_v31  ;;  %v1637_v37 = vsel %vm1631_vm9, %v1635_v25, %v1636_v26  ;;  %v1434_v39 = vshll.u32 %v3788_v20, 16  ;;  %v4092_v40 = vpack.c.bf16 %v545_v17, %v545_v17  ;;  %v3790_v41 = vld [vmem:[#allocation2 + $0x30] sm:$0xff]   ;;  %v3791_v50 = vld [vmem:[#allocation2 + $0x38] ss:$0 sps:$4 sm:$0x11]  }
  0x2d   : > { %v1424_v38 = vrot.slane %v1422_v30, 1  ;;  %1128 = vst [vmem:[#allocation2 + $0x24] sm:$0xf] %v1127_v36  ;;  %1682 = vrot.lane.b32.xlu1 %v1637_v37, %s3849_s19  ;;  %v1429_v42 = vrot.slane %v1427_v32, 1  ;;  %v1639_v43 = vrot.slane %v3789_v33, 1  ;;  %v1439_v44 = vshll.u32 %v3789_v33, 16 }
  0x2e   : > { %v4095_v46 = vpack.c.bf16 %v546_v22, %v546_v22  ;;  %v1436_v48 = vrot.slane %v1434_v39, 1  ;;  %v834_v45 = vrot.slane %v832_v56, 7  ;;  %v875_v51 = vshrl.u32 %v4064_v8, 16  ;;  %v652_v25 = vld [vmem:[#allocation2 + $0x44] sm:$0x1] }
  0x2f   : > { %v1425_v47 = vor.u32 %v1424_v38, %v1420_v27  ;;  %v1640_v52 = vsel %vm1631_vm9, %v1638_v34, %v1639_v43  ;;  %v1441_v55 = vrot.slane %v1439_v44, 1  ;;  %v1456_v58 = vshrl.u32 %v3790_v41, 16  ;;  %v605_v31 = vld [vmem:[#allocation2 + $0x60] sm:$0x1]  ;;  %v661_v39 = vld [vmem:[#allocation2 + $0x68] sm:$0x1] }
  0x30   : > { %v1458_v59 = vshll.u32 %v3790_v41, 16  ;;  %v1437_v63 = vor.u32 %v1436_v48, %v1432_v35  ;;  %v1463_v0 = vshll.u32 %v3791_v50, 16  ;;  %v837_v2 = vor.u32 %v835_v57, %v834_v45 }
  0x31   : > { %v1430_v61 = vsel %vm1406_vm10, %v1425_v47, %v1429_v42  ;;  %1684 = vrot.lane.b32.xlu1 %v1640_v52, %s3849_s19  ;;  %v839_v56 = vrot.slane %v834_v45, 4  ;;  %v1644_v11 = vrot.slane %v3790_v41, 1  ;;  %v1645_v12 = vrot.slane %v3791_v50, 1  ;;  %v1151_v47 = vld [vmem:[#allocation2 + $0x50] sm:$0x1] }
  0x32   : > { %1601 = vrot.lane.b32.xlu0 %v1430_v61, %s3850_s20  ;;  %v1460_v10 = vrot.slane %v1458_v59, 1  ;;  %v1442_v16 = vsel %vm1406_vm10, %v1437_v63, %v1441_v55  ;;  %v1465_v17 = vrot.slane %v1463_v0, 1  ;;  %v838_v20 = vsel %vm3996_vm7, %v830_v21, %v837_v2  ;;  %v1147_v21 = vld [vmem:[#allocation2 + $0x48] sm:$0xf] }
  0x33   : > { %v877_v22 = vrot.slane %v875_v51, 7  ;;  %1129 = vst.msk [vmem:[#allocation2 + $0x28] sm:$0xf] %vm569_vm0, %v838_v20  ;;  %v1131_v26 = vsel %vm3915_vm3, %v839_v56, %v1130_v4  ;;  %v1646_v27 = vsel %vm1631_vm9, %v1644_v11, %v1645_v12  ;;  %v878_v30 = vshll.u32 %v4064_v8, 16 }
  0x34   : > { %v1461_v57 = vor.u32 %v1460_v10, %v1456_v58  ;;  %1132 = vst [vmem:[#allocation2 + $0x2c] sm:$0x1] %v1131_v26  ;;  %v883_v33 = vshrl.u32 %v4066_v9, 16  ;;  %v886_v34 = vshll.u32 %v4066_v9, 16  ;;  %v597_v35 = vsel %vm3915_vm3, 0, %v596_v15 }
  0x35   : > { %v881_v32 = vrot.slane %v877_v22, 4  ;;  %v880_v37 = vor.u32 %v878_v30, %v877_v22  ;;  %598 = vst [vmem:[#allocation2 + $0x3c] sm:$0x1] %v597_v35  ;;  %v653_v8 = vsel %vm3928_vm5, 0, %v652_v25  ;;  %v858_v38 = vshrl.u32 %v4092_v40, 16  ;;  %v353_v35 = vld [vmem:[%s3949_s18 + $0x98] sm:$0xff] }
  0x36   : > { %1603 = vrot.lane.b32.xlu0 %v1442_v16, %s3850_s20  ;;  %v1466_v36 = vsel %vm1406_vm10, %v1461_v57, %v1465_v17  ;;  %v885_v42 = vrot.slane %v883_v33, 7  ;;  %654 = vst [vmem:[#allocation2 + $0x44] sm:$0x1] %v653_v8  ;;  %v861_v9 = vshll.u32 %v4092_v40, 16  ;;  %v866_v43 = vshrl.u32 %v4095_v46, 16 }
  0x37   : > { %1607 = vrot.lane.b32.xlu1 %v1466_v36, %s3850_s20  ;;  %v869_v44 = vshll.u32 %v4095_v46, 16  ;;  %v1148_v41 = vsel %vm4002_vm8, %v880_v37, %v1147_v21  ;;  %v860_v48 = vrot.slane %v858_v38, 7  ;;  %v552_v50 = vadd.f32 %v3942_v7, %v4074_v18  ;;  %v352_v46 = vld [vmem:[%s3949_s18 + $0x90] sm:$0xff]  ;;  %v658_v26 = vld [vmem:[#allocation2 + $0x5c] sm:$0x1] }
  0x38   : > { %v606_v45 = vsel %vm3915_vm3, 0, %v605_v31  ;;  %v888_v51 = vor.u32 %v886_v34, %v885_v42  ;;  %v890_v52 = vrot.slane %v885_v42, 4  ;;  %1149 = vst [vmem:[#allocation2 + $0x48] sm:$0xf] %v1148_v41  ;;  %v868_v55 = vrot.slane %v866_v43, 7 }
  0x39   : > { %607 = vst [vmem:[#allocation2 + $0x60] sm:$0x1] %v606_v45  ;;  %v662_v40 = vsel %vm3928_vm5, 0, %v661_v39  ;;  %v863_v58 = vor.u32 %v861_v9, %v860_v48  ;;  %v864_v59 = vrot.slane %v860_v48, 4  ;;  %v3446_v61 = vpack.c.bf16 %v4083_v23, %v4083_v23  ;;  %v602_v15 = vld [vmem:[#allocation2 + $0x54] sm:$0x1] }
  0x3a   : > { %663 = vst [vmem:[#allocation2 + $0x68] sm:$0x1] %v662_v40  ;;  %v3447_v63 = vpack.c.bf16 %v552_v50, %v552_v50  ;;  %v3792_v18 = vld [vmem:[#allocation2 + $0x24] sm:$0xff]   ;;  %v889_v0 = vsel %vm3996_vm7, %v881_v32, %v888_v51  ;;  %v1152_v2 = vsel %vm3915_vm3, %v890_v52, %v1151_v47  ;;  %v871_v4 = vor.u32 %v869_v44, %v868_v55 }
  0x3b   : > { %1688 = vrot.lane.b32.xlu1 %v1646_v27, %s3849_s19  ;;  %v873_v10 = vrot.slane %v868_v55, 4  ;;  %v3793_v56 = vld [vmem:[#allocation2 + $0x2c] ss:$0 sps:$4 sm:$0x11]   ;;  %1150 = vst.msk [vmem:[#allocation2 + $0x4c] sm:$0xf] %vm569_vm0, %v889_v0  ;;  %v549_v23 = vadd.f32 %v3942_v7, %v4078_v19  ;;  %v550_v12 = vadd.f32 %v3942_v7, %v4087_v24  ;;  %v516_v16 = vmul.f32 %v3922_v3, %v352_v46 }
  0x3c   : > { %1153 = vst [vmem:[#allocation2 + $0x50] sm:$0x1] %v1152_v2  ;;  %v909_v11 = vshrl.u32 %v3446_v61, 16  ;;  %v1444_v17 = vshrl.u32 %v3792_v18, 16  ;;  %v1446_v20 = vshll.u32 %v3792_v18, 16  ;;  %v1641_v22 = vrot.slane %v3792_v18, 1 }
  0x3d   : > { %v872_v25 = vsel %vm3996_vm7, %v864_v59, %v871_v4  ;;  %v1140_v57 = vld [vmem:[#allocation2 + $0x3c] sm:$0xf]  ;;  %v1451_v27 = vshll.u32 %v3793_v56, 16  ;;  %v1642_v30 = vrot.slane %v3793_v56, 1  ;;  %v1144_v24 = vld [vmem:[#allocation2 + $0x44] sm:$0x1]  ;;  %v3444_v48 = vpack.c.bf16 %v549_v23, %v549_v23 }
  0x3e   : > { %v1141_v19 = vsel %vm4002_vm8, %v863_v58, %v1140_v57  ;;  %1143 = vst.msk [vmem:[#allocation2 + $0x40] sm:$0xf] %vm569_vm0, %v872_v25  ;;  %v911_v31 = vrot.slane %v909_v11, 7  ;;  %v1448_v32 = vrot.slane %v1446_v20, 1  ;;  %v1145_v33 = vsel %vm3915_vm3, %v873_v10, %v1144_v24  ;;  %v4160_v51 = vld [vmem:[%s3949_s18 + $0x80] sm:$0xff] }
  0x3f   : > { %1142 = vst [vmem:[#allocation2 + $0x3c] sm:$0xf] %v1141_v19  ;;  %v912_v34 = vshll.u32 %v3446_v61, 16  ;;  %v917_v21 = vshrl.u32 %v3447_v63, 16  ;;  %v1453_v36 = vrot.slane %v1451_v27, 1  ;;  %v1643_v37 = vsel %vm1631_vm9, %v1641_v22, %v1642_v30 }
  0x40   : > { %1146 = vst [vmem:[#allocation2 + $0x44] sm:$0x1] %v1145_v33  ;;  %v915_v8 = vrot.slane %v911_v31, 4  ;;  %v920_v38 = vshll.u32 %v3447_v63, 16  ;;  %v1449_v39 = vor.u32 %v1448_v32, %v1444_v17  ;;  %v1161_v43 = vld [vmem:[#allocation2 + $0x60] sm:$0xf]  ;;  %v3445_v50 = vpack.c.bf16 %v550_v12, %v550_v12 }
  0x41   : > { %v914_v42 = vor.u32 %v912_v34, %v911_v31  ;;  %v919_v9 = vrot.slane %v917_v21, 7  ;;  %v603_v44 = vsel %vm3915_vm3, 0, %v602_v15  ;;  %v1165_v41 = vld [vmem:[#allocation2 + $0x68] sm:$0x1]  ;;  %v659_v47 = vsel %vm3928_vm5, 0, %v658_v26 }
  0x42   : > { %604 = vst [vmem:[#allocation2 + $0x54] sm:$0x1] %v603_v44  ;;  %v517_v45 = vmul.f32 %v3922_v3, %v353_v35  ;;  %v1454_v52 = vsel %vm1406_vm10, %v1449_v39, %v1453_v36  ;;  %v3794_v55 = vld [vmem:[#allocation2 + $0x48] sm:$0xff]   ;;  %660 = vst [vmem:[#allocation2 + $0x5c] sm:$0x1] %v659_v47  ;;  %v892_v61 = vshrl.u32 %v3444_v48, 16  ;;  %v555_v0 = vadd.f32 %v3942_v7, %v516_v16 }
  0x43   : > { %v922_v40 = vor.u32 %v920_v38, %v919_v9  ;;  %v924_v46 = vrot.slane %v919_v9, 4  ;;  %v1162_v58 = vsel %vm4002_vm8, %v914_v42, %v1161_v43  ;;  %1605 = vrot.lane.b32.xlu0 %v1454_v52, %s3850_s20  ;;  %v3795_v59 = vld [vmem:[#allocation2 + $0x50] ss:$0 sps:$4 sm:$0x11]   ;;  %v895_v63 = vshll.u32 %v3444_v48, 16  ;;  %v4180_v42 = vld [vmem:[%s3949_s18 + $0x88] sm:$0xff] }
  0x44   : > { %1163 = vst [vmem:[#allocation2 + $0x60] sm:$0xf] %v1162_v58  ;;  %v900_v18 = vshrl.u32 %v3445_v50, 16  ;;  %v1480_v2 = vshrl.u32 %v3794_v55, 16  ;;  %v1482_v4 = vshll.u32 %v3794_v55, 16  ;;  %v1650_v10 = vrot.slane %v3794_v55, 1 }
  0x45   : > { %v923_v56 = vsel %vm3996_vm7, %v915_v8, %v922_v40  ;;  %v1487_v11 = vshll.u32 %v3795_v59, 16  ;;  %v1651_v12 = vrot.slane %v3795_v59, 1  ;;  %v1166_v15 = vsel %vm3915_vm3, %v924_v46, %v1165_v41  ;;  %v611_v24 = vld [vmem:[#allocation2 + $0x78] sm:$0x1]  ;;  %v667_v39 = vld [vmem:[#allocation2 + $0x80] sm:$0x1] }
  0x46   : > { %v3796_v23 = vld [vmem:[#allocation2 + $0x3c] sm:$0xff]   ;;  %1164 = vst.msk [vmem:[#allocation2 + $0x64] sm:$0xf] %vm569_vm0, %v923_v56  ;;  %v894_v17 = vrot.slane %v892_v61, 7  ;;  %v1484_v20 = vrot.slane %v1482_v4, 1  ;;  %v556_v16 = vadd.f32 %v3942_v7, %v517_v45  ;;  %v4173_v25 = vpack.c.bf16 %v555_v0, %v555_v0 }
  0x47   : > { %v3797_v22 = vld [vmem:[#allocation2 + $0x44] ss:$0 sps:$4 sm:$0x11]   ;;  %1167 = vst [vmem:[#allocation2 + $0x68] sm:$0x1] %v1166_v15  ;;  %v514_v57 = vmul.f32 %v3922_v3, %v4160_v51  ;;  %1686 = vrot.lane.b32.xlu0 %v1643_v37, %s3849_s19  ;;  %v1489_v26 = vrot.slane %v1487_v11, 1  ;;  %v1652_v19 = vsel %vm1631_vm9, %v1650_v10, %v1651_v12  ;;  %v515_v0 = vmul.f32 %v3922_v3, %v4180_v42 }
  0x48   : > { %v1468_v27 = vshrl.u32 %v3796_v23, 16  ;;  %v1470_v30 = vshll.u32 %v3796_v23, 16  ;;  %v1485_v31 = vor.u32 %v1484_v20, %v1480_v2  ;;  %v1475_v32 = vshll.u32 %v3797_v22, 16  ;;  %v608_v2 = vld [vmem:[#allocation2 + $0x6c] sm:$0x1]  ;;  %v356_v12 = vld [vmem:[%s3949_s18 + $0xb0] sm:$0xff] }
  0x49   : > { %v1647_v33 = vrot.slane %v3796_v23, 1  ;;  %v1648_v34 = vrot.slane %v3797_v22, 1  ;;  %v1154_v21 = vld [vmem:[#allocation2 + $0x54] sm:$0xf]  ;;  %v897_v36 = vor.u32 %v895_v63, %v894_v17  ;;  %v898_v8 = vrot.slane %v894_v17, 4  ;;  %v357_v15 = vld [vmem:[%s3949_s18 + $0xb8] sm:$0xff] }
  0x4a   : > { %v1472_v35 = vrot.slane %v1470_v30, 1  ;;  %v902_v38 = vrot.slane %v900_v18, 7  ;;  %v1490_v37 = vsel %vm1406_vm10, %v1485_v31, %v1489_v26  ;;  %v1477_v9 = vrot.slane %v1475_v32, 1  ;;  %v1158_v41 = vld [vmem:[#allocation2 + $0x5c] sm:$0x1] }
  0x4b   : > { %v1649_v43 = vsel %vm1631_vm9, %v1647_v33, %v1648_v34  ;;  %v903_v44 = vshll.u32 %v3445_v50, 16  ;;  %1611 = vrot.lane.b32.xlu1 %v1490_v37, %s3850_s20  ;;  %v1155_v45 = vsel %vm4002_vm8, %v897_v36, %v1154_v21  ;;  %v612_v52 = vsel %vm3915_vm3, 0, %v611_v24  ;;  %v664_v4 = vld [vmem:[#allocation2 + $0x74] sm:$0x1]  ;;  %v4214_v36 = vld [vmem:[%s3949_s18 + $0xa0] sm:$0xff] }
  0x4c   : > { %v1473_v47 = vor.u32 %v1472_v35, %v1468_v27  ;;  %v907_v48 = vrot.slane %v902_v38, 4  ;;  %1156 = vst [vmem:[#allocation2 + $0x54] sm:$0xf] %v1155_v45  ;;  %613 = vst [vmem:[#allocation2 + $0x78] sm:$0x1] %v612_v52  ;;  %v668_v46 = vsel %vm3928_vm5, 0, %v667_v39  ;;  %v3451_v58 = vpack.c.bf16 %v556_v16, %v556_v16 }
  0x4d   : > { %v3798_v55 = vld [vmem:[#allocation2 + $0x60] sm:$0xff]   ;;  %v905_v40 = vor.u32 %v903_v44, %v902_v38  ;;  %v943_v50 = vshrl.u32 %v4173_v25, 16  ;;  %669 = vst [vmem:[#allocation2 + $0x80] sm:$0x1] %v668_v46  ;;  %v946_v18 = vshll.u32 %v4173_v25, 16  ;;  %v553_v27 = vadd.f32 %v3942_v7, %v514_v57 }
  0x4e   : > { %v1478_v59 = vsel %vm1406_vm10, %v1473_v47, %v1477_v9  ;;  %v3799_v61 = vld [vmem:[#allocation2 + $0x68] ss:$0 sps:$4 sm:$0x11]   ;;  %v1159_v63 = vsel %vm3915_vm3, %v907_v48, %v1158_v41  ;;  %v1504_v10 = vshrl.u32 %v3798_v55, 16  ;;  %v1506_v56 = vshll.u32 %v3798_v55, 16 }
  0x4f   : > { %1609 = vrot.lane.b32.xlu0 %v1478_v59, %s3850_s20  ;;  %v906_v11 = vsel %vm3996_vm7, %v898_v8, %v905_v40  ;;  %1160 = vst [vmem:[#allocation2 + $0x5c] sm:$0x1] %v1159_v63  ;;  %v1656_v23 = vrot.slane %v3798_v55, 1  ;;  %1692 = vrot.lane.b32.xlu1 %v1652_v19, %s3849_s19  ;;  %v1511_v17 = vshll.u32 %v3799_v61, 16  ;;  %v1657_v20 = vrot.slane %v3799_v61, 1 }
  0x50   : > { %1157 = vst.msk [vmem:[#allocation2 + $0x58] sm:$0xf] %vm569_vm0, %v906_v11  ;;  %v945_v22 = vrot.slane %v943_v50, 7  ;;  %v951_v16 = vshrl.u32 %v3451_v58, 16  ;;  %v1508_v25 = vrot.slane %v1506_v56, 1  ;;  %v954_v26 = vshll.u32 %v3451_v58, 16 }
  0x51   : > { %v554_v30 = vadd.f32 %v3942_v7, %v515_v0  ;;  %v1513_v24 = vrot.slane %v1511_v17, 1  ;;  %v1658_v31 = vsel %vm1631_vm9, %v1656_v23, %v1657_v20  ;;  %v609_v21 = vsel %vm3915_vm3, 0, %v608_v2  ;;  %v617_v48 = vld [vmem:[#allocation2 + $0x90] sm:$0x1] }
  0x52   : > { %v948_v32 = vor.u32 %v946_v18, %v945_v22  ;;  %v949_v33 = vrot.slane %v945_v22, 4  ;;  %v1509_v19 = vor.u32 %v1508_v25, %v1504_v10  ;;  %v953_v34 = vrot.slane %v951_v16, 7  ;;  %610 = vst [vmem:[#allocation2 + $0x6c] sm:$0x1] %v609_v21  ;;  %v4240_v16 = vld [vmem:[%s3949_s18 + $0xa8] sm:$0xff] }
  0x53   : > { %1690 = vrot.lane.b32.xlu0 %v1649_v43, %s3849_s19  ;;  %v665_v35 = vsel %vm3928_vm5, 0, %v664_v4  ;;  %v1175_v57 = vld [vmem:[#allocation2 + $0x78] sm:$0xf]  ;;  %v3448_v8 = vpack.c.bf16 %v553_v27, %v553_v27  ;;  %v3449_v38 = vpack.c.bf16 %v554_v30, %v554_v30  ;;  %v520_v39 = vmul.f32 %v3922_v3, %v356_v12  ;;  %v614_v21 = vld [vmem:[#allocation2 + $0x84] sm:$0x1] }
  0x54   : > { %666 = vst [vmem:[#allocation2 + $0x74] sm:$0x1] %v665_v35  ;;  %v521_v37 = vmul.f32 %v3922_v3, %v357_v15  ;;  %v1514_v9 = vsel %vm1406_vm10, %v1509_v19, %v1513_v24  ;;  %v956_v43 = vor.u32 %v954_v26, %v953_v34  ;;  %v958_v44 = vrot.slane %v953_v34, 4  ;;  %v1179_v47 = vld [vmem:[#allocation2 + $0x80] sm:$0x1] }
  0x55   : > { %v1176_v41 = vsel %vm4002_vm8, %v948_v32, %v1175_v57  ;;  %1615 = vrot.lane.b32.xlu1 %v1514_v9, %s3850_s20  ;;  %v926_v52 = vshrl.u32 %v3448_v8, 16  ;;  %v559_v55 = vadd.f32 %v3942_v7, %v520_v39  ;;  %v518_v46 = vmul.f32 %v3922_v3, %v4214_v36  ;;  %v673_v12 = vld [vmem:[#allocation2 + $0x98] sm:$0x1]  ;;  %v670_v39 = vld [vmem:[#allocation2 + $0x8c] sm:$0x1] }
  0x56   : > { %v3801_v45 = vld [vmem:[#allocation2 + $0x5c] ss:$0 sps:$4 sm:$0x11]   ;;  %1177 = vst [vmem:[#allocation2 + $0x78] sm:$0xf] %v1176_v41  ;;  %v560_v40 = vadd.f32 %v3942_v7, %v521_v37  ;;  %v957_v50 = vsel %vm3996_vm7, %v949_v33, %v956_v43  ;;  %v1180_v59 = vsel %vm3915_vm3, %v958_v44, %v1179_v47  ;;  %v929_v61 = vshll.u32 %v3448_v8, 16 }
  0x57   : > { %v4226_v58 = vld [vmem:[#allocation2 + $0x54] sm:$0xff]   ;;  %v934_v63 = vshrl.u32 %v3449_v38, 16  ;;  %v1499_v18 = vshll.u32 %v3801_v45, 16  ;;  %v1654_v0 = vrot.slane %v3801_v45, 1  ;;  %1178 = vst.msk [vmem:[#allocation2 + $0x7c] sm:$0xf] %vm569_vm0, %v957_v50  ;;  %v3454_v19 = vpack.c.bf16 %v559_v55, %v559_v55 }
  0x58   : > { %1181 = vst [vmem:[#allocation2 + $0x80] sm:$0x1] %v1180_v59  ;;  %v928_v2 = vrot.slane %v926_v52, 7  ;;  %v937_v4 = vshll.u32 %v3449_v38, 16  ;;  %v1492_v10 = vshrl.u32 %v4226_v58, 16  ;;  %v1494_v56 = vshll.u32 %v4226_v58, 16 }
  0x59   : > { %v1653_v11 = vrot.slane %v4226_v58, 1  ;;  %v936_v23 = vrot.slane %v934_v63, 7  ;;  %v1501_v15 = vrot.slane %v1499_v18, 1  ;;  %1696 = vrot.lane.b32.xlu1 %v1658_v31, %s3849_s19  ;;  %v618_v22 = vsel %vm3915_vm3, 0, %v617_v48  ;;  %v1168_v24 = vld [vmem:[#allocation2 + $0x6c] sm:$0xf] }
  0x5a   : > { %v931_v17 = vor.u32 %v929_v61, %v928_v2  ;;  %v932_v20 = vrot.slane %v928_v2, 4  ;;  %v1496_v25 = vrot.slane %v1494_v56, 1  ;;  %619 = vst [vmem:[#allocation2 + $0x90] sm:$0x1] %v618_v22  ;;  %v674_v31 = vsel %vm3928_vm5, 0, %v673_v12  ;;  %v360_v37 = vld [vmem:[%s3949_s18 + $0xd0] sm:$0xff] }
  0x5b   : > { %v1655_v26 = vsel %vm1631_vm9, %v1653_v11, %v1654_v0  ;;  %v939_v27 = vor.u32 %v937_v4, %v936_v23  ;;  %v941_v30 = vrot.slane %v936_v23, 4  ;;  %v1172_v32 = vld [vmem:[#allocation2 + $0x74] sm:$0x1]  ;;  %v3455_v34 = vpack.c.bf16 %v560_v40, %v560_v40  ;;  %675 = vst [vmem:[#allocation2 + $0x98] sm:$0x1] %v674_v31 }
  0x5c   : > { %v1169_v33 = vsel %vm4002_vm8, %v931_v17, %v1168_v24  ;;  %v1497_v35 = vor.u32 %v1496_v25, %v1492_v10  ;;  %v519_v38 = vmul.f32 %v3922_v3, %v4240_v16  ;;  %v977_v9 = vshrl.u32 %v3454_v19, 16  ;;  %v4268_v61 = vld [vmem:[%s4975_s1] ss:$0 sm:$0xff] }
  0x5d   : > { %v940_v57 = vsel %vm3996_vm7, %v932_v20, %v939_v27  ;;  %1170 = vst [vmem:[#allocation2 + $0x6c] sm:$0xf] %v1169_v33  ;;  %v1173_v8 = vsel %vm3915_vm3, %v941_v30, %v1172_v32  ;;  %v980_v43 = vshll.u32 %v3454_v19, 16  ;;  %v985_v44 = vshrl.u32 %v3455_v34, 16  ;;  %v361_v20 = vld [vmem:[%s3949_s18 + $0xd8] sm:$0xff] }
  0x5e   : > { %1171 = vst.msk [vmem:[#allocation2 + $0x70] sm:$0xf] %vm569_vm0, %v940_v57  ;;  %1174 = vst [vmem:[#allocation2 + $0x74] sm:$0x1] %v1173_v8  ;;  %v988_v41 = vshll.u32 %v3455_v34, 16  ;;  %v1502_v47 = vsel %vm1406_vm10, %v1497_v35, %v1501_v15  ;;  %v4256_v48 = vld [vmem:[#allocation2 + $0x78] sm:$0xff]   ;;  %v557_v45 = vadd.f32 %v3942_v7, %v518_v46  ;;  %v558_v52 = vadd.f32 %v3942_v7, %v519_v38 }
  0x5f   : > { %v615_v3 = vsel %vm3915_vm3, 0, %v614_v21  ;;  %1613 = vrot.lane.b32.xlu0 %v1502_v47, %s3850_s20  ;;  %v3803_v55 = vld [vmem:[#allocation2 + $0x80] ss:$0 sps:$4 sm:$0x11]   ;;  %v979_v40 = vrot.slane %v977_v9, 7  ;;  %v987_v50 = vrot.slane %v985_v44, 7  ;;  %v524_v7 = vmul.f32 %v4268_v61, %v360_v37 }
  0x60   : > { %616 = vst [vmem:[#allocation2 + $0x84] sm:$0x1] %v615_v3  ;;  %v671_v59 = vsel %vm3928_vm5, 0, %v670_v39  ;;  %v1528_v46 = vshrl.u32 %v4256_v48, 16  ;;  %v1530_v63 = vshll.u32 %v4256_v48, 16  ;;  %v1662_v18 = vrot.slane %v4256_v48, 1 }
  0x61   : > { %672 = vst [vmem:[#allocation2 + $0x8c] sm:$0x1] %v671_v59  ;;  %v3452_v0 = vpack.c.bf16 %v557_v45, %v557_v45  ;;  %v1535_v2 = vshll.u32 %v3803_v55, 16  ;;  %v1663_v4 = vrot.slane %v3803_v55, 1  ;;  %v982_v10 = vor.u32 %v980_v43, %v979_v40  ;;  %v1189_v11 = vld [vmem:[#allocation2 + $0x90] sm:$0xf] }
  0x62   : > { %v983_v56 = vrot.slane %v979_v40, 4  ;;  %v1532_v23 = vrot.slane %v1530_v63, 1  ;;  %v990_v12 = vor.u32 %v988_v41, %v987_v50  ;;  %v992_v15 = vrot.slane %v987_v50, 4  ;;  %v1193_v30 = vld [vmem:[#allocation2 + $0x98] sm:$0x1]  ;;  %v4300_v63 = vld [vmem:[%s3949_s18 + $0xc0] sm:$0xff] }
  0x63   : > { %v3453_v17 = vpack.c.bf16 %v558_v52, %v558_v52  ;;  %1694 = vrot.lane.b32.xlu0 %v1655_v26, %s3849_s19  ;;  %v1537_v22 = vrot.slane %v1535_v2, 1  ;;  %v1664_v25 = vsel %vm1631_vm9, %v1662_v18, %v1663_v4  ;;  %v1190_v27 = vsel %vm4002_vm8, %v982_v10, %v1189_v11  ;;  %v623_v26 = vld [vmem:[#allocation2 + $0xa8] sm:$0x1]  ;;  %v679_v3 = vld [vmem:[#allocation2 + $0xb0] sm:$0x1] }
  0x64   : > { %v960_v24 = vshrl.u32 %v3452_v0, 16  ;;  %v1533_v32 = vor.u32 %v1532_v23, %v1528_v46  ;;  %v991_v31 = vsel %vm3996_vm7, %v983_v56, %v990_v12  ;;  %1191 = vst [vmem:[#allocation2 + $0x90] sm:$0xf] %v1190_v27  ;;  %v1194_v19 = vsel %vm3915_vm3, %v992_v15, %v1193_v30  ;;  %v4295_v50 = vld [vmem:[%s4976_s2] ss:$0 sm:$0xff]  ;;  %v4303_v18 = vld [vmem:[%s3949_s18 + $0xc8] sm:$0xff] }
  0x65   : > { %v4279_v33 = vld [vmem:[#allocation2 + $0x6c] sm:$0xff]   ;;  %v963_v34 = vshll.u32 %v3452_v0, 16  ;;  %v3805_v21 = vld [vmem:[#allocation2 + $0x74] ss:$0 sps:$4 sm:$0x11]   ;;  %v968_v57 = vshrl.u32 %v3453_v17, 16  ;;  %v525_v38 = vmul.f32 %v4268_v61, %v361_v20  ;;  %v563_v59 = vadd.f32 %v4295_v50, %v524_v7 }
  0x66   : > { %1192 = vst.msk [vmem:[#allocation2 + $0x94] sm:$0xf] %vm569_vm0, %v991_v31  ;;  %1195 = vst [vmem:[#allocation2 + $0x98] sm:$0x1] %v1194_v19  ;;  %v962_v35 = vrot.slane %v960_v24, 7  ;;  %v971_v8 = vshll.u32 %v3453_v17, 16  ;;  %v1538_v39 = vsel %vm1406_vm10, %v1533_v32, %v1537_v22  ;;  %v522_v22 = vmul.f32 %v4268_v61, %v4300_v63 }
  0x67   : > { %v1516_v37 = vshrl.u32 %v4279_v33, 16  ;;  %v1518_v9 = vshll.u32 %v4279_v33, 16  ;;  %v1659_v43 = vrot.slane %v4279_v33, 1  ;;  %v1182_v44 = vld [vmem:[#allocation2 + $0x84] sm:$0xf]  ;;  %1619 = vrot.lane.b32.xlu1 %v1538_v39, %s3850_s20  ;;  %v1523_v41 = vshll.u32 %v3805_v21, 16 }
  0x68   : > { %v1660_v47 = vrot.slane %v3805_v21, 1  ;;  %v965_v45 = vor.u32 %v963_v34, %v962_v35  ;;  %v966_v52 = vrot.slane %v962_v35, 4  ;;  %v970_v40 = vrot.slane %v968_v57, 7  ;;  %v1186_v10 = vld [vmem:[#allocation2 + $0x8c] sm:$0x1] }
  0x69   : > { %v1520_v55 = vrot.slane %v1518_v9, 1  ;;  %v564_v46 = vadd.f32 %v4295_v50, %v525_v38  ;;  %v1525_v0 = vrot.slane %v1523_v41, 1  ;;  %v624_v56 = vsel %vm3915_vm3, 0, %v623_v26  ;;  %v620_v11 = vld [vmem:[#allocation2 + $0x9c] sm:$0x1] }
  0x6a   : > { %v1661_v2 = vsel %vm1631_vm9, %v1659_v43, %v1660_v47  ;;  %v1183_v4 = vsel %vm4002_vm8, %v965_v45, %v1182_v44  ;;  %v973_v12 = vor.u32 %v971_v8, %v970_v40  ;;  %v975_v7 = vrot.slane %v970_v40, 4  ;;  %625 = vst [vmem:[#allocation2 + $0xa8] sm:$0x1] %v624_v56  ;;  %v676_v30 = vld [vmem:[#allocation2 + $0xa4] sm:$0x1] }
  0x6b   : > { %v1521_v23 = vor.u32 %v1520_v55, %v1516_v37  ;;  %1184 = vst [vmem:[#allocation2 + $0x84] sm:$0xf] %v1183_v4  ;;  %v680_v15 = vsel %vm3928_vm5, 0, %v679_v3  ;;  %1700 = vrot.lane.b32.xlu1 %v1664_v25, %s3849_s19  ;;  %v3458_v17 = vpack.c.bf16 %v563_v59, %v563_v59  ;;  %v3459_v20 = vpack.c.bf16 %v564_v46, %v564_v46  ;;  %v4336_v55 = vld [vmem:[%s3949_s18 + $0xe0] sm:$0xff] }
  0x6c   : > { %681 = vst [vmem:[#allocation2 + $0xb0] sm:$0x1] %v680_v15  ;;  %v523_v27 = vmul.f32 %v4268_v61, %v4303_v18  ;;  %v974_v31 = vsel %vm3996_vm7, %v966_v52, %v973_v12  ;;  %v1187_v25 = vsel %vm3915_vm3, %v975_v7, %v1186_v10  ;;  %v621_v19 = vsel %vm3915_vm3, 0, %v620_v11  ;;  %v4341_v7 = vld [vmem:[%s3949_s18 + $0xe8] sm:$0xff] }
  0x6d   : > { %v1526_v24 = vsel %vm1406_vm10, %v1521_v23, %v1525_v0  ;;  %v4318_v32 = vld [vmem:[#allocation2 + $0x90] sm:$0xff]   ;;  %v3807_v34 = vld [vmem:[#allocation2 + $0x98] ss:$0 sps:$4 sm:$0x11]   ;;  %1185 = vst.msk [vmem:[#allocation2 + $0x88] sm:$0xf] %vm569_vm0, %v974_v31  ;;  %v561_v57 = vadd.f32 %v4295_v50, %v522_v22 }
  0x6e   : > { %1617 = vrot.lane.b32.xlu0 %v1526_v24, %s3850_s20  ;;  %1188 = vst [vmem:[#allocation2 + $0x8c] sm:$0x1] %v1187_v25  ;;  %v1011_v26 = vshrl.u32 %v3458_v17, 16  ;;  %v1014_v21 = vshll.u32 %v3458_v17, 16  ;;  %v1019_v35 = vshrl.u32 %v3459_v20, 16  ;;  %v1552_v8 = vshrl.u32 %v4318_v32, 16 }
  0x6f   : > { %622 = vst [vmem:[#allocation2 + $0x9c] sm:$0x1] %v621_v19  ;;  %v1554_v38 = vshll.u32 %v4318_v32, 16  ;;  %v1668_v39 = vrot.slane %v4318_v32, 1  ;;  %v1022_v37 = vshll.u32 %v3459_v20, 16  ;;  %v1559_v9 = vshll.u32 %v3807_v34, 16 }
  0x70   : > { %v1669_v43 = vrot.slane %v3807_v34, 1  ;;  %v1013_v44 = vrot.slane %v1011_v26, 7  ;;  %v1021_v41 = vrot.slane %v1019_v35, 7  ;;  %v562_v45 = vadd.f32 %v4295_v50, %v523_v27  ;;  %v626_v25 = vld [vmem:[#allocation2 + $0xb4] sm:$0x1] }
  0x71   : > { %v1556_v47 = vrot.slane %v1554_v38, 1  ;;  %v677_v52 = vsel %vm3928_vm5, 0, %v676_v30  ;;  %v3456_v3 = vpack.c.bf16 %v561_v57, %v561_v57  ;;  %v1561_v40 = vrot.slane %v1559_v9, 1  ;;  %v1203_v4 = vld [vmem:[#allocation2 + $0xa8] sm:$0xf] }
  0x72   : > { %1698 = vrot.lane.b32.xlu0 %v1661_v2, %s3849_s19  ;;  %v1670_v59 = vsel %vm1631_vm9, %v1668_v39, %v1669_v43  ;;  %v1016_v46 = vor.u32 %v1014_v21, %v1013_v44  ;;  %v1017_v0 = vrot.slane %v1013_v44, 4  ;;  %678 = vst [vmem:[#allocation2 + $0xa4] sm:$0x1] %v677_v52  ;;  %v1024_v56 = vor.u32 %v1022_v37, %v1021_v41 }
  0x73   : > { %v1557_v10 = vor.u32 %v1556_v47, %v1552_v8  ;;  %v1026_v11 = vrot.slane %v1021_v41, 4  ;;  %v1207_v23 = vld [vmem:[#allocation2 + $0xb0] sm:$0x1]  ;;  %v3457_v12 = vpack.c.bf16 %v562_v45, %v562_v45  ;;  %v994_v17 = vshrl.u32 %v3456_v3, 16  ;;  %v682_v47 = vld [vmem:[#allocation2 + $0xbc] sm:$0x1] }
  0x74   : > { %v1204_v15 = vsel %vm4002_vm8, %v1016_v46, %v1203_v4  ;;  %v997_v20 = vshll.u32 %v3456_v3, 16  ;;  %v526_v2 = vmul.f32 %v4268_v61, %v4336_v55  ;;  %v4348_v27 = vld [vmem:[#allocation2 + $0x84] sm:$0xff]   ;;  %v1025_v30 = vsel %vm3996_vm7, %v1017_v0, %v1024_v56  ;;  %v364_v0 = vld [vmem:[%s3949_s18 + $0xf0] sm:$0xff] }
  0x75   : > { %v1562_v22 = vsel %vm1406_vm10, %v1557_v10, %v1561_v40  ;;  %1205 = vst [vmem:[#allocation2 + $0xa8] sm:$0xf] %v1204_v15  ;;  %v1208_v24 = vsel %vm3915_vm3, %v1026_v11, %v1207_v23  ;;  %v1002_v31 = vshrl.u32 %v3457_v12, 16  ;;  %v3809_v19 = vld [vmem:[#allocation2 + $0x8c] ss:$0 sps:$4 sm:$0x11]   ;;  %v527_v21 = vmul.f32 %v4268_v61, %v4341_v7 }
  0x76   : > { %1623 = vrot.lane.b32.xlu1 %v1562_v22, %s3850_s20  ;;  %1206 = vst.msk [vmem:[#allocation2 + $0xac] sm:$0xf] %vm569_vm0, %v1025_v30  ;;  %1209 = vst [vmem:[#allocation2 + $0xb0] sm:$0x1] %v1208_v24  ;;  %v996_v34 = vrot.slane %v994_v17, 7  ;;  %v1005_v26 = vshll.u32 %v3457_v12, 16  ;;  %v565_v35 = vadd.f32 %v4295_v50, %v526_v2  ;;  %v528_v22 = vmul.f32 %v4268_v61, %v364_v0 }
  0x77   : > { %v1540_v57 = vshrl.u32 %v4348_v27, 16  ;;  %v1542_v8 = vshll.u32 %v4348_v27, 16  ;;  %v1665_v38 = vrot.slane %v4348_v27, 1  ;;  %v1004_v39 = vrot.slane %v1002_v31, 7  ;;  %v1196_v37 = vld [vmem:[#allocation2 + $0x9c] sm:$0xf] }
  0x78   : > { %v1547_v9 = vshll.u32 %v3809_v19, 16  ;;  %v1666_v43 = vrot.slane %v3809_v19, 1  ;;  %v999_v44 = vor.u32 %v997_v20, %v996_v34  ;;  %v1000_v41 = vrot.slane %v996_v34, 4  ;;  %v365_v11 = vld [vmem:[%s3949_s18 + $0xf8] sm:$0xff]  ;;  %v629_v23 = vld [vmem:[#allocation2 + $0xc0] sm:$0x1] }
  0x79   : > { %v1544_v45 = vrot.slane %v1542_v8, 1  ;;  %v1007_v52 = vor.u32 %v1005_v26, %v1004_v39  ;;  %v1009_v3 = vrot.slane %v1004_v39, 4  ;;  %v1200_v40 = vld [vmem:[#allocation2 + $0xa4] sm:$0x1]  ;;  %v566_v46 = vadd.f32 %v4295_v50, %v527_v21  ;;  %v685_v30 = vld [vmem:[#allocation2 + $0xc8] sm:$0x1] }
  0x7a   : > { %v1549_v4 = vrot.slane %v1547_v9, 1  ;;  %1704 = vrot.lane.b32.xlu1 %v1670_v59, %s3849_s19  ;;  %v1197_v10 = vsel %vm4002_vm8, %v999_v44, %v1196_v37  ;;  %v627_v56 = vsel %vm3915_vm3, 0, %v626_v25  ;;  %v683_v59 = vsel %vm3928_vm5, 0, %v682_v47  ;;  %s3852_s18 = smov 16  }
  0x7b   : > { %v1545_v12 = vor.u32 %v1544_v45, %v1540_v57  ;;  %v1008_v15 = vsel %vm3996_vm7, %v1000_v41, %v1007_v52  ;;  %1198 = vst [vmem:[#allocation2 + $0x9c] sm:$0xf] %v1197_v10  ;;  %v1201_v17 = vsel %vm3915_vm3, %v1009_v3, %v1200_v40  ;;  %628 = vst [vmem:[#allocation2 + $0xb4] sm:$0x1] %v627_v56  ;;  %v630_v34 = vsel %vm3915_vm3, 0, %v629_v23 }
  0x7c   : > { %1199 = vst.msk [vmem:[#allocation2 + $0xa0] sm:$0xf] %vm569_vm0, %v1008_v15  ;;  %1202 = vst [vmem:[#allocation2 + $0xa4] sm:$0x1] %v1201_v17  ;;  %v3460_v20 = vpack.c.bf16 %v565_v35, %v565_v35  ;;  %v3461_v2 = vpack.c.bf16 %v566_v46, %v566_v46  ;;  %v1667_v31 = vsel %vm1631_vm9, %v1665_v38, %v1666_v43  ;;  %v686_v52 = vsel %vm3928_vm5, 0, %v685_v30 }
  0x7d   : > { %684 = vst [vmem:[#allocation2 + $0xbc] sm:$0x1] %v683_v59  ;;  %v1550_v24 = vsel %vm1406_vm10, %v1545_v12, %v1549_v4  ;;  %v4380_v25 = vld [vmem:[#allocation2 + $0xa8] sm:$0xff]   ;;  %v529_v19 = vmul.f32 %v4268_v61, %v365_v11  ;;  %v3811_v26 = vld [vmem:[#allocation2 + $0xb0] ss:$0 sps:$4 sm:$0x11]   ;;  %v567_v8 = vadd.f32 %v4295_v50, %v528_v22 }
  0x7e   : > { %1621 = vrot.lane.b32.xlu0 %v1550_v24, %s3850_s20  ;;  %v1028_v21 = vshrl.u32 %v3460_v20, 16  ;;  %v1031_v35 = vshll.u32 %v3460_v20, 16  ;;  %v1036_v57 = vshrl.u32 %v3461_v2, 16  ;;  %631 = vst [vmem:[#allocation2 + $0xc0] sm:$0x1] %v630_v34  ;;  %v1576_v39 = vshrl.u32 %v4380_v25, 16 }
  0x7f   : > { %v1578_v38 = vshll.u32 %v4380_v25, 16  ;;  %v1674_v37 = vrot.slane %v4380_v25, 1  ;;  %v1039_v9 = vshll.u32 %v3461_v2, 16  ;;  %v1583_v61 = vshll.u32 %v3811_v26, 16  ;;  %687 = vst [vmem:[#allocation2 + $0xc8] sm:$0x1] %v686_v52 }
  0x80   : > { %v1675_v43 = vrot.slane %v3811_v26, 1  ;;  %v1030_v44 = vrot.slane %v1028_v21, 7  ;;  %v1038_v41 = vrot.slane %v1036_v57, 7  ;;  %v568_v45 = vadd.f32 %v4295_v50, %v529_v19  ;;  %v581_v24 = vld [vmem:[#allocation2] sm:$0x1] }
  0x81   : > { %v1580_v47 = vrot.slane %v1578_v38, 1  ;;  %v3462_v3 = vpack.c.bf16 %v567_v8, %v567_v8  ;;  %v1585_v40 = vrot.slane %v1583_v61, 1  ;;  %v637_v21 = vld [vmem:[#allocation2 + $0x8] sm:$0x1]  ;;  %vm366_vm11 = vcmask 31744  }
  0x82   : > { %1702 = vrot.lane.b32.xlu0 %v1667_v31, %s3849_s19  ;;  %v1033_v46 = vor.u32 %v1031_v35, %v1030_v44  ;;  %v1034_v0 = vrot.slane %v1030_v44, 4  ;;  %v1210_v4 = vld [vmem:[#allocation2 + $0xb4] sm:$0xf]  ;;  %v1041_v11 = vor.u32 %v1039_v9, %v1038_v41  ;;  %v1043_v23 = vrot.slane %v1038_v41, 4  ;;  %v3820_v38 = vld [vmem:[%s4977_s3 + $0x8] sm:$0x3f]  }
  0x83   : > { %v1581_v10 = vor.u32 %v1580_v47, %v1576_v39  ;;  %v4394_v56 = vld [vmem:[#allocation2 + $0x9c] sm:$0xff]   ;;  %v3463_v12 = vpack.c.bf16 %v568_v45, %v568_v45  ;;  %v4396_v15 = vld [vmem:[#allocation2 + $0xa4] ss:$0 sps:$4 sm:$0x11]   ;;  %v1045_v59 = vshrl.u32 %v3462_v3, 16  ;;  %v1676_v30 = vsel %vm1631_vm9, %v1674_v37, %v1675_v43  ;;  %367 = vst.msk [vmem:[#allocation4] sm:$0xff] %vm366_vm11, %v3954_v13 }
  0x84   : > { %v1211_v50 = vsel %vm4002_vm8, %v1033_v46, %v1210_v4  ;;  %v1214_v17 = vld [vmem:[#allocation2 + $0xbc] sm:$0x1]  ;;  %v1564_v2 = vshrl.u32 %v4394_v56, 16  ;;  %v1566_v22 = vshll.u32 %v4394_v56, 16  ;;  %v1571_v31 = vshll.u32 %v4396_v15, 16  ;;  %368 = vst.msk [vmem:[#allocation4 + $0x8] sm:$0xff] %vm366_vm11, %v3957_v14 }
  0x85   : > { %v1586_v20 = vsel %vm1406_vm10, %v1581_v10, %v1585_v40  ;;  %1212 = vst [vmem:[#allocation2 + $0xb4] sm:$0xf] %v1211_v50  ;;  %v1671_v19 = vrot.slane %v4394_v56, 1  ;;  %v1042_v34 = vsel %vm3996_vm7, %v1034_v0, %v1041_v11  ;;  %v1215_v26 = vsel %vm3915_vm3, %v1043_v23, %v1214_v17  ;;  %v1217_v43 = vld [vmem:[#allocation2 + $0xc0] sm:$0xf]  ;;  %369 = vst.msk [vmem:[#allocation4 + $0x10] sm:$0xff] %vm366_vm11, %v3976_v28 }
  0x86   : > { %1627 = vrot.lane.b32.xlu1 %v1586_v20, %s3850_s20  ;;  %v1568_v35 = vrot.slane %v1566_v22, 1  ;;  %1213 = vst.msk [vmem:[#allocation2 + $0xb8] sm:$0xf] %vm569_vm0, %v1042_v34  ;;  %1216 = vst [vmem:[#allocation2 + $0xbc] sm:$0x1] %v1215_v26  ;;  %v1047_v57 = vrot.slane %v1045_v59, 7 }
  0x87   : > { %v1048_v8 = vshll.u32 %v3462_v3, 16  ;;  %v1053_v39 = vshrl.u32 %v3463_v12, 16  ;;  %v1573_v37 = vrot.slane %v1571_v31, 1  ;;  %v1672_v9 = vrot.slane %v4396_v15, 1  ;;  %v4421_v41 = vld [vmem:[%s4977_s3 + $0x10] sm:$0x3f]  }
  0x88   : > { %v1056_v61 = vshll.u32 %v3463_v12, 16  ;;  %v582_v44 = vsel %vm3915_vm3, 0, %v581_v24  ;;  %v1569_v47 = vor.u32 %v1568_v35, %v1564_v2  ;;  %v1051_v52 = vrot.slane %v1047_v57, 4  ;;  %v632_v40 = vld [vmem:[#allocation2 + $0xcc] sm:$0x1]  ;;  %370 = vst.msk [vmem:[#allocation4 + $0x18] sm:$0xff] %vm366_vm11, %v3979_v29 }
  0x89   : > { %v1050_v45 = vor.u32 %v1048_v8, %v1047_v57  ;;  %v1055_v3 = vrot.slane %v1053_v39, 7  ;;  %583 = vst [vmem:[#allocation2] sm:$0x1] %v582_v44  ;;  %v688_v46 = vld [vmem:[#allocation2 + $0xd4] sm:$0x1]  ;;  %v638_v4 = vsel %vm3928_vm5, 0, %v637_v21  ;;  %v1673_v14 = vsel %vm1631_vm9, %v1671_v19, %v1672_v9 }
  0x8a   : > { %1708 = vrot.lane.b32.xlu1 %v1676_v30, %s3849_s19  ;;  %v1221_v0 = vld [vmem:[#allocation2 + $0xc8] sm:$0x1]  ;;  %vm1851_vm12 = vcmask 1045504   ;;  %v1574_v10 = vsel %vm1406_vm10, %v1569_v47, %v1573_v37  ;;  %639 = vst [vmem:[#allocation2 + $0x8] sm:$0x1] %v638_v4  ;;  %371 = vst.msk [vmem:[#allocation4 + $0x20] sm:$0xff] %vm366_vm11, %v4034_v49 }
  0x8b   : > { %v1058_v11 = vor.u32 %v1056_v61, %v1055_v3  ;;  %v1060_v23 = vrot.slane %v1055_v3, 4  ;;  %v1218_v12 = vsel %vm4002_vm8, %v1050_v45, %v1217_v43  ;;  %372 = vst.msk [vmem:[#allocation4 + $0x28] sm:$0xff] %vm366_vm11, %v4041_v53  ;;  %373 = vst.msk [vmem:[#allocation4 + $0x30] sm:$0xff] %vm366_vm11, %v4051_v62  ;;  %3687 = vmatprep.subr.msk.bf16.mxu1 %vm1851_vm12, %v3820_v38  ;;  %v402_v13 = vld [vmem:[%s4981_s7] sm:$0x3]  ;;  %1625 = vrot.lane.b32.xlu0 %v1574_v10, %s3850_s20  ;;  %vm422_vm13 = vcmask 1041408  }
  0x8c   : > { %374 = vst.msk [vmem:[#allocation4 + $0x38] sm:$0xff] %vm366_vm11, %v4062_v6  ;;  %375 = vst.msk [vmem:[#allocation4 + $0x40] sm:$0xff] %vm366_vm11, %v4160_v51  ;;  %v1853_v28 = vsel %vm1851_vm12, %v3820_v38, 0  ;;  %v633_v29 = vsel %vm3915_vm3, 0, %v632_v40  ;;  %v689_v62 = vsel %vm3928_vm5, 0, %v688_v46  ;;  %3686 = vmatprep.subr.msk.bf16.mxu0 %vm422_vm13, %v402_v13  ;;  %v424_v54 = vsel %vm422_vm13, %v402_v13, 0 }
  0x8d   : > { %376 = vst.msk [vmem:[#allocation4 + $0x48] sm:$0xff] %vm366_vm11, %v4180_v42  ;;  %377 = vst.msk [vmem:[#allocation4 + $0x50] sm:$0xff] %vm366_vm11, %v4214_v36  ;;  %v1059_v49 = vsel %vm3996_vm7, %v1051_v52, %v1058_v11  ;;  %v1222_v53 = vsel %vm3915_vm3, %v1060_v23, %v1221_v0  ;;  %3549 = vmatpush3.bf16.msra.mxu1 %v1853_v28  ;;  %v4479_v6 = vld [vmem:[#allocation2 + $0xb4] sm:$0xff]   ;;  %v3815_v51 = vld [vmem:[#allocation2 + $0xbc] ss:$0 sps:$4 sm:$0x11]   ;;  %3539 = vmatpush3.bf16.msra.mxu0 %v424_v54 }
  0x8e   : > { %378 = vst.msk [vmem:[#allocation4 + $0x58] sm:$0xff] %vm366_vm11, %v4240_v16  ;;  %379 = vst.msk [vmem:[#allocation4 + $0x60] sm:$0xff] %vm366_vm11, %v4300_v63  ;;  %3689 = vmatprep.subr.msk.bf16.mxu1 %vm1851_vm12, %v4421_v41  ;;  %v1588_v1 = vshrl.u32 %v4479_v6, 16  ;;  %v1590_v5 = vshll.u32 %v4479_v6, 16  ;;  %v1677_v42 = vrot.slane %v4479_v6, 1  ;;  %3688 = vmatprep.subr.msk.bf16.mxu0 %vm1851_vm12, %v3824_v60  ;;  %v1595_v16 = vshll.u32 %v3815_v51, 16 }
  0x8f   : > { %380 = vst.msk [vmem:[#allocation4 + $0x68] sm:$0xff] %vm366_vm11, %v4303_v18  ;;  %381 = vst.msk [vmem:[#allocation4 + $0x70] sm:$0xff] %vm366_vm11, %v4336_v55  ;;  %1706 = vrot.lane.b32.xlu0 %v1673_v14, %s3849_s19  ;;  %v1678_v63 = vrot.slane %v3815_v51, 1  ;;  %v383_v37 = vld [vmem:[#allocation4] ss:$2 sm:$0xff]  ;;  %v2024_v44 = vsel %vm1851_vm12, %v3824_v60, 0 }
  0x90   : > { %382 = vst.msk [vmem:[#allocation4 + $0x78] sm:$0xff] %vm366_vm11, %v4341_v7  ;;  %1219 = vst [vmem:[#allocation2 + $0xc0] sm:$0xf] %v1218_v12  ;;  %v4488_v36 = vld [vmem:[#allocation2] sm:$0xff]   ;;  %v1592_v18 = vrot.slane %v1590_v5, 1  ;;  %v1597_v7 = vrot.slane %v1595_v16, 1 }
  0x91   : > { %634 = vst [vmem:[#allocation2 + $0xcc] sm:$0x1] %v633_v29  ;;  %1220 = vst.msk [vmem:[#allocation2 + $0xc4] sm:$0xf] %vm569_vm0, %v1059_v49  ;;  %v1679_v15 = vsel %vm1631_vm9, %v1677_v42, %v1678_v63  ;;  %v1410_v50 = vshll.u32 %v4488_v36, 16  ;;  %v1408_v59 = vshrl.u32 %v4488_v36, 16 }
  0x92   : > { %1223 = vst [vmem:[#allocation2 + $0xc8] sm:$0x1] %v1222_v53  ;;  %690 = vst [vmem:[#allocation2 + $0xd4] sm:$0x1] %v689_v62  ;;  %v1593_v17 = vor.u32 %v1592_v18, %v1588_v1  ;;  %1710 = vrot.lane.b32.xlu1 %v1679_v15, %s3849_s19  ;;  %v1632_v30 = vrot.slane %v4488_v36, 1  ;;  %vm1744_vm14 = vcmask 64512  }
  0x93   : > { %v3819_v55 = vld [vmem:[#allocation2 + $0x8] ss:$0 sps:$4 sm:$0x11]   ;;  %v1412_v19 = vrot.slane %v1410_v50, 1  ;;  %v385_v43 = vld [vmem:[#allocation4 + $0x10] ss:$2 sm:$0xff] }
  0x94   : > { %v1415_v20 = vshll.u32 %v3819_v55, 16  ;;  %v1598_v24 = vsel %vm1406_vm10, %v1593_v17, %v1597_v7  ;;  %v1633_v39 = vrot.slane %v3819_v55, 1  ;;  %v387_v40 = vld [vmem:[#allocation4 + $0x20] ss:$2 sm:$0xff]  ;;  %v398_v10 = vpack.c.bf16 %v385_v43, %v383_v37  ;;  %v389_v11 = vld [vmem:[#allocation4 + $0x30] ss:$2 sm:$0xff] }
  0x95   : > { %1629 = vrot.lane.b32.xlu0 %v1598_v24, %s3850_s20  ;;  %v1413_v52 = vor.u32 %v1412_v19, %v1408_v59  ;;  %v391_v23 = vld [vmem:[#allocation4 + $0x40] ss:$2 sm:$0xff]  ;;  %v399_v28 = vpack.c.bf16 %v389_v11, %v387_v40  ;;  %v393_v29 = vld [vmem:[#allocation4 + $0x50] ss:$2 sm:$0xff]  ;;  %vm1818_vm15 = vcmask 97280   ;;  %vm2529_vm0 = vcmask 58368  }
  0x96   : > { %v1417_v61 = vrot.slane %v1415_v20, 1  ;;  %v1634_v12 = vsel %vm1631_vm9, %v1632_v30, %v1633_v39  ;;  %3540 = vmatprep.mubr.msk.bf16.mxu0 %vm366_vm11, %v398_v10  ;;  %v400_v49 = vpack.c.bf16 %v393_v29, %v391_v23  ;;  %v395_v51 = vld [vmem:[#allocation4 + $0x60] ss:$2 sm:$0xff]  ;;  %v3834_v59 = vld [vmem:[#allocation2 + $0x18] sm:$0xff]   ;;  %v2229_v30 = vsel %vm1851_vm12, %v4421_v41, 0 }
  0x97   : > { %3541 = vmatmul.mubr.msk.bf16.vlgmr.msra.gmra.mxu0 %vm366_vm11, %v399_v28  ;;  %v397_v1 = vld [vmem:[#allocation4 + $0x70] ss:$2 sm:$0xff]  ;;  %v3833_v55 = vld [vmem:[#allocation2 + $0xc] sm:$0xff]   ;;  %vm2535_vm1 = vcmask 57344   ;;  %vm2904_vm2 = vcmask 1043456  }
  0x98   : > { %v4495_v2 = vld [vmem:[#allocation2 + $0xcc] sm:$0xff]   ;;  %v4497_v22 = vld [vmem:[#allocation2 + $0xc0] sm:$0xff]   ;;  %v1418_v53 = vsel %vm1406_vm10, %v1413_v52, %v1417_v61  ;;  %3583 = vmatpush3.bf16.msra.mxu0 %v2024_v44  ;;  %3544 = vmatprep.mubr.msk.bf16.mxu0 %vm366_vm11, %v400_v49  ;;  %v401_v42 = vpack.c.bf16 %v397_v1, %v395_v51 }
  0x99   : > { %v3817_v31 = vld [vmem:[#allocation2 + $0xc8] ss:$0 sps:$4 sm:$0x11]   ;;  %v1788_v34 = vshrl.u32 %v4497_v22, 16  ;;  %v1790_v26 = vshll.u32 %v4497_v22, 16  ;;  %v1801_v21 = vrot.slane %v4497_v22, 1 }
  0x9a   : > { %v3823_v35 = vld [vmem:[#allocation2 + $0xd4] ss:$0 sps:$4 sm:$0x11]   ;;  %v1795_v57 = vshll.u32 %v3817_v31, 16  ;;  %v1802_v8 = vrot.slane %v3817_v31, 1  ;;  %v2198_v38 = vshll.u32 %v4495_v2, 16 }
  0x9b   : > { %v1792_v9 = vrot.slane %v1790_v26, 1  ;;  %v2196_v3 = vshrl.u32 %v4495_v2, 16  ;;  %v2203_v4 = vshll.u32 %v3823_v35, 16  ;;  %v2209_v13 = vrot.slane %v4495_v2, 1  ;;  %v3835_v26 = vld [vmem:[#allocation2 + $0x30] sm:$0xff]   ;;  %v3838_v44 = vld [vmem:[#allocation2 + $0x3c] sm:$0xff]  }
  0x9c   : > { %v1797_v47 = vrot.slane %v1795_v57, 1  ;;  %v1803_v45 = vsel %vm1631_vm9, %v1801_v21, %v1802_v8  ;;  %v2200_v0 = vrot.slane %v2198_v38, 1  ;;  %v2210_v14 = vrot.slane %v3823_v35, 1  ;;  %v3836_v35 = vld [vmem:[#allocation2 + $0x24] sm:$0xff]  }
  0x9d   : > { %v1793_v46 = vor.u32 %v1792_v9, %v1788_v34  ;;  %1804 = vrot.lane.b32.xlu1 %v1803_v45, %s3849_s19  ;;  %v2205_v54 = vrot.slane %v2203_v4, 1  ;;  %v3837_v9 = vld [vmem:[#allocation2 + $0x48] sm:$0xff]  }
  0x9e   : > { %v2201_v62 = vor.u32 %v2200_v0, %v2196_v3  ;;  %v2211_v5 = vsel %vm1631_vm9, %v2209_v13, %v2210_v14  ;;  %v3839_v0 = vld [vmem:[#allocation2 + $0x60] sm:$0xff]  }
  0x9f   : > { %v1798_v60 = vsel %vm1406_vm10, %v1793_v46, %v1797_v47  ;;  %v1683_v16 = vpop.permute.xlu1 %1682  ;;  %3545 = vmatmul.mubr.msk.bf16.gmra.mxu0 %vm366_vm11, %v401_v42 }
  0xa0   : > { %1799 = vrot.lane.b32.xlu0 %v1798_v60, %s3850_s20  ;;  %v2206_v63 = vsel %vm1406_vm10, %v2201_v62, %v2205_v54 }
  0xa1   : > { %1680 = vrot.lane.b32.xlu1 %v1634_v12, %s3849_s19 }
  0xa3   : > { %v1685_v17 = vpop.permute.xlu1 %1684 }
  0xa4   : > { %1599 = vrot.lane.b32.xlu0 %v1418_v53, %s3850_s20  ;;  %v1602_v18 = vpop.permute.xlu0 %1601 }
  0xa5   : > { %2212 = vrot.lane.b32.xlu1 %v2211_v5, %s3849_s19  ;;  %v1715_v7 = vsel %vm366_vm11, %v3833_v55, %v1602_v18 }
  0xa6   : > { %v4525_v15 = vsel %vm1744_vm14, %v1715_v7, %v1683_v16 }
  0xa7   : > { %3550 = vmatprep.mubr.msk.bf16.mxu1 %vm1818_vm15, %v4525_v15 }
  0xa8   : > { %2207 = vrot.lane.b32.xlu0 %v2206_v63, %s3850_s20  ;;  %v1604_v50 = vpop.permute.xlu0 %1603 }
  0xa9   : > { %v1717_v20 = vsel %vm366_vm11, %v3834_v59, %v1604_v50  ;;  %v1608_v31 = vpop.permute.xlu1 %1607 }
  0xaa   : > { %v4535_v24 = vsel %vm1744_vm14, %v1717_v20, %v1685_v17  ;;  %v1721_v21 = vsel %vm366_vm11, %v3835_v26, %v1608_v31 }
  0xab   : > { %3551 = vmatmul.mubr.msk.bf16.vlgmr.msra.gmra.mxu1 %vm1818_vm15, %v4535_v24 }
  0xac   : > { %3617 = vmatpush3.bf16.msra.mxu1 %v2229_v30 }
  0xad   : > { %v1689_v34 = vpop.permute.xlu1 %1688 }
  0xae   : > { %v4545_v41 = vsel %vm1744_vm14, %v1721_v21, %v1689_v34 }
  0xb5   : > { %v1606_v19 = vpop.permute.xlu0 %1605 }
  0xb6   : > { %v1719_v57 = vsel %vm366_vm11, %v3836_v35, %v1606_v19 }
  0xb9   : > { %v1687_v8 = vpop.permute.xlu0 %1686 }
  0xba   : > { %v4542_v39 = vsel %vm1744_vm14, %v1719_v57, %v1687_v8  ;;  %v3851_v57 = vmov 0.0  }
  0xbb   : > { %3554 = vmatprep.mubr.msk.bf16.mxu1 %vm1818_vm15, %v4542_v39  ;;  %2527 = vst.msk [vmem:[#allocation3] sm:$0xff] %vm1744_vm14, %v3851_v57  ;;  %2528 = vst.msk [vmem:[#allocation3 + $0x8] sm:$0xff] %vm1744_vm14, %v3851_v57 }
  0xbc   : > { %3555 = vmatmul.mubr.msk.bf16.gmra.mxu1 %vm1818_vm15, %v4545_v41  ;;  %2530 = vst.msk [vmem:[#allocation3 + $0x10] sm:$0x3] %vm2529_vm0, %v3851_v57 }
  0xbd   : > { %v1612_v38 = vpop.permute.xlu1 %1611  ;;  %2537 = vst.msk [vmem:[#allocation3 + $0x18] sm:$0x1] %vm2535_vm1, %v3851_v57  ;;  %2538 = vst.msk [vmem:[#allocation3 + $0x30] sm:$0x1] %vm2535_vm1, %v3851_v57 }
  0xbe   : > { %v1725_v61 = vsel %vm366_vm11, %v3837_v9, %v1612_v38  ;;  %2539 = vst.msk [vmem:[#allocation3 + $0x48] sm:$0x1] %vm2535_vm1, %v3851_v57  ;;  %2540 = vst.msk [vmem:[#allocation3 + $0x60] sm:$0x1] %vm2535_vm1, %v3851_v57 }
  0xbf   : > { %2541 = vst.msk [vmem:[#allocation3 + $0x78] sm:$0x1] %vm2535_vm1, %v3851_v57  ;;  %2542 = vst.msk [vmem:[#allocation3 + $0x90] sm:$0x1] %vm2535_vm1, %v3851_v57 }
  0xc0   : > { %2543 = vst.msk [vmem:[#allocation3 + $0xa8] sm:$0x1] %vm2535_vm1, %v3851_v57  ;;  %2544 = vst.msk [vmem:[#allocation3 + $0xc0] sm:$0x1] %vm2535_vm1, %v3851_v57 }
  0xc1   : > { %v1610_v37 = vpop.permute.xlu0 %1609  ;;  %v1693_v43 = vpop.permute.xlu1 %1692  ;;  %2545 = vst.msk [vmem:[#allocation3 + $0xd8] sm:$0x1] %vm2535_vm1, %v3851_v57  ;;  %2546 = vst.msk [vmem:[#allocation3 + $0xf0] sm:$0x1] %vm2535_vm1, %v3851_v57 }
  0xc2   : > { %v1723_v47 = vsel %vm366_vm11, %v3838_v44, %v1610_v37  ;;  %v4557_v3 = vsel %vm1744_vm14, %v1725_v61, %v1693_v43  ;;  %2547 = vst.msk [vmem:[#allocation3 + $0x108] sm:$0x1] %vm2535_vm1, %v3851_v57  ;;  %2548 = vst.msk [vmem:[#allocation3 + $0x120] sm:$0x1] %vm2535_vm1, %v3851_v57 }
  0xc3   : > { %2549 = vst.msk [vmem:[#allocation3 + $0x138] sm:$0x1] %vm2535_vm1, %v3851_v57  ;;  %2550 = vst.msk [vmem:[#allocation3 + $0x150] sm:$0x1] %vm2535_vm1, %v3851_v57 }
  0xc4   : > { %2551 = vst.msk [vmem:[#allocation3 + $0x168] sm:$0x1] %vm2535_vm1, %v3851_v57  ;;  %2552 = vst.msk [vmem:[#allocation3 + $0x180] sm:$0x1] %vm2535_vm1, %v3851_v57 }
  0xc5   : > { %v1691_v45 = vpop.permute.xlu0 %1690  ;;  %2536 = vst.msk [vmem:[#allocation3] sm:$0x1] %vm2535_vm1, %v3851_v57 }
  0xc6   : > { %v4554_v52 = vsel %vm1744_vm14, %v1723_v47, %v1691_v45 }
  0xc7   : > { %3558 = vmatprep.mubr.msk.bf16.mxu1 %vm1818_vm15, %v4554_v52  ;;  %v1616_v40 = vpop.permute.xlu1 %1615 }
  0xc8   : > { %3559 = vmatmul.mubr.msk.bf16.gmra.mxu1 %vm1818_vm15, %v4557_v3  ;;  %v1729_v4 = vsel %vm366_vm11, %v3839_v0, %v1616_v40 }
  0xcb   : > { %v1697_v10 = vpop.permute.xlu1 %1696 }
  0xcc   : > { %v1762_v13 = vsel %vm1744_vm14, %v1729_v4, %v1697_v10 }
  0xd1   : > { %v1614_v46 = vpop.permute.xlu0 %1613 }
  0xd2   : > { %v1727_v11 = vsel %vm366_vm11, %v4226_v58, %v1614_v46 }
  0xd5   : > { %v1695_v23 = vpop.permute.xlu0 %1694 }
  0xd6   : > { %v1760_v12 = vsel %vm1744_vm14, %v1727_v11, %v1695_v23 }
  0xd7   : > { %3562 = vmatprep.mubr.msk.bf16.mxu1 %vm1818_vm15, %v1760_v12 }
  0xd8   : > { %3563 = vmatmul.mubr.msk.bf16.gmra.mxu1 %vm1818_vm15, %v1762_v13 }
  0xd9   : > { %v1620_v14 = vpop.permute.xlu1 %1619 }
  0xda   : > { %v1733_v29 = vsel %vm366_vm11, %v4256_v48, %v1620_v14 }
  0xdd   : > { %v1701_v60 = vpop.permute.xlu1 %1700 }
  0xde   : > { %v1766_v62 = vsel %vm1744_vm14, %v1733_v29, %v1701_v60  ;;  %v3825_v60 = vld [vmem:[%s4979_s5 + $0x14] ss:$0 sps:$4 sm:$0xff]  }
  0xdf   : > { %3690 = vmatprep.subr.msk.bf16.mxu0 %vm2904_vm2, %v3825_v60 }
  0xe0   : > { %v1618_v28 = vpop.permute.xlu0 %1617 }
  0xe1   : > { %v1731_v49 = vsel %vm366_vm11, %v4279_v33, %v1618_v28 }
  0xe4   : > { %v1699_v53 = vpop.permute.xlu0 %1698 }
  0xe5   : > { %v1764_v58 = vsel %vm1744_vm14, %v1731_v49, %v1699_v53  ;;  %v2906_v53 = vsel %vm2904_vm2, %v3825_v60, 0 }
  0xe6   : > { %3566 = vmatprep.mubr.msk.bf16.mxu1 %vm1818_vm15, %v1764_v58 }
  0xe7   : > { %3567 = vmatmul.mubr.msk.bf16.gmra.mxu1 %vm1818_vm15, %v1766_v62 }
  0xe8   : > { %v1624_v54 = vpop.permute.xlu1 %1623 }
  0xe9   : > { %v1737_v1 = vsel %vm366_vm11, %v4318_v32, %v1624_v54 }
  0xec   : > { %v1705_v5 = vpop.permute.xlu1 %1704 }
  0xed   : > { %v1770_v16 = vsel %vm1744_vm14, %v1737_v1, %v1705_v5 }
  0xf0   : > { %v1622_v51 = vpop.permute.xlu0 %1621 }
  0xf1   : > { %v1735_v48 = vsel %vm366_vm11, %v4348_v27, %v1622_v51 }
  0xf4   : > { %v1703_v42 = vpop.permute.xlu0 %1702 }
  0xf5   : > { %v1768_v33 = vsel %vm1744_vm14, %v1735_v48, %v1703_v42 }
  0xf6   : > { %3570 = vmatprep.mubr.msk.bf16.mxu1 %vm1818_vm15, %v1768_v33 }
  0xf7   : > { %3571 = vmatmul.mubr.msk.bf16.gmra.mxu1 %vm1818_vm15, %v1770_v16 }
  0xf8   : > { %v1628_v63 = vpop.permute.xlu1 %1627 }
  0xf9   : > { %v1741_v55 = vsel %vm366_vm11, %v4380_v25, %v1628_v63 }
  0xfc   : > { %v1709_v7 = vpop.permute.xlu1 %1708 }
  0xfd   : > { %v1626_v18 = vpop.permute.xlu0 %1625  ;;  %v1774_v17 = vsel %vm1744_vm14, %v1741_v55, %v1709_v7 }
  0xfe   : > { %v1739_v32 = vsel %vm366_vm11, %v4394_v56, %v1626_v18 }
 0x101   : > { %v1707_v50 = vpop.permute.xlu0 %1706 }
 0x102   : > { %v1772_v27 = vsel %vm1744_vm14, %v1739_v32, %v1707_v50 }
 0x103   : > { %3574 = vmatprep.mubr.msk.bf16.mxu1 %vm1818_vm15, %v1772_v27 }
 0x104   : > { %3575 = vmatmul.mubr.msk.bf16.gmra.mxu1 %vm1818_vm15, %v1774_v17  ;;  %v1711_v59 = vpop.permute.xlu1 %1710 }
 0x107   : > { %v1630_v20 = vpop.permute.xlu0 %1629 }
 0x108   : > { %v1743_v30 = vsel %vm366_vm11, %v4479_v6, %v1630_v20 }
 0x109   : > { %v1776_v25 = vsel %vm1744_vm14, %v1743_v30, %v1711_v59  ;;  %v4750_v59 = vld [vmem:[%s4978_s4] ss:$0 sm:$0xff] }
 0x10a   : > { %3578 = vmatprep.mubr.msk.bf16.mxu1 %vm1818_vm15, %v1776_v25 }
 0x10f   : > { %v1805_v31 = vpop.permute.xlu1 %1804 }
 0x112   : > { %v1800_v56 = vpop.permute.xlu0 %1799 }
 0x113   : > { %v1807_v19 = vsel %vm366_vm11, %v4497_v22, %v1800_v56  ;;  %v1681_v26 = vpop.permute.xlu1 %1680 }
 0x114   : > { %v1809_v34 = vsel %vm1744_vm14, %v1807_v19, %v1805_v31 }
 0x115   : > { %3579 = vmatmul.mubr.msk.bf16.gmra.mxu1 %vm1818_vm15, %v1809_v34 }
 0x116   : > { %3618 = vmatprep.mubr.msk.bf16.mxu1 %vm1818_vm15, %v4535_v24  ;;  %v1600_v21 = vpop.permute.xlu0 %1599 }
 0x117   : > { %v1713_v6 = vsel %vm366_vm11, %v4488_v36, %v1600_v21 }
 0x118   : > { %v1746_v35 = vsel %vm1744_vm14, %v1713_v6, %v1681_v26 }
 0x119   : > { %3584 = vmatprep.mubr.msk.bf16.mxu0 %vm1818_vm15, %v1746_v35 }
 0x11a   : > { %3585 = vmatmul.mubr.msk.bf16.vlgmr.msra.gmra.mxu0 %vm1818_vm15, %v4525_v15  ;;  %v2208_v36 = vpop.permute.xlu0 %2207  ;;  %v2213_v15 = vpop.permute.xlu1 %2212 }
 0x11b   : > { %3588 = vmatprep.mubr.msk.bf16.mxu0 %vm1818_vm15, %v4535_v24  ;;  %v2215_v22 = vsel %vm366_vm11, %v4495_v2, %v2208_v36  ;;  %3651 = vmatpush3.bf16.msra.mxu0 %v2906_v53 }
 0x11c   : > { %v2217_v24 = vsel %vm1744_vm14, %v2215_v22, %v2213_v15 }
 0x11d   : > { %3619 = vmatmul.mubr.msk.bf16.vlgmr.msra.gmra.mxu1 %vm1818_vm15, %v4542_v39 }
 0x11e   : > { %3622 = vmatprep.mubr.msk.bf16.mxu1 %vm1818_vm15, %v4545_v41 }
 0x122   : > { %3589 = vmatmul.mubr.msk.bf16.gmra.mxu0 %vm1818_vm15, %v4542_v39 }
 0x123   : > { %3592 = vmatprep.mubr.msk.bf16.mxu0 %vm1818_vm15, %v4545_v41 }
 0x125   : > { %3623 = vmatmul.mubr.msk.bf16.gmra.mxu1 %vm1818_vm15, %v4554_v52 }
 0x126   : > { %3626 = vmatprep.mubr.msk.bf16.mxu1 %vm1818_vm15, %v4557_v3 }
 0x12a   : > { %3593 = vmatmul.mubr.msk.bf16.gmra.mxu0 %vm1818_vm15, %v4554_v52 }
 0x12b   : > { %3596 = vmatprep.mubr.msk.bf16.mxu0 %vm1818_vm15, %v4557_v3 }
 0x12d   : > { %3627 = vmatmul.mubr.msk.bf16.gmra.mxu1 %vm1818_vm15, %v1760_v12 }
 0x12e   : > { %3630 = vmatprep.mubr.msk.bf16.mxu1 %vm1818_vm15, %v1762_v13 }
 0x132   : > { %3597 = vmatmul.mubr.msk.bf16.gmra.mxu0 %vm1818_vm15, %v1760_v12 }
 0x133   : > { %3600 = vmatprep.mubr.msk.bf16.mxu0 %vm1818_vm15, %v1762_v13 }
 0x135   : > { %3631 = vmatmul.mubr.msk.bf16.gmra.mxu1 %vm1818_vm15, %v1764_v58 }
 0x136   : > { %3634 = vmatprep.mubr.msk.bf16.mxu1 %vm1818_vm15, %v1766_v62 }
 0x13a   : > { %3601 = vmatmul.mubr.msk.bf16.gmra.mxu0 %vm1818_vm15, %v1764_v58 }
 0x13b   : > { %3604 = vmatprep.mubr.msk.bf16.mxu0 %vm1818_vm15, %v1766_v62 }
 0x13d   : > { %3635 = vmatmul.mubr.msk.bf16.gmra.mxu1 %vm1818_vm15, %v1768_v33 }
 0x13e   : > { %3638 = vmatprep.mubr.msk.bf16.mxu1 %vm1818_vm15, %v1770_v16 }
 0x142   : > { %3605 = vmatmul.mubr.msk.bf16.gmra.mxu0 %vm1818_vm15, %v1768_v33 }
 0x143   : > { %3608 = vmatprep.mubr.msk.bf16.mxu0 %vm1818_vm15, %v1770_v16 }
 0x145   : > { %3639 = vmatmul.mubr.msk.bf16.gmra.mxu1 %vm1818_vm15, %v1772_v27 }
 0x146   : > { %3642 = vmatprep.mubr.msk.bf16.mxu1 %vm1818_vm15, %v1774_v17 }
 0x14a   : > { %3609 = vmatmul.mubr.msk.bf16.gmra.mxu0 %vm1818_vm15, %v1772_v27 }
 0x14b   : > { %3612 = vmatprep.mubr.msk.bf16.mxu0 %vm1818_vm15, %v1774_v17 }
 0x14d   : > { %3643 = vmatmul.mubr.msk.bf16.gmra.mxu1 %vm1818_vm15, %v1776_v25 }
 0x14e   : > { %3646 = vmatprep.mubr.msk.bf16.mxu1 %vm1818_vm15, %v1809_v34 }
 0x152   : > { %3613 = vmatmul.mubr.msk.bf16.gmra.mxu0 %vm1818_vm15, %v1776_v25 }
 0x155   : > { %3647 = vmatmul.mubr.msk.bf16.gmra.mxu1 %vm1818_vm15, %v2217_v24 }
 0x157   : > { %v4706_v13 = vpop.f32.mrf.mxu0 }
 0x159   : > { %v4710_v28 = vpop.f32.mrf.mxu0 }
 0x15b   : > { %v4717_v49 = vpop.f32.mrf.mxu0 }
 0x15d   : > { %v4723_v62 = vpop.f32.mrf.mxu0 }
 0x15f   : > { %v4727_v51 = vpop.f32.mrf.mxu0 }
 0x161   : > { %v4731_v5 = vpop.f32.mrf.mxu0 }
 0x163   : > { %v4735_v42 = vpop.f32.mrf.mxu0 }
 0x165   : > { %v4741_v63 = vpop.f32.mrf.mxu0 }
 0x16b   : > { %v3552_v2 = vpop.f32.mrf.mxu1 }
 0x16d   : > { %v1889_v8 = vpop.f32.mrf.mxu1 }
 0x16f   : > { %v3553_v39 = vpop.f32.mrf.mxu1 }
 0x171   : > { %v1892_v41 = vpop.f32.mrf.mxu1 }
 0x17c   : > { %v4670_v38 = vpop.f32.mrf.mxu1 }
 0x17e   : > { %v4672_v37 = vpop.f32.mrf.mxu1 }
 0x180   : > { %v4674_v9 = vpop.f32.mrf.mxu1 }
 0x182   : > { %v4676_v61 = vpop.f32.mrf.mxu1 }
 0x188   : > { %v4678_v43 = vpop.f32.mrf.mxu1 }
 0x18a   : > { %v4680_v44 = vpop.f32.mrf.mxu1 }
 0x18c   : > { %v4682_v47 = vpop.f32.mrf.mxu1 }
 0x18e   : > { %v4684_v45 = vpop.f32.mrf.mxu1 }
 0x198   : > { %v4686_v52 = vpop.f32.mrf.mxu1 }
 0x19a   : > { %v4688_v3 = vpop.f32.mrf.mxu1 }
 0x19c   : > { %v4690_v40 = vpop.f32.mrf.mxu1 }
 0x19e   : > { %v4692_v46 = vpop.f32.mrf.mxu1 }
 0x1a7   : > { %v4694_v0 = vpop.f32.mrf.mxu1 }
 0x1a9   : > { %v4696_v4 = vpop.f32.mrf.mxu1 }
 0x1ab   : > { %v4698_v10 = vpop.f32.mrf.mxu1 }
 0x1ad   : > { %v4700_v11 = vpop.f32.mrf.mxu1 }
 0x1b7   : > { %v4702_v23 = vpop.f32.mrf.mxu1 }
 0x1b9   : > { %v4704_v12 = vpop.f32.mrf.mxu1 }
 0x1bb   : > { %v4708_v14 = vpop.f32.mrf.mxu1 }
 0x1bd   : > { %v4712_v29 = vpop.f32.mrf.mxu1 }
 0x1c4   : > { %v4721_v58 = vpop.f32.mrf.mxu1 }
 0x1c6   : > { %v4725_v54 = vpop.f32.mrf.mxu1 }
 0x1c8   : > { %v4729_v1 = vpop.f32.mrf.mxu1 }
 0x1ca   : > { %v4733_v48 = vpop.f32.mrf.mxu1 }
 0x1d5   : > { %v4737_v33 = vpop.f32.mrf.mxu1 }
 0x1d7   : > { %v4739_v16 = vpop.f32.mrf.mxu1 }
 0x1d9   : > { %v4743_v18 = vpop.f32.mrf.mxu1 }
 0x1da   : > { %v3586_v55 = vpop.f32.mrf.mxu0 }
 0x1db   : > { %v2069_v7 = vadd.f32 %v3586_v55, %v3552_v2  ;;  %v4745_v32 = vpop.f32.mrf.mxu1 }
 0x1dc   : > { %v2060_v50 = vpop.f32.mrf.mxu0 }
 0x1dd   : > { %v2061_v27 = vadd.f32 %v2060_v50, %v1889_v8  ;;  %v3620_v17 = vpop.f32.mrf.mxu1 }
 0x1de   : > { %v2394_v20 = vadd.f32 %v3620_v17, %v2069_v7  ;;  %v3587_v30 = vpop.f32.mrf.mxu0 }
 0x1df   : > { %v2072_v25 = vadd.f32 %v3587_v30, %v3553_v39  ;;  %v2265_v31 = vpop.f32.mrf.mxu1 }
 0x1e0   : > { %vm2426_vm3 = vcmp.ge.f32.partialorder %v2394_v20, 0.0  ;;  %v2465_v56 = vmul.f32 %v4750_v59, %v2394_v20  ;;  %v2392_v19 = vadd.f32 %v2265_v31, %v2061_v27  ;;  %v2063_v34 = vpop.f32.mrf.mxu0 }
 0x1e1   : > { %v2064_v26 = vadd.f32 %v2063_v34, %v1892_v41  ;;  %v3621_v21 = vpop.f32.mrf.mxu1 }
 0x1e2   : > { %v2497_v6 = vsel %vm2426_vm3, %v2394_v20, %v2465_v56  ;;  %vm2424_vm4 = vcmp.ge.f32.partialorder %v2392_v19, 0.0  ;;  %v2463_v35 = vmul.f32 %v4750_v59, %v2392_v19  ;;  %v2395_v36 = vadd.f32 %v3621_v21, %v2072_v25  ;;  %v3590_v22 = vpop.f32.mrf.mxu0 }
 0x1e3   : > { %2575 = vst.msk [vmem:[#allocation3 + $0x31] sm:$0xff] %vm1744_vm14, %v2497_v6  ;;  %v2085_v15 = vadd.f32 %v3590_v22, %v4670_v38  ;;  %v2268_v24 = vpop.f32.mrf.mxu1 }
 0x1e4   : > { %v2495_v57 = vsel %vm2424_vm4, %v2392_v19, %v2463_v35  ;;  %vm2427_vm5 = vcmp.ge.f32.partialorder %v2395_v36, 0.0  ;;  %v2466_v2 = vmul.f32 %v4750_v59, %v2395_v36  ;;  %v2393_v8 = vadd.f32 %v2268_v24, %v2064_v26  ;;  %v2076_v39 = vpop.f32.mrf.mxu0 }
 0x1e5   : > { %2573 = vst.msk [vmem:[#allocation3 + $0x19] sm:$0xff] %vm1744_vm14, %v2495_v57  ;;  %v2077_v41 = vadd.f32 %v2076_v39, %v4672_v37  ;;  %v3624_v60 = vpop.f32.mrf.mxu1 }
 0x1e6   : > { %v2498_v53 = vsel %vm2427_vm5, %v2395_v36, %v2466_v2  ;;  %vm2425_vm6 = vcmp.ge.f32.partialorder %v2393_v8, 0.0  ;;  %v2464_v55 = vmul.f32 %v4750_v59, %v2393_v8  ;;  %v2398_v7 = vadd.f32 %v3624_v60, %v2085_v15  ;;  %v3591_v50 = vpop.f32.mrf.mxu0 }
 0x1e7   : > { %2576 = vst.msk [vmem:[#allocation3 + $0x39] sm:$0xff] %vm1744_vm14, %v2498_v53  ;;  %v2088_v38 = vadd.f32 %v3591_v50, %v4674_v9  ;;  %v2281_v27 = vpop.f32.mrf.mxu1 }
 0x1e8   : > { %v2496_v17 = vsel %vm2425_vm6, %v2393_v8, %v2464_v55  ;;  %vm2430_vm7 = vcmp.ge.f32.partialorder %v2398_v7, 0.0  ;;  %v2469_v20 = vmul.f32 %v4750_v59, %v2398_v7  ;;  %v2396_v30 = vadd.f32 %v2281_v27, %v2077_v41  ;;  %v2079_v25 = vpop.f32.mrf.mxu0 }
 0x1e9   : > { %2574 = vst.msk [vmem:[#allocation3 + $0x21] sm:$0xff] %vm1744_vm14, %v2496_v17  ;;  %v2080_v37 = vadd.f32 %v2079_v25, %v4676_v61  ;;  %v3625_v31 = vpop.f32.mrf.mxu1 }
 0x1ea   : > { %v2501_v56 = vsel %vm2430_vm7, %v2398_v7, %v2469_v20  ;;  %vm2428_vm8 = vcmp.ge.f32.partialorder %v2396_v30, 0.0  ;;  %v2467_v19 = vmul.f32 %v4750_v59, %v2396_v30  ;;  %v2399_v34 = vadd.f32 %v3625_v31, %v2088_v38  ;;  %v3594_v26 = vpop.f32.mrf.mxu0 }
 0x1eb   : > { %2579 = vst.msk [vmem:[#allocation3 + $0x61] sm:$0xff] %vm1744_vm14, %v2501_v56  ;;  %v2101_v9 = vadd.f32 %v3594_v26, %v4678_v43  ;;  %v2284_v21 = vpop.f32.mrf.mxu1 }
 0x1ec   : > { %v2499_v6 = vsel %vm2428_vm8, %v2396_v30, %v2467_v19  ;;  %vm2431_vm9 = vcmp.ge.f32.partialorder %v2399_v34, 0.0  ;;  %v2470_v35 = vmul.f32 %v4750_v59, %v2399_v34  ;;  %v2397_v36 = vadd.f32 %v2284_v21, %v2080_v37  ;;  %v2092_v22 = vpop.f32.mrf.mxu0 }
 0x1ed   : > { %2577 = vst.msk [vmem:[#allocation3 + $0x49] sm:$0xff] %vm1744_vm14, %v2499_v6  ;;  %v2093_v61 = vadd.f32 %v2092_v22, %v4680_v44  ;;  %v3628_v15 = vpop.f32.mrf.mxu1 }
 0x1ee   : > { %v2502_v24 = vsel %vm2431_vm9, %v2399_v34, %v2470_v35  ;;  %vm2429_vm10 = vcmp.ge.f32.partialorder %v2397_v36, 0.0  ;;  %v2468_v57 = vmul.f32 %v4750_v59, %v2397_v36  ;;  %v2402_v2 = vadd.f32 %v3628_v15, %v2101_v9  ;;  %v3595_v8 = vpop.f32.mrf.mxu0 }
 0x1ef   : > { %2580 = vst.msk [vmem:[#allocation3 + $0x69] sm:$0xff] %vm1744_vm14, %v2502_v24  ;;  %v2104_v43 = vadd.f32 %v3595_v8, %v4682_v47  ;;  %v2297_v39 = vpop.f32.mrf.mxu1 }
 0x1f0   : > { %v2500_v41 = vsel %vm2429_vm10, %v2397_v36, %v2468_v57  ;;  %vm2434_vm11 = vcmp.ge.f32.partialorder %v2402_v2, 0.0  ;;  %v2473_v60 = vmul.f32 %v4750_v59, %v2402_v2  ;;  %v2400_v53 = vadd.f32 %v2297_v39, %v2093_v61  ;;  %v2095_v55 = vpop.f32.mrf.mxu0  ;;  %v2641_v61 = vld [vmem:[#allocation3 + $0x19] ss:$2 sm:$0xff] }
 0x1f1   : > { %2578 = vst.msk [vmem:[#allocation3 + $0x51] sm:$0xff] %vm1744_vm14, %v2500_v41  ;;  %v2096_v44 = vadd.f32 %v2095_v55, %v4684_v45  ;;  %v3629_v7 = vpop.f32.mrf.mxu1 }
 0x1f2   : > { %v2505_v50 = vsel %vm2434_vm11, %v2402_v2, %v2473_v60  ;;  %vm2432_vm12 = vcmp.ge.f32.partialorder %v2400_v53, 0.0  ;;  %v2471_v38 = vmul.f32 %v4750_v59, %v2400_v53  ;;  %v2403_v27 = vadd.f32 %v3629_v7, %v2104_v43  ;;  %v3598_v17 = vpop.f32.mrf.mxu0  ;;  %v2675_v7 = vld [vmem:[#allocation3 + $0x1a] ss:$2 sm:$0xff] }
 0x1f3   : > { %2583 = vst.msk [vmem:[#allocation3 + $0x91] sm:$0xff] %vm1744_vm14, %v2505_v50  ;;  %v2117_v47 = vadd.f32 %v3598_v17, %v4686_v52  ;;  %v2300_v20 = vpop.f32.mrf.mxu1 }
 0x1f4   : > { %v2503_v30 = vsel %vm2432_vm12, %v2400_v53, %v2471_v38  ;;  %vm2435_vm13 = vcmp.ge.f32.partialorder %v2403_v27, 0.0  ;;  %v2474_v25 = vmul.f32 %v4750_v59, %v2403_v27  ;;  %v2401_v37 = vadd.f32 %v2300_v20, %v2096_v44  ;;  %v2108_v31 = vpop.f32.mrf.mxu0 }
 0x1f5   : > { %2581 = vst.msk [vmem:[#allocation3 + $0x79] sm:$0xff] %vm1744_vm14, %v2503_v30  ;;  %v2109_v45 = vadd.f32 %v2108_v31, %v4688_v3  ;;  %v3632_v56 = vpop.f32.mrf.mxu1 }
 0x1f6   : > { %v2506_v19 = vsel %vm2435_vm13, %v2403_v27, %v2474_v25  ;;  %vm2433_vm15 = vcmp.ge.f32.partialorder %v2401_v37, 0.0  ;;  %v2472_v34 = vmul.f32 %v4750_v59, %v2401_v37  ;;  %v2406_v26 = vadd.f32 %v3632_v56, %v2117_v47  ;;  %v3599_v9 = vpop.f32.mrf.mxu0  ;;  %v3826_v56 = vld [vmem:[%s4979_s5 + $0xc] sm:$0xff]  }
 0x1f7   : > { %2584 = vst.msk [vmem:[#allocation3 + $0x99] sm:$0xff] %vm1744_vm14, %v2506_v19  ;;  %v2120_v52 = vadd.f32 %v3599_v9, %v4690_v40  ;;  %v2313_v21 = vpop.f32.mrf.mxu1  ;;  %3652 = vmatprep.subr.bf16.mxu0 %v3826_v56 }
 0x1f8   : > { %v2504_v6 = vsel %vm2433_vm15, %v2401_v37, %v2472_v34  ;;  %vm2438_vm0 = vcmp.ge.f32.partialorder %v2406_v26, 0.0  ;;  %v2477_v35 = vmul.f32 %v4750_v59, %v2406_v26  ;;  %v2404_v36 = vadd.f32 %v2313_v21, %v2109_v45  ;;  %v2111_v22 = vpop.f32.mrf.mxu0  ;;  %v2645_v3 = vld [vmem:[#allocation3 + $0x49] ss:$2 sm:$0xff]  ;;  %v2679_v39 = vld [vmem:[#allocation3 + $0x4a] ss:$2 sm:$0xff]  ;;  %3653 = vmatpush3.bf16.msra.mxu0 %v3826_v56 }
 0x1f9   : > { %2582 = vst.msk [vmem:[#allocation3 + $0x81] sm:$0xff] %vm1744_vm14, %v2504_v6  ;;  %v2112_v15 = vadd.f32 %v2111_v22, %v4692_v46  ;;  %v3633_v24 = vpop.f32.mrf.mxu1  ;;  %v3706_v57 = vpack.i.bf16 %v2645_v3, %v2641_v61  ;;  %v3711_v27 = vpack.i.bf16 %v2679_v39, %v2675_v7 }
 0x1fa   : > { %v2509_v2 = vsel %vm2438_vm0, %v2406_v26, %v2477_v35  ;;  %vm2436_vm1 = vcmp.ge.f32.partialorder %v2404_v36, 0.0  ;;  %v2475_v8 = vmul.f32 %v4750_v59, %v2404_v36  ;;  %v2407_v40 = vadd.f32 %v3633_v24, %v2120_v52  ;;  %v3602_v43 = vpop.f32.mrf.mxu0 }
 0x1fb   : > { %2587 = vst.msk [vmem:[#allocation3 + $0xc1] sm:$0xff] %vm1744_vm14, %v2509_v2  ;;  %v2133_v41 = vadd.f32 %v3602_v43, %v4694_v0  ;;  %v2316_v60 = vpop.f32.mrf.mxu1  ;;  %3707 = vrot.lane.b32.xlu0 %v3706_v57, %s3849_s19 }
 0x1fc   : > { %v2507_v53 = vsel %vm2436_vm1, %v2404_v36, %v2475_v8  ;;  %vm2439_vm3 = vcmp.ge.f32.partialorder %v2407_v40, 0.0  ;;  %v2478_v46 = vmul.f32 %v4750_v59, %v2407_v40  ;;  %v2405_v55 = vadd.f32 %v2316_v60, %v2112_v15  ;;  %v2124_v44 = vpop.f32.mrf.mxu0 }
 0x1fd   : > { %2585 = vst.msk [vmem:[#allocation3 + $0xa9] sm:$0xff] %vm1744_vm14, %v2507_v53  ;;  %v2125_v50 = vadd.f32 %v2124_v44, %v4696_v4  ;;  %v3636_v38 = vpop.f32.mrf.mxu1 }
 0x1fe   : > { %v2510_v17 = vsel %vm2439_vm3, %v2407_v40, %v2478_v46  ;;  %vm2437_vm4 = vcmp.ge.f32.partialorder %v2405_v55, 0.0  ;;  %v2476_v0 = vmul.f32 %v4750_v59, %v2405_v55  ;;  %v2410_v47 = vadd.f32 %v3636_v38, %v2133_v41  ;;  %v3603_v20 = vpop.f32.mrf.mxu0 }
 0x1ff   : > { %2588 = vst.msk [vmem:[#allocation3 + $0xc9] sm:$0xff] %vm1744_vm14, %v2510_v17  ;;  %v2136_v30 = vadd.f32 %v3603_v20, %v4698_v10  ;;  %v2329_v25 = vpop.f32.mrf.mxu1  ;;  %3712 = vrot.lane.b32.xlu0 %v3711_v27, %s3852_s18 }
 0x200   : > { %v2508_v37 = vsel %vm2437_vm4, %v2405_v55, %v2476_v0  ;;  %vm2442_vm5 = vcmp.ge.f32.partialorder %v2410_v47, 0.0  ;;  %v2481_v4 = vmul.f32 %v4750_v59, %v2410_v47  ;;  %v2408_v31 = vadd.f32 %v2329_v25, %v2125_v50  ;;  %v2127_v45 = vpop.f32.mrf.mxu0  ;;  %v2649_v60 = vld [vmem:[#allocation3 + $0x79] ss:$2 sm:$0xff] }
 0x201   : > { %2586 = vst.msk [vmem:[#allocation3 + $0xb1] sm:$0xff] %vm1744_vm14, %v2508_v37  ;;  %v2128_v19 = vadd.f32 %v2127_v45, %v4700_v11  ;;  %v3637_v34 = vpop.f32.mrf.mxu1 }
 0x202   : > { %v2513_v10 = vsel %vm2442_vm5, %v2410_v47, %v2481_v4  ;;  %vm2440_vm6 = vcmp.ge.f32.partialorder %v2408_v31, 0.0  ;;  %v2479_v26 = vmul.f32 %v4750_v59, %v2408_v31  ;;  %v2411_v9 = vadd.f32 %v3637_v34, %v2136_v30  ;;  %v3606_v52 = vpop.f32.mrf.mxu0  ;;  %v2683_v30 = vld [vmem:[#allocation3 + $0x7a] ss:$2 sm:$0xff] }
 0x203   : > { %2591 = vst.msk [vmem:[#allocation3 + $0xf1] sm:$0xff] %vm1744_vm14, %v2513_v10  ;;  %v2149_v21 = vadd.f32 %v3606_v52, %v4702_v23  ;;  %v2332_v6 = vpop.f32.mrf.mxu1 }
 0x204   : > { %v2511_v35 = vsel %vm2440_vm6, %v2408_v31, %v2479_v26  ;;  %vm2443_vm7 = vcmp.ge.f32.partialorder %v2411_v9, 0.0  ;;  %v2482_v36 = vmul.f32 %v4750_v59, %v2411_v9  ;;  %v2409_v22 = vadd.f32 %v2332_v6, %v2128_v19  ;;  %v2140_v11 = vpop.f32.mrf.mxu0 }
 0x205   : > { %2589 = vst.msk [vmem:[#allocation3 + $0xd9] sm:$0xff] %vm1744_vm14, %v2511_v35  ;;  %v2141_v61 = vadd.f32 %v2140_v11, %v4704_v12  ;;  %v3640_v3 = vpop.f32.mrf.mxu1 }
 0x206   : > { %v2514_v15 = vsel %vm2443_vm7, %v2411_v9, %v2482_v36  ;;  %vm2441_vm8 = vcmp.ge.f32.partialorder %v2409_v22, 0.0  ;;  %v2480_v24 = vmul.f32 %v4750_v59, %v2409_v22  ;;  %v2414_v57 = vadd.f32 %v3640_v3, %v2149_v21  ;;  %v3607_v2 = vpop.f32.mrf.mxu0 }
 0x207   : > { %2592 = vst.msk [vmem:[#allocation3 + $0xf9] sm:$0xff] %vm1744_vm14, %v2514_v15  ;;  %v2152_v23 = vadd.f32 %v3607_v2, %v4708_v14  ;;  %v2345_v8 = vpop.f32.mrf.mxu1  ;;  %vm2778_vm7 = vcmask 130048  }
 0x208   : > { %v2512_v40 = vsel %vm2441_vm8, %v2409_v22, %v2480_v24  ;;  %vm2446_vm9 = vcmp.ge.f32.partialorder %v2414_v57, 0.0  ;;  %v2485_v43 = vmul.f32 %v4750_v59, %v2414_v57  ;;  %v2412_v39 = vadd.f32 %v2345_v8, %v2141_v61  ;;  %v2143_v41 = vpop.f32.mrf.mxu0  ;;  %v2653_v12 = vld [vmem:[#allocation3 + $0xa9] ss:$2 sm:$0xff]  ;;  %v2687_v38 = vld [vmem:[#allocation3 + $0xaa] ss:$2 sm:$0xff] }
 0x209   : > { %2590 = vst.msk [vmem:[#allocation3 + $0xe1] sm:$0xff] %vm1744_vm14, %v2512_v40  ;;  %v2144_v53 = vadd.f32 %v2143_v41, %v4712_v29  ;;  %v3641_v46 = vpop.f32.mrf.mxu1  ;;  %v3716_v55 = vpack.i.bf16 %v2653_v12, %v2649_v60  ;;  %v3721_v4 = vpack.i.bf16 %v2687_v38, %v2683_v30  ;;  %v2639_v30 = vld [vmem:[#allocation3 + $0x1] ss:$2 sm:$0xff]  ;;  %vm2891_vm8 = vcmask 195584  }
 0x20a   : > { %v2517_v44 = vsel %vm2446_vm9, %v2414_v57, %v2485_v43  ;;  %vm2444_vm10 = vcmp.ge.f32.partialorder %v2412_v39, 0.0  ;;  %v2483_v7 = vmul.f32 %v4750_v59, %v2412_v39  ;;  %v2415_v14 = vadd.f32 %v3641_v46, %v2152_v23  ;;  %v3610_v50 = vpop.f32.mrf.mxu0 }
 0x20b   : > { %2595 = vst.msk [vmem:[#allocation3 + $0x121] sm:$0xff] %vm1744_vm14, %v2517_v44  ;;  %v2165_v27 = vadd.f32 %v3610_v50, %v4721_v58  ;;  %v2348_v17 = vpop.f32.mrf.mxu1  ;;  %3717 = vrot.lane.b32.xlu1 %v3716_v55, %s3849_s19 }
 0x20c   : > { %v2515_v0 = vsel %vm2444_vm10, %v2412_v39, %v2483_v7  ;;  %vm2447_vm11 = vcmp.ge.f32.partialorder %v2415_v14, 0.0  ;;  %v2486_v29 = vmul.f32 %v4750_v59, %v2415_v14  ;;  %v2413_v47 = vadd.f32 %v2348_v17, %v2144_v53  ;;  %v2156_v20 = vpop.f32.mrf.mxu0 }
 0x20d   : > { %2593 = vst.msk [vmem:[#allocation3 + $0x109] sm:$0xff] %vm1744_vm14, %v2515_v0  ;;  %v2157_v25 = vadd.f32 %v2156_v20, %v4725_v54  ;;  %v3644_v37 = vpop.f32.mrf.mxu1 }
 0x20e   : > { %v2518_v31 = vsel %vm2447_vm11, %v2415_v14, %v2486_v29  ;;  %vm2445_vm12 = vcmp.ge.f32.partialorder %v2413_v47, 0.0  ;;  %v2484_v58 = vmul.f32 %v4750_v59, %v2413_v47  ;;  %v2418_v45 = vadd.f32 %v3644_v37, %v2165_v27  ;;  %v3611_v56 = vpop.f32.mrf.mxu0 }
 0x20f   : > { %2596 = vst.msk [vmem:[#allocation3 + $0x129] sm:$0xff] %vm1744_vm14, %v2518_v31  ;;  %v2168_v19 = vadd.f32 %v3611_v56, %v4729_v1  ;;  %v2361_v34 = vpop.f32.mrf.mxu1  ;;  %3722 = vrot.lane.b32.xlu1 %v3721_v4, %s3852_s18  ;;  %v4856_v31 = vld [vmem:[%s4979_s5 + $0x8] ss:$0 sps:$4 sm:$0xff]   ;;  %v2659_v56 = vld [vmem:[#allocation3 + $0xf1] ss:$2 sm:$0xff] }
 0x210   : > { %v2516_v10 = vsel %vm2445_vm12, %v2413_v47, %v2484_v58  ;;  %vm2450_vm13 = vcmp.ge.f32.partialorder %v2418_v45, 0.0  ;;  %v2489_v26 = vmul.f32 %v4750_v59, %v2418_v45  ;;  %v2416_v54 = vadd.f32 %v2361_v34, %v2157_v25  ;;  %v2159_v9 = vpop.f32.mrf.mxu0  ;;  %v2657_v53 = vld [vmem:[#allocation3 + $0xd9] ss:$2 sm:$0xff]  ;;  %v2691_v29 = vld [vmem:[#allocation3 + $0xda] ss:$2 sm:$0xff]  ;;  %3691 = vmatprep.subr.msk.bf16.mxu0 %vm2904_vm2, %v4856_v31 }
 0x211   : > { %2594 = vst.msk [vmem:[#allocation3 + $0x111] sm:$0xff] %vm1744_vm14, %v2516_v10  ;;  %v2160_v52 = vadd.f32 %v2159_v9, %v4733_v48  ;;  %v3645_v21 = vpop.f32.mrf.mxu1  ;;  %v2643_v25 = vld [vmem:[#allocation3 + $0x31] ss:$2 sm:$0xff]  ;;  %v2673_v58 = vld [vmem:[#allocation3 + $0x2] ss:$2 sm:$0xff] }
 0x212   : > { %v2521_v6 = vsel %vm2450_vm13, %v2418_v45, %v2489_v26  ;;  %vm2448_vm15 = vcmp.ge.f32.partialorder %v2416_v54, 0.0  ;;  %v2487_v35 = vmul.f32 %v4750_v59, %v2416_v54  ;;  %v2419_v36 = vadd.f32 %v3645_v21, %v2168_v19  ;;  %v3614_v1 = vpop.f32.mrf.mxu0  ;;  %v2677_v45 = vld [vmem:[#allocation3 + $0x32] ss:$2 sm:$0xff]  ;;  %v2655_v10 = vld [vmem:[#allocation3 + $0xc1] ss:$2 sm:$0xff] }
 0x213   : > { %2599 = vst.msk [vmem:[#allocation3 + $0x151] sm:$0xff] %vm1744_vm14, %v2521_v6  ;;  %v2181_v22 = vadd.f32 %v3614_v1, %v4737_v33  ;;  %v2364_v11 = vpop.f32.mrf.mxu1  ;;  %v3736_v4 = vpack.i.bf16 %v2643_v25, %v2639_v30  ;;  %v2689_v6 = vld [vmem:[#allocation3 + $0xc2] ss:$2 sm:$0xff]  ;;  %v2651_v1 = vld [vmem:[#allocation3 + $0x91] ss:$2 sm:$0xff] }
 0x214   : > { %v2519_v61 = vsel %vm2448_vm15, %v2416_v54, %v2487_v35  ;;  %vm2451_vm0 = vcmp.ge.f32.partialorder %v2419_v36, 0.0  ;;  %v2490_v3 = vmul.f32 %v4750_v59, %v2419_v36  ;;  %v2417_v15 = vadd.f32 %v2364_v11, %v2160_v52  ;;  %v2172_v24 = vpop.f32.mrf.mxu0  ;;  %v2693_v52 = vld [vmem:[#allocation3 + $0xf2] ss:$2 sm:$0xff] }
 0x215   : > { %2597 = vst.msk [vmem:[#allocation3 + $0x139] sm:$0xff] %vm1744_vm14, %v2519_v61  ;;  %v2173_v48 = vadd.f32 %v2172_v24, %v4739_v16  ;;  %v3648_v57 = vpop.f32.mrf.mxu1  ;;  %v3766_v54 = vpack.i.bf16 %v2659_v56, %v2655_v10  ;;  %v2623_v10 = vld [vmem:[#allocation3 + $0xd8] ss:$2 sm:$0xff] }
 0x216   : > { %v2522_v2 = vsel %vm2451_vm0, %v2419_v36, %v2490_v3  ;;  %vm2449_vm1 = vcmp.ge.f32.partialorder %v2417_v15, 0.0  ;;  %v2488_v23 = vmul.f32 %v4750_v59, %v2417_v15  ;;  %v2422_v8 = vadd.f32 %v3648_v57, %v2181_v22  ;;  %v3615_v40 = vpop.f32.mrf.mxu0  ;;  %v2647_v22 = vld [vmem:[#allocation3 + $0x61] ss:$2 sm:$0xff]  ;;  %v2685_v3 = vld [vmem:[#allocation3 + $0x92] ss:$2 sm:$0xff] }
 0x217   : > { %2600 = vst.msk [vmem:[#allocation3 + $0x159] sm:$0xff] %vm1744_vm14, %v2522_v2  ;;  %v2184_v33 = vadd.f32 %v3615_v40, %v4743_v18  ;;  %v2377_v43 = vpop.f32.mrf.mxu1  ;;  %v3776_v36 = vpack.i.bf16 %v2693_v52, %v2689_v6  ;;  %v3751_v11 = vpack.i.bf16 %v2651_v1, %v2647_v22  ;;  %v2663_v57 = vld [vmem:[#allocation3 + $0x121] ss:$2 sm:$0xff] }
 0x218   : > { %v2520_v39 = vsel %vm2449_vm1, %v2417_v15, %v2488_v23  ;;  %vm2454_vm3 = vcmp.ge.f32.partialorder %v2422_v8, 0.0  ;;  %v2493_v41 = vmul.f32 %v4750_v59, %v2422_v8  ;;  %v2420_v60 = vadd.f32 %v2377_v43, %v2173_v48  ;;  %v2175_v12 = vpop.f32.mrf.mxu0  ;;  %v2661_v16 = vld [vmem:[#allocation3 + $0x109] ss:$2 sm:$0xff]  ;;  %v2695_v50 = vld [vmem:[#allocation3 + $0x10a] ss:$2 sm:$0xff] }
 0x219   : > { %2598 = vst.msk [vmem:[#allocation3 + $0x141] sm:$0xff] %vm1744_vm14, %v2520_v39  ;;  %v2176_v46 = vadd.f32 %v2175_v12, %v4745_v32  ;;  %v3649_v55 = vpop.f32.mrf.mxu1  ;;  %v3726_v44 = vpack.i.bf16 %v2661_v16, %v2657_v53  ;;  %v3731_v32 = vpack.i.bf16 %v2695_v50, %v2691_v29  ;;  %v2681_v15 = vld [vmem:[#allocation3 + $0x62] ss:$2 sm:$0xff] }
 0x21a   : > { %v2525_v7 = vsel %vm2454_vm3, %v2422_v8, %v2493_v41  ;;  %vm2452_vm4 = vcmp.ge.f32.partialorder %v2420_v60, 0.0  ;;  %v2491_v14 = vmul.f32 %v4750_v59, %v2420_v60  ;;  %v2423_v18 = vadd.f32 %v3649_v55, %v2184_v33  ;;  %v2697_v8 = vld [vmem:[#allocation3 + $0x122] ss:$2 sm:$0xff] }
 0x21b   : > { %2603 = vst.msk [vmem:[#allocation3 + $0x181] sm:$0xff] %vm1744_vm14, %v2525_v7  ;;  %v2380_v38 = vpop.f32.mrf.mxu1  ;;  %3727 = vrot.lane.b32.xlu0 %v3726_v44, %s3849_s19  ;;  %v3761_v24 = vpack.i.bf16 %v2685_v3, %v2681_v15  ;;  %v2611_v12 = vld [vmem:[#allocation3 + $0x48] ss:$2 sm:$0xff]  ;;  %v2607_v53 = vld [vmem:[#allocation3 + $0x18] ss:$2 sm:$0xff] }
 0x21c   : > { %v2523_v27 = vsel %vm2452_vm4, %v2420_v60, %v2491_v14  ;;  %vm2455_vm5 = vcmp.ge.f32.partialorder %v2423_v18, 0.0  ;;  %v2494_v17 = vmul.f32 %v4750_v59, %v2423_v18  ;;  %v2421_v0 = vadd.f32 %v2380_v38, %v2176_v46  ;;  %v2615_v29 = vld [vmem:[#allocation3 + $0x78] ss:$2 sm:$0xff] }
 0x21d   : > { %2601 = vst.msk [vmem:[#allocation3 + $0x169] sm:$0xff] %vm1744_vm14, %v2523_v27 }
 0x21e   : > { %v2526_v47 = vsel %vm2455_vm5, %v2423_v18, %v2494_v17  ;;  %vm2453_vm6 = vcmp.ge.f32.partialorder %v2421_v0, 0.0  ;;  %v2492_v20 = vmul.f32 %v4750_v59, %v2421_v0  ;;  %v3756_v59 = vpack.i.bf16 %v2677_v45, %v2673_v58  ;;  %v2667_v48 = vld [vmem:[#allocation3 + $0x151] ss:$2 sm:$0xff]  ;;  %v2701_v23 = vld [vmem:[#allocation3 + $0x152] ss:$2 sm:$0xff]  ;;  %v3828_v45 = vld [vmem:[%s4979_s5] sm:$0xff]  }
 0x21f   : > { %2604 = vst.msk [vmem:[#allocation3 + $0x189] sm:$0xff] %vm1744_vm14, %v2526_v47  ;;  %3732 = vrot.lane.b32.xlu0 %v3731_v32, %s3852_s18  ;;  %v3771_v2 = vpack.i.bf16 %v2667_v48, %v2663_v57  ;;  %v3781_v40 = vpack.i.bf16 %v2701_v23, %v2697_v8  ;;  %v2995_v58 = vsel %vm2904_vm2, %v4856_v31, 0  ;;  %v2609_v8 = vld [vmem:[#allocation3 + $0x30] ss:$2 sm:$0xff] }
 0x220   : > { %v2524_v37 = vsel %vm2453_vm6, %v2421_v0, %v2492_v20  ;;  %v2665_v19 = vld [vmem:[#allocation3 + $0x139] ss:$2 sm:$0xff]  ;;  %v2699_v21 = vld [vmem:[#allocation3 + $0x13a] ss:$2 sm:$0xff] }
 0x221   : > { %2602 = vst.msk [vmem:[#allocation3 + $0x171] sm:$0xff] %vm1744_vm14, %v2524_v37  ;;  %v2619_v0 = vld [vmem:[#allocation3 + $0xa8] ss:$2 sm:$0xff] }
 0x223   : > { %3737 = vrot.lane.b32.xlu0 %v3736_v4, %s3849_s19 }
 0x226   : > { %v2671_v61 = vld [vmem:[#allocation3 + $0x181] ss:$2 sm:$0xff]  ;;  %v2705_v33 = vld [vmem:[#allocation3 + $0x182] ss:$2 sm:$0xff] }
 0x227   : > { %3757 = vrot.lane.b32.xlu0 %v3756_v59, %s3852_s18  ;;  %v4890_v59 = vld [vmem:[%s4979_s5 + $0x20] ss:$0 sps:$4 sm:$0xff]  }
 0x228   : > { %v2669_v34 = vld [vmem:[#allocation3 + $0x169] ss:$2 sm:$0xff]  ;;  %v2703_v9 = vld [vmem:[#allocation3 + $0x16a] ss:$2 sm:$0xff] }
 0x229   : > { %v3741_v26 = vpack.i.bf16 %v2669_v34, %v2665_v19  ;;  %v3746_v35 = vpack.i.bf16 %v2703_v9, %v2699_v21 }
 0x22b   : > { %3742 = vrot.lane.b32.xlu1 %v3741_v26, %s3849_s19  ;;  %3767 = vrot.lane.b32.xlu0 %v3766_v54, %s3849_s19  ;;  %v2627_v26 = vld [vmem:[#allocation3 + $0x108] ss:$2 sm:$0xff] }
 0x22f   : > { %3747 = vrot.lane.b32.xlu1 %v3746_v35, %s3852_s18  ;;  %3777 = vrot.lane.b32.xlu0 %v3776_v36, %s3852_s18 }
 0x233   : > { %3752 = vrot.lane.b32.xlu1 %v3751_v11, %s3849_s19  ;;  %3063 = vrot.lane.b32.xlu0 %v2671_v61, %s3849_s19 }
 0x237   : > { %3762 = vrot.lane.b32.xlu1 %v3761_v24, %s3852_s18  ;;  %v2605_v24 = vld [vmem:[#allocation3] ss:$2 sm:$0xff] }
 0x23b   : > { %3772 = vrot.lane.b32.xlu1 %v3771_v2, %s3849_s19 }
 0x23f   : > { %3782 = vrot.lane.b32.xlu1 %v3781_v40, %s3852_s18 }
 0x243   : > { %3067 = vrot.lane.b32.xlu1 %v2705_v33, %s3852_s18 }
 0x26d   : > { %v3708_v43 = vpop.permute.xlu0 %3707 }
 0x26e   : > { %v3710_v39 = vunpack.i.h.bf16 %v3708_v43  ;;  %v3709_v41 = vunpack.i.l.bf16 %v3708_v43 }
 0x270   : > { %v2859_v55 = vsel %vm1744_vm14, %v2611_v12, %v3710_v39  ;;  %v2858_v44 = vsel %vm1744_vm14, %v2607_v53, %v3709_v41  ;;  %v2631_v39 = vld [vmem:[#allocation3 + $0x138] ss:$2 sm:$0xff]  ;;  %v2635_v41 = vld [vmem:[#allocation3 + $0x168] ss:$2 sm:$0xff] }
 0x271   : > { %v3713_v60 = vpop.permute.xlu0 %3712 }
 0x272   : > { %v3715_v16 = vunpack.i.h.bf16 %v3713_v60  ;;  %v3714_v46 = vunpack.i.l.bf16 %v3713_v60 }
 0x274   : > { %v2866_v7 = vsel %vm2778_vm7, %v2858_v44, %v3714_v46  ;;  %v2867_v14 = vsel %vm2778_vm7, %v2859_v55, %v3715_v16 }
 0x275   : > { %v2874_v18 = vpack.c.bf16 %v2867_v14, %v2866_v7 }
 0x277   : > { %3654 = vmatprep.mubr.msk.bf16.mxu0 %vm2891_vm8, %v2874_v18 }
 0x27d   : > { %v3718_v50 = vpop.permute.xlu1 %3717 }
 0x27e   : > { %v3720_v38 = vunpack.i.h.bf16 %v3718_v50  ;;  %v3719_v27 = vunpack.i.l.bf16 %v3718_v50 }
 0x280   : > { %v2861_v20 = vsel %vm1744_vm14, %v2619_v0, %v3720_v38  ;;  %v2860_v30 = vsel %vm1744_vm14, %v2615_v29, %v3719_v27 }
 0x281   : > { %v3723_v17 = vpop.permute.xlu1 %3722 }
 0x282   : > { %v3725_v32 = vunpack.i.h.bf16 %v3723_v17  ;;  %v3724_v47 = vunpack.i.l.bf16 %v3723_v17 }
 0x284   : > { %v2868_v25 = vsel %vm2778_vm7, %v2860_v30, %v3724_v47  ;;  %v2869_v37 = vsel %vm2778_vm7, %v2861_v20, %v3725_v32  ;;  %v2621_v20 = vld [vmem:[#allocation3 + $0xc0] ss:$2 sm:$0xff]  ;;  %v2625_v30 = vld [vmem:[#allocation3 + $0xf0] ss:$2 sm:$0xff] }
 0x285   : > { %v2875_v4 = vpack.c.bf16 %v2869_v37, %v2868_v25 }
 0x287   : > { %3655 = vmatmul.mubr.msk.bf16.vlgmr.msra.gmra.mxu0 %vm2891_vm8, %v2875_v4 }
 0x288   : > { %3663 = vmatpush3.bf16.msra.mxu0 %v2995_v58  ;;  %v2613_v58 = vld [vmem:[#allocation3 + $0x60] ss:$2 sm:$0xff] }
 0x289   : > { %3664 = vmatprep.subr.bf16.mxu0 %v3828_v45 }
 0x28c   : > { %3665 = vmatpush3.bf16.msra.mxu0 %v3828_v45  ;;  %v2617_v45 = vld [vmem:[#allocation3 + $0x90] ss:$2 sm:$0xff] }
 0x28d   : > { %v3728_v56 = vpop.permute.xlu0 %3727  ;;  %3692 = vmatprep.subr.msk.bf16.mxu0 %vm2904_vm2, %v4890_v59 }
 0x28e   : > { %v3730_v19 = vunpack.i.h.bf16 %v3728_v56  ;;  %v3729_v31 = vunpack.i.l.bf16 %v3728_v56 }
 0x290   : > { %v2863_v52 = vsel %vm1744_vm14, %v2627_v26, %v3730_v19  ;;  %v2862_v21 = vsel %vm1744_vm14, %v2623_v10, %v3729_v31 }
 0x291   : > { %v3733_v34 = vpop.permute.xlu0 %3732 }
 0x292   : > { %v3735_v54 = vunpack.i.h.bf16 %v3733_v34  ;;  %v3734_v9 = vunpack.i.l.bf16 %v3733_v34 }
 0x294   : > { %v2870_v6 = vsel %vm2778_vm7, %v2862_v21, %v3734_v9  ;;  %v2871_v35 = vsel %vm2778_vm7, %v2863_v52, %v3735_v54 }
 0x295   : > { %v2876_v36 = vpack.c.bf16 %v2871_v35, %v2870_v6  ;;  %v3738_v1 = vpop.permute.xlu0 %3737  ;;  %v3102_v6 = vsel %vm2904_vm2, %v4890_v59, 0  ;;  %v3830_v35 = vld [vmem:[%s4979_s5 + $0x18] sm:$0xff]  }
 0x296   : > { %v3740_v61 = vunpack.i.h.bf16 %v3738_v1  ;;  %v3739_v3 = vunpack.i.l.bf16 %v3738_v1 }
 0x297   : > { %3658 = vmatprep.mubr.msk.bf16.mxu0 %vm2891_vm8, %v2876_v36 }
 0x298   : > { %v2771_v33 = vsel %vm1744_vm14, %v2609_v8, %v3740_v61  ;;  %v2770_v43 = vsel %vm1744_vm14, %v2605_v24, %v3739_v3  ;;  %v2629_v61 = vld [vmem:[#allocation3 + $0x120] ss:$2 sm:$0xff]  ;;  %v2633_v24 = vld [vmem:[#allocation3 + $0x150] ss:$2 sm:$0xff] }
 0x299   : > { %v3758_v22 = vpop.permute.xlu0 %3757 }
 0x29a   : > { %v3760_v48 = vunpack.i.h.bf16 %v3758_v22  ;;  %v3759_v57 = vunpack.i.l.bf16 %v3758_v22 }
 0x29c   : > { %v2779_v53 = vsel %vm2778_vm7, %v2770_v43, %v3759_v57  ;;  %v2780_v16 = vsel %vm2778_vm7, %v2771_v33, %v3760_v48 }
 0x29d   : > { %v3743_v11 = vpop.permute.xlu1 %3742  ;;  %v3768_v15 = vpop.permute.xlu0 %3767  ;;  %v2787_v38 = vpack.c.bf16 %v2780_v16, %v2779_v53 }
 0x29e   : > { %v3745_v2 = vunpack.i.h.bf16 %v3743_v11  ;;  %v3744_v23 = vunpack.i.l.bf16 %v3743_v11  ;;  %v3770_v27 = vunpack.i.h.bf16 %v3768_v15  ;;  %v3769_v17 = vunpack.i.l.bf16 %v3768_v15 }
 0x2a0   : > { %v2865_v46 = vsel %vm1744_vm14, %v2635_v41, %v3745_v2  ;;  %v2864_v55 = vsel %vm1744_vm14, %v2631_v39, %v3744_v23  ;;  %v2775_v37 = vsel %vm1744_vm14, %v2625_v30, %v3770_v27  ;;  %v2774_v4 = vsel %vm1744_vm14, %v2621_v20, %v3769_v17  ;;  %v2637_v41 = vld [vmem:[#allocation3 + $0x180] ss:$2 sm:$0xff] }
 0x2a1   : > { %v3748_v40 = vpop.permute.xlu1 %3747  ;;  %v3778_v14 = vpop.permute.xlu0 %3777 }
 0x2a2   : > { %v3750_v60 = vunpack.i.h.bf16 %v3748_v40  ;;  %v3749_v12 = vunpack.i.l.bf16 %v3748_v40  ;;  %v3780_v0 = vunpack.i.h.bf16 %v3778_v14  ;;  %v3779_v29 = vunpack.i.l.bf16 %v3778_v14 }
 0x2a4   : > { %v2872_v44 = vsel %vm2778_vm7, %v2864_v55, %v3749_v12  ;;  %v2873_v7 = vsel %vm2778_vm7, %v2865_v46, %v3750_v60  ;;  %v2783_v31 = vsel %vm2778_vm7, %v2774_v4, %v3779_v29  ;;  %v2784_v34 = vsel %vm2778_vm7, %v2775_v37, %v3780_v0  ;;  %v3427_v4 = vld [vmem:[%s4980_s6] ss:$0 sm:$0xff] }
 0x2a5   : > { %v2877_v18 = vpack.c.bf16 %v2873_v7, %v2872_v44  ;;  %v3753_v50 = vpop.permute.xlu1 %3752  ;;  %v2789_v36 = vpack.c.bf16 %v2784_v34, %v2783_v31  ;;  %v3064_v33 = vpop.permute.xlu0 %3063 }
 0x2a6   : > { %v3755_v32 = vunpack.i.h.bf16 %v3753_v50  ;;  %v3754_v47 = vunpack.i.l.bf16 %v3753_v50  ;;  %v3070_v60 = vsel %vm1744_vm14, %v2637_v41, %v3064_v33 }
 0x2a7   : > { %3659 = vmatmul.mubr.msk.bf16.gmra.mxu0 %vm2891_vm8, %v2877_v18 }
 0x2a8   : > { %3666 = vmatprep.mubr.msk.bf16.mxu0 %vm2891_vm8, %v2787_v38  ;;  %v2773_v10 = vsel %vm1744_vm14, %v2617_v45, %v3755_v32  ;;  %v2772_v26 = vsel %vm1744_vm14, %v2613_v58, %v3754_v47 }
 0x2a9   : > { %v3763_v25 = vpop.permute.xlu1 %3762 }
 0x2aa   : > { %v3765_v56 = vunpack.i.h.bf16 %v3763_v25  ;;  %v3764_v19 = vunpack.i.l.bf16 %v3763_v25  ;;  %v3272_v25 = vld [vmem:[%s4982_s8] ss:$0 sm:$0xff] }
 0x2ac   : > { %v2781_v54 = vsel %vm2778_vm7, %v2772_v26, %v3764_v19  ;;  %v2782_v9 = vsel %vm2778_vm7, %v2773_v10, %v3765_v56  ;;  %v469_v19 = vadd.f32 %v4706_v13, %v3272_v25  ;;  %v461_v26 = vadd.f32 %v3272_v25, %v4710_v28 }
 0x2ad   : > { %v2788_v52 = vpack.c.bf16 %v2782_v9, %v2781_v54  ;;  %v3773_v21 = vpop.permute.xlu1 %3772  ;;  %v3072_v8 = vpack.c.bf16 %v2781_v54, %v2780_v16  ;;  %v3073_v40 = vpack.c.bf16 %v2783_v31, %v2782_v9 }
 0x2ae   : > { %v3775_v1 = vunpack.i.h.bf16 %v3773_v21  ;;  %v3774_v22 = vunpack.i.l.bf16 %v3773_v21 }
 0x2af   : > { %3667 = vmatmul.mubr.msk.bf16.vlgmr.msra.gmra.mxu0 %vm2891_vm8, %v2788_v52 }
 0x2b0   : > { %3675 = vmatpush3.bf16.msra.mxu0 %v3102_v6  ;;  %3670 = vmatprep.mubr.msk.bf16.mxu0 %vm2891_vm8, %v2789_v36  ;;  %v2776_v59 = vsel %vm1744_vm14, %v2629_v61, %v3774_v22  ;;  %v2777_v48 = vsel %vm1744_vm14, %v2633_v24, %v3775_v1 }
 0x2b1   : > { %v3783_v11 = vpop.permute.xlu1 %3782  ;;  %3676 = vmatprep.subr.bf16.mxu0 %v3830_v35 }
 0x2b2   : > { %v3785_v3 = vunpack.i.h.bf16 %v3783_v11  ;;  %v3784_v15 = vunpack.i.l.bf16 %v3783_v11  ;;  %v464_v11 = vadd.f32 %v3272_v25, %v4723_v62  ;;  %v477_v62 = vadd.f32 %v3272_v25, %v4731_v5 }
 0x2b4   : > { %v2785_v57 = vsel %vm2778_vm7, %v2776_v59, %v3784_v15  ;;  %v2786_v2 = vsel %vm2778_vm7, %v2777_v48, %v3785_v3  ;;  %3677 = vmatpush3.bf16.msra.mxu0 %v3830_v35  ;;  %v472_v35 = vadd.f32 %v4717_v49, %v3272_v25  ;;  %v485_v49 = vadd.f32 %v4727_v51, %v3272_v25 }
 0x2b5   : > { %v2790_v23 = vpack.c.bf16 %v2786_v2, %v2785_v57  ;;  %v3074_v43 = vpack.c.bf16 %v2785_v57, %v2784_v34  ;;  %v3068_v39 = vpop.permute.xlu1 %3067 }
 0x2b6   : > { %v3071_v12 = vsel %vm2778_vm7, %v3070_v60, %v3068_v39  ;;  %v488_v60 = vadd.f32 %v4735_v42, %v3272_v25 }
 0x2b7   : > { %3671 = vmatmul.mubr.msk.bf16.gmra.mxu0 %vm2891_vm8, %v2790_v23  ;;  %v3075_v53 = vpack.c.bf16 %v3071_v12, %v2786_v2 }
 0x2b8   : > { %3678 = vmatprep.mubr.msk.bf16.mxu0 %vm2891_vm8, %v3072_v8 }
 0x2bf   : > { %3679 = vmatmul.mubr.msk.bf16.vlgmr.msra.gmra.mxu0 %vm2891_vm8, %v3073_v40 }
 0x2c0   : > { %3682 = vmatprep.mubr.msk.bf16.mxu0 %vm2891_vm8, %v3074_v43 }
 0x2c7   : > { %3683 = vmatmul.mubr.msk.bf16.gmra.mxu0 %vm2891_vm8, %v3075_v53 }
 0x347   : > { %v3656_v16 = vpop.f32.mrf.mxu0 }
 0x349   : > { %v2942_v46 = vpop.f32.mrf.mxu0 }
 0x34b   : > { %v3657_v55 = vpop.f32.mrf.mxu0 }
 0x34d   : > { %v2945_v44 = vpop.f32.mrf.mxu0 }
 0x367   : > { %v3660_v7 = vpop.f32.mrf.mxu0 }
 0x369   : > { %v2958_v14 = vpop.f32.mrf.mxu0 }
 0x36b   : > { %v3661_v18 = vpop.f32.mrf.mxu0 }
 0x36d   : > { %v2961_v50 = vpop.f32.mrf.mxu0 }
 0x36f   : > { %v3668_v38 = vpop.f32.mrf.mxu0 }
 0x370   : > { %v3040_v30 = vadd.f32 %v3668_v38, %v3656_v16 }
 0x371   : > { %v3031_v27 = vpop.f32.mrf.mxu0 }
 0x372   : > { %v3032_v58 = vadd.f32 %v3031_v27, %v2942_v46  ;;  %v480_v46 = vadd.f32 %v3272_v25, %v4741_v63 }
 0x373   : > { %v3669_v17 = vpop.f32.mrf.mxu0 }
 0x374   : > { %v3043_v31 = vadd.f32 %v3669_v17, %v3657_v55 }
 0x375   : > { %v3034_v0 = vpop.f32.mrf.mxu0 }
 0x376   : > { %v3035_v9 = vadd.f32 %v3034_v0, %v2945_v44 }
 0x377   : > { %v3672_v29 = vpop.f32.mrf.mxu0 }
 0x378   : > { %v3056_v36 = vadd.f32 %v3672_v29, %v3660_v7 }
 0x379   : > { %v3047_v32 = vpop.f32.mrf.mxu0 }
 0x37a   : > { %v3048_v3 = vadd.f32 %v3047_v32, %v2958_v14 }
 0x37b   : > { %v3673_v47 = vpop.f32.mrf.mxu0 }
 0x37c   : > { %v3059_v57 = vadd.f32 %v3673_v47, %v3661_v18 }
 0x37d   : > { %v3050_v20 = vpop.f32.mrf.mxu0 }
 0x37e   : > { %v3051_v33 = vadd.f32 %v3050_v20, %v2961_v50 }
 0x37f   : > { %v3680_v37 = vpop.f32.mrf.mxu0 }
 0x380   : > { %v3171_v45 = vadd.f32 %v3680_v37, %v3040_v30 }
 0x381   : > { %v3138_v56 = vpop.f32.mrf.mxu0 }
 0x382   : > { %v3186_v34 = vadd.f32 %v3427_v4, %v3171_v45  ;;  %v3169_v10 = vadd.f32 %v3138_v56, %v3032_v58 }
 0x383   : > { %v3681_v54 = vpop.f32.mrf.mxu0 }
 0x384   : > { %v3194_v52 = vadd.f32 %v3186_v34, %v469_v19  ;;  %v3184_v21 = vadd.f32 %v3427_v4, %v3169_v10  ;;  %v3172_v6 = vadd.f32 %v3681_v54, %v3043_v31 }
 0x385   : > { %v3141_v13 = vpop.f32.mrf.mxu0 }
 0x386   : > { %3202 = vst.msk [vmem:[%s4947_s17 + $0x10] sm:$0xff] %vm1744_vm14, %v3194_v52  ;;  %v3192_v28 = vadd.f32 %v3184_v21, %v461_v26  ;;  %v3187_v1 = vadd.f32 %v3427_v4, %v3172_v6  ;;  %v3170_v22 = vadd.f32 %v3141_v13, %v3035_v9 }
 0x387   : > { %v3684_v61 = vpop.f32.mrf.mxu0 }
 0x388   : > { %3200 = vst.msk [vmem:[%s4947_s17] sm:$0xff] %vm1744_vm14, %v3192_v28  ;;  %v3195_v15 = vadd.f32 %v3187_v1, %v472_v35  ;;  %v3185_v24 = vadd.f32 %v3427_v4, %v3170_v22  ;;  %v3175_v59 = vadd.f32 %v3684_v61, %v3056_v36 }
 0x389   : > { %v3154_v48 = vpop.f32.mrf.mxu0 }
 0x38a   : > { %3203 = vst.msk [vmem:[%s4947_s17 + $0x18] sm:$0xff] %vm1744_vm14, %v3195_v15  ;;  %v3193_v2 = vadd.f32 %v3185_v24, %v464_v11  ;;  %v3190_v23 = vadd.f32 %v3427_v4, %v3175_v59  ;;  %v3173_v8 = vadd.f32 %v3154_v48, %v3048_v3 }
 0x38b   : > { %v3685_v40 = vpop.f32.mrf.mxu0 }
 0x38c   : > { %3201 = vst.msk [vmem:[%s4947_s17 + $0x8] sm:$0xff] %vm1744_vm14, %v3193_v2  ;;  %v3198_v43 = vadd.f32 %v3190_v23, %v485_v49  ;;  %v3188_v39 = vadd.f32 %v3427_v4, %v3173_v8  ;;  %v3176_v51 = vadd.f32 %v3685_v40, %v3059_v57 }
 0x38d   : > { %v3157_v41 = vpop.f32.mrf.mxu0 }
 0x38e   : > { %3206 = vst.msk [vmem:[%s4947_s17 + $0x30] sm:$0xff] %vm1744_vm14, %v3198_v43  ;;  %v3196_v12 = vadd.f32 %v3188_v39, %v477_v62  ;;  %v3191_v53 = vadd.f32 %v3427_v4, %v3176_v51  ;;  %v3174_v16 = vadd.f32 %v3157_v41, %v3051_v33 }
 0x390   : > { %3204 = vst.msk [vmem:[%s4947_s17 + $0x20] sm:$0xff] %vm1744_vm14, %v3196_v12  ;;  %v3199_v5 = vadd.f32 %v3191_v53, %v488_v60  ;;  %v3189_v55 = vadd.f32 %v3427_v4, %v3174_v16 }
 0x392   : > { %3207 = vst.msk [vmem:[%s4947_s17 + $0x38] sm:$0xff] %vm1744_vm14, %v3199_v5  ;;  %v3197_v44 = vadd.f32 %v3189_v55, %v480_v46 }
 0x394   : > { %3205 = vst.msk [vmem:[%s4947_s17 + $0x28] sm:$0xff] %vm1744_vm14, %v3197_v44 }
 0x395 PF: > { %s19_s30 = sadd.s32 1, %s3846_s30  }
 0x396   : > { %p16_p4 = scmp.ge.s32.totalorder %s19_s30, 4  }
 0x398   :  { %18 = sbr.rel (!%p16_p4) target bundleno = 1 (0x1), region = 151 }

</bundles_post_ra>
